<compile_context>
chip_gen: v7x
topology: tpu7x:2x2x1
jax: 0.10.0
libtpu: 0.0.40
codegen_flags: <defaults>
</compile_context>

<pallas_src>
import jax
import jax.numpy as jnp
from jax import lax
from jax.experimental import pallas as pl
from jax.experimental.pallas import tpu as pltpu

_EPS = 1e-5  # PyTorch BatchNorm2d default


# --------------------------------------------------------------------------- #
# In-kernel helpers
# --------------------------------------------------------------------------- #
def _shift_w(x, delta):
    """y[..., w, :] = x[..., w+delta, :], zero-filled at the W boundary.

    dx-shift step of the dy-slab conv scheme: one sublane shift of the
    full-width slab (equivalent to pltpu.roll + boundary mask; expressed as a
    zero-column concat so the conv zero boundary comes for free).
    """
    rows, W, C = x.shape
    zcol = jnp.zeros((rows, 1, C), x.dtype)
    if delta < 0:                                   # left neighbour (dx = 0 tap)
        return jnp.concatenate([zcol, x[:, :W - 1, :]], axis=1)
    return jnp.concatenate([x[:, 1:, :], zcol], axis=1)   # right neighbour (dx=2)


def _conv3x3_same(act, w_ref):
    """3x3 'same' conv of one image via 3 dy-slab MXU matmuls (K = 3*C each).

    act:   (H, W, C) bf16 value (pointwise prologue already applied).
    w_ref: (3, 3*C, Cout) bf16 ref; rows of w_ref[dy] ordered as kx*C + cin.
    Returns (H*W, Cout) float32.
    """
    H, W, C = act.shape
    zrow = jnp.zeros((1, W, C), act.dtype)
    cen = jnp.concatenate([zrow, act, zrow], axis=0)   # (H+2, W, C), H-padded
    lft = _shift_w(cen, -1)                            # dx = 0 tap
    rgt = _shift_w(cen, 1)                             # dx = 2 tap
    acc = None
    for dy in range(3):                                # unrolled: 3 matmuls
        blk = jnp.concatenate(
            [lft[dy:dy + H], cen[dy:dy + H], rgt[dy:dy + H]],
            axis=-1).reshape(H * W, 3 * C)             # (HW, 3C) bf16
        p = jnp.dot(blk, w_ref[dy], preferred_element_type=jnp.float32)
        acc = p if acc is None else acc + p
    return acc                                          # (HW, Cout) f32


def _moment_rows(acc):
    """(2, Cout) rows [sum; sum of squares] of an (HW, Cout) f32 block."""
    return jnp.concatenate(
        [jnp.sum(acc, axis=0, keepdims=True),
         jnp.sum(acc * acc, axis=0, keepdims=True)], axis=0)


# --------------------------------------------------------------------------- #
# Kernels (one image per grid step)
# --------------------------------------------------------------------------- #
def _conv1_kernel(x_ref, w_ref, y_ref, st_ref):
    # x_ref: (H, W, C) bf16    w_ref: (3, 3C, Cout) bf16
    # y_ref: (H, W, Cout) bf16 st_ref: (2, Cout) f32 [sum; sumsq]
    acc = _conv3x3_same(x_ref[...], w_ref)
    st_ref[...] = _moment_rows(acc)                    # f32 stats BEFORE the cast
    y_ref[...] = acc.reshape(y_ref.shape).astype(y_ref.dtype)


def _conv2_kernel(y1_ref, s1_ref, b1_ref, w_ref, y2_ref, st_ref):
    # y1_ref: (H, W, Cout) bf16   s1/b1: (1, Cout) f32 folded BN1
    # w_ref : (3, 3*Cout, Cout) bf16
    # y2_ref: (H, W, Cout) bf16   st_ref: (2, Cout) f32
    a = jnp.maximum(y1_ref[...].astype(jnp.float32) * s1_ref[...] + b1_ref[...],
                    0.0)                                # folded bn1 + relu (f32)
    acc = _conv3x3_same(a.astype(jnp.bfloat16), w_ref)
    st_ref[...] = _moment_rows(acc)
    y2_ref[...] = acc.reshape(y2_ref.shape).astype(y2_ref.dtype)


def _epilogue_kernel(y2_ref, xr_ref, s2_ref, b2_ref, o_ref):
    # out = relu(folded_bn2(conv2) + identity); residual read from the single
    # bf16 copy of x; f32 epilogue / output.
    o_ref[...] = jnp.maximum(
        y2_ref[...].astype(jnp.float32) * s2_ref[...] + b2_ref[...]
        + xr_ref[...].astype(jnp.float32), 0.0)


# --------------------------------------------------------------------------- #
# Wrapper
# --------------------------------------------------------------------------- #
def _fold_bn(stats, count, gamma, beta):
    """stats: (N, 2, C) per-image [sum; sumsq] -> folded (1, C) scale, shift."""
    tot = jnp.sum(stats.astype(jnp.float32), axis=0)   # (2, C)
    mean = tot[0] / count
    # One-pass variance E[y^2] - E[y]^2 in f32 (biased, like train-mode PyTorch).
    # TODO(synk): switch to a mean-shifted second pass if |mean| >> std.
    var = jnp.maximum(tot[1] / count - mean * mean, 0.0)
    inv = lax.rsqrt(var + _EPS)
    scale = gamma.astype(jnp.float32) * inv
    shift = beta.astype(jnp.float32) - mean * scale
    C = scale.shape[0]
    return scale.reshape(1, C), shift.reshape(1, C)


def basic_block_nhwc(x_nhwc, w1_oihw, gamma1, beta1, w2_oihw, gamma2, beta2):
    """BasicBlock forward, NHWC activations. Returns (N, H, W, Cout) f32."""
    N, H, W, C = x_nhwc.shape
    Cout = w1_oihw.shape[0]
    assert Cout == C, "downsample=None requires in_channels == out_channels"

    # Single bf16 NHWC copy of the input: feeds conv1 (pass 1) AND the residual
    # add (pass 3) -- no padded HBM copy, no separate f32 duplicate.
    x_b = x_nhwc.astype(jnp.bfloat16)
    # OIHW -> (ky, kx*Cin + cin, Cout): one (3C, Cout) weight slab per dy.
    w1_b = jnp.transpose(w1_oihw, (2, 3, 1, 0)).reshape(3, 3 * C, Cout).astype(jnp.bfloat16)
    w2_b = jnp.transpose(w2_oihw, (2, 3, 1, 0)).reshape(3, 3 * Cout, Cout).astype(jnp.bfloat16)

    par = pltpu.CompilerParams(
        dimension_semantics=("parallel",),       # only splits work on v7x (2 TCs)
        vmem_limit_bytes=32 * 1024 * 1024)       # explicit; raise for large stages

    img_spec = pl.BlockSpec((None, H, W, C), lambda n: (n, 0, 0, 0))
    w1_spec = pl.BlockSpec((3, 3 * C, Cout), lambda n: (0, 0, 0))
    w2_spec = pl.BlockSpec((3, 3 * Cout, Cout), lambda n: (0, 0, 0))
    vec_spec = pl.BlockSpec((1, Cout), lambda n: (0, 0))
    st_spec = pl.BlockSpec((None, 2, Cout), lambda n: (n, 0, 0))

    # ---- pass 1: conv1 + per-image BN1 partial stats --------------------------
    y1, st1 = pl.pallas_call(
        _conv1_kernel,
        grid=(N,),
        in_specs=[img_spec, w1_spec],
        out_specs=[img_spec, st_spec],
        out_shape=[jax.ShapeDtypeStruct((N, H, W, Cout), jnp.bfloat16),
                   jax.ShapeDtypeStruct((N, 2, Cout), jnp.float32)],
        compiler_params=par,
    )(x_b, w1_b)

    scale1, shift1 = _fold_bn(st1, float(N * H * W), gamma1, beta1)

    # ---- pass 2: folded bn1 + relu + conv2 + per-image BN2 partial stats ------
    y2, st2 = pl.pallas_call(
        _conv2_kernel,
        grid=(N,),
        in_specs=[img_spec, vec_spec, vec_spec, w2_spec],
        out_specs=[img_spec, st_spec],
        out_shape=[jax.ShapeDtypeStruct((N, H, W, Cout), jnp.bfloat16),
                   jax.ShapeDtypeStruct((N, 2, Cout), jnp.float32)],
        compiler_params=par,
    )(y1, scale1, shift1, w2_b)

    scale2, shift2 = _fold_bn(st2, float(N * H * W), gamma2, beta2)

    # ---- pass 3: folded bn2 + residual add + relu ------------------------------
    out = pl.pallas_call(
        _epilogue_kernel,
        grid=(N,),
        in_specs=[img_spec, img_spec, vec_spec, vec_spec],
        out_specs=img_spec,
        out_shape=jax.ShapeDtypeStruct((N, H, W, Cout), jnp.float32),
        compiler_params=par,
    )(y2, x_b, scale2, shift2)

    return out


def basic_block(x_nchw, w1, g1, b1, w2, g2, b2):
    """PyTorch-layout entry point: x (N,C,H,W), conv weights OIHW."""
    # TODO(synk): when chaining blocks, keep activations NHWC (bf16) end-to-end
    #             and drop these transposes (use basic_block_nhwc directly).
    x_nhwc = jnp.transpose(x_nchw, (0, 2, 3, 1))
    out = basic_block_nhwc(x_nhwc, w1, g1, b1, w2, g2, b2)
    return jnp.transpose(out, (0, 3, 1, 2))


# --------------------------------------------------------------------------- #
# Pure-JAX references (no Pallas) for validation
# --------------------------------------------------------------------------- #
def _ref_matched(x, w1, g1, b1, w2, g2, b2):
    """Mirrors the kernel precision: bf16 conv operands / inter-pass activations /
    residual, f32 accumulation, f32 BN stats taken pre-rounding."""
    dn = ("NCHW", "OIHW", "NCHW")

    def conv_bf16(a_b, w):
        return lax.conv_general_dilated(
            a_b, w.astype(jnp.bfloat16), (1, 1), ((1, 1), (1, 1)),
            dimension_numbers=dn, preferred_element_type=jnp.float32)

    def fold(y, g, b):
        m = y.mean(axis=(0, 2, 3))
        v = jnp.maximum((y * y).mean(axis=(0, 2, 3)) - m * m, 0.0)
        s = g * lax.rsqrt(v + _EPS)
        return s.reshape(1, -1, 1, 1), (b - m * s).reshape(1, -1, 1, 1)

    x_b = x.astype(jnp.bfloat16)
    y1 = conv_bf16(x_b, w1)
    s1, t1 = fold(y1, g1, b1)
    a1 = jnp.maximum(y1.astype(jnp.bfloat16).astype(jnp.float32) * s1 + t1, 0.0)
    y2 = conv_bf16(a1.astype(jnp.bfloat16), w2)
    s2, t2 = fold(y2, g2, b2)
    return jnp.maximum(y2.astype(jnp.bfloat16).astype(jnp.float32) * s2 + t2
                       + x_b.astype(jnp.float32), 0.0)


def _ref_fp32(x, w1, g1, b1, w2, g2, b2):
    dn = ("NCHW", "OIHW", "NCHW")

    def conv(a, w):
        return lax.conv_general_dilated(a, w, (1, 1), ((1, 1), (1, 1)),
                                        dimension_numbers=dn)

    def bn(y, g, b):
        m = y.mean(axis=(0, 2, 3), keepdims=True)
        v = ((y - m) ** 2).mean(axis=(0, 2, 3), keepdims=True)
        return (y - m) * lax.rsqrt(v + _EPS) * g.reshape(1, -1, 1, 1) + b.reshape(1, -1, 1, 1)

    h = jnp.maximum(bn(conv(x, w1), g1, b1), 0.0)
    h = bn(conv(h, w2), g2, b2) + x
    return jnp.maximum(h, 0.0)


if __name__ == "__main__":
    key = jax.random.PRNGKey(0)
    k_x, k_w1, k_w2, k_g1, k_b1, k_g2, k_b2 = jax.random.split(key, 7)

    N, C, H, W = 2, 4, 16, 16      # small shapes; in_channels == out_channels
    x = jax.random.normal(k_x, (N, C, H, W), jnp.float32)
    w1 = 0.2 * jax.random.normal(k_w1, (C, C, 3, 3), jnp.float32)
    w2 = 0.2 * jax.random.normal(k_w2, (C, C, 3, 3), jnp.float32)
    gamma1 = 1.0 + 0.1 * jax.random.normal(k_g1, (C,), jnp.float32)
    beta1 = 0.1 * jax.random.normal(k_b1, (C,), jnp.float32)
    gamma2 = 1.0 + 0.1 * jax.random.normal(k_g2, (C,), jnp.float32)
    beta2 = 0.1 * jax.random.normal(k_b2, (C,), jnp.float32)

    run = jax.jit(basic_block)
    out = jax.block_until_ready(run(x, w1, gamma1, beta1, w2, gamma2, beta2))
    assert out.shape == (N, C, H, W)

    # Matched-precision reference (bf16 operands / intermediates, f32 accum).
    ref_m = jax.block_until_ready(
        _ref_matched(x, w1, gamma1, beta1, w2, gamma2, beta2))
    err_m = float(jnp.max(jnp.abs(out - ref_m)))
    assert jnp.allclose(out, ref_m, atol=2e-2, rtol=2e-2), (
        f"matched-precision max |diff| = {err_m}")

    # Loose sanity check against the full-fp32 reference (bf16 operands and
    # bf16 intermediates necessarily loosen this tolerance).
    ref_f = jax.block_until_ready(
        _ref_fp32(x, w1, gamma1, beta1, w2, gamma2, beta2))
    err_f = float(jnp.max(jnp.abs(out - ref_f)))
    assert jnp.allclose(out, ref_f, atol=0.25, rtol=0.05), (
        f"fp32 max |diff| = {err_f}")

    print("KERNEL_OK")
</pallas_src>

<mosaic_0001>
module attributes {stable_mosaic.version = 11 : i64} {
  func.func @_conv1_kernel(%arg0: i32, %arg1: memref<1x16x16x4xbf16, #tpu.memory_space<vmem>>, %arg2: memref<3x12x4xbf16, #tpu.memory_space<vmem>>, %arg3: memref<1x16x16x4xbf16, #tpu.memory_space<vmem>>, %arg4: memref<1x2x4xf32, #tpu.memory_space<vmem>>) attributes {dimension_semantics = [#tpu.dimension_semantics<parallel>], iteration_bounds = array<i64: 2>, scalar_prefetch = 0 : i64, scratch_operands = 0 : i64, tpu.core_type = #tpu.core_type<tc>, window_params = [{transform_indices = @transform_0, window_bounds = array<i64: 1, 16, 16, 4>}, {pipeline_mode = #tpu.pipeline_mode<synchronous>, transform_indices = @transform_1, window_bounds = array<i64: 3, 12, 4>}, {transform_indices = @transform_2, window_bounds = array<i64: 1, 16, 16, 4>}, {transform_indices = @transform_3, window_bounds = array<i64: 1, 2, 4>}]} {
    %c0 = arith.constant 0 : index
    %c0_0 = arith.constant 0 : index
    %c0_1 = arith.constant 0 : index
    %c0_2 = arith.constant 0 : index
    %0 = vector.load %arg1[%c0, %c0_0, %c0_1, %c0_2] : memref<1x16x16x4xbf16, #tpu.memory_space<vmem>>, vector<1x16x16x4xbf16>
    %1 = vector.shape_cast %0 : vector<1x16x16x4xbf16> to vector<16x16x4xbf16>
    %cst = arith.constant 0.000000e+00 : bf16
    %2 = vector.broadcast %cst : bf16 to vector<1x16x4xbf16>
    %3 = tpu.concatenate %2, %1, %2 in 0 : vector<1x16x4xbf16>, vector<16x16x4xbf16>, vector<1x16x4xbf16> -> vector<18x16x4xbf16>
    %cst_3 = arith.constant 0.000000e+00 : bf16
    %4 = vector.broadcast %cst_3 : bf16 to vector<18x1x4xbf16>
    %5 = vector.extract_strided_slice %3 {offsets = [0, 0, 0], sizes = [18, 15, 4], strides = [1, 1, 1]} : vector<18x16x4xbf16> to vector<18x15x4xbf16>
    %6 = tpu.concatenate %4, %5 in 1 : vector<18x1x4xbf16>, vector<18x15x4xbf16> -> vector<18x16x4xbf16>
    %cst_4 = arith.constant 0.000000e+00 : bf16
    %7 = vector.broadcast %cst_4 : bf16 to vector<18x1x4xbf16>
    %8 = vector.extract_strided_slice %3 {offsets = [0, 1, 0], sizes = [18, 15, 4], strides = [1, 1, 1]} : vector<18x16x4xbf16> to vector<18x15x4xbf16>
    %9 = tpu.concatenate %8, %7 in 1 : vector<18x15x4xbf16>, vector<18x1x4xbf16> -> vector<18x16x4xbf16>
    %10 = vector.extract_strided_slice %6 {offsets = [0, 0, 0], sizes = [16, 16, 4], strides = [1, 1, 1]} : vector<18x16x4xbf16> to vector<16x16x4xbf16>
    %11 = vector.extract_strided_slice %3 {offsets = [0, 0, 0], sizes = [16, 16, 4], strides = [1, 1, 1]} : vector<18x16x4xbf16> to vector<16x16x4xbf16>
    %12 = vector.extract_strided_slice %9 {offsets = [0, 0, 0], sizes = [16, 16, 4], strides = [1, 1, 1]} : vector<18x16x4xbf16> to vector<16x16x4xbf16>
    %13 = tpu.concatenate %10, %11, %12 in 2 : vector<16x16x4xbf16>, vector<16x16x4xbf16>, vector<16x16x4xbf16> -> vector<16x16x12xbf16>
    %14 = vector.shape_cast %13 : vector<16x16x12xbf16> to vector<256x12xbf16>
    %c0_5 = arith.constant 0 : index
    %c0_6 = arith.constant 0 : index
    %c0_7 = arith.constant 0 : index
    %15 = vector.load %arg2[%c0_5, %c0_6, %c0_7] : memref<3x12x4xbf16, #tpu.memory_space<vmem>>, vector<1x12x4xbf16>
    %16 = vector.shape_cast %15 : vector<1x12x4xbf16> to vector<12x4xbf16>
    %cst_8 = arith.constant dense<0.000000e+00> : vector<256x4xf32>
    %17 = tpu.matmul %14, %16, %cst_8 {dimension_numbers = #tpu.dot_dimension_numbers<[1], [0], [0], [1], [0, 0, 1, 1], [], []>} : vector<256x12xbf16>, vector<12x4xbf16>, vector<256x4xf32> -> vector<256x4xf32>
    %18 = vector.extract_strided_slice %6 {offsets = [1, 0, 0], sizes = [16, 16, 4], strides = [1, 1, 1]} : vector<18x16x4xbf16> to vector<16x16x4xbf16>
    %19 = vector.extract_strided_slice %3 {offsets = [1, 0, 0], sizes = [16, 16, 4], strides = [1, 1, 1]} : vector<18x16x4xbf16> to vector<16x16x4xbf16>
    %20 = vector.extract_strided_slice %9 {offsets = [1, 0, 0], sizes = [16, 16, 4], strides = [1, 1, 1]} : vector<18x16x4xbf16> to vector<16x16x4xbf16>
    %21 = tpu.concatenate %18, %19, %20 in 2 : vector<16x16x4xbf16>, vector<16x16x4xbf16>, vector<16x16x4xbf16> -> vector<16x16x12xbf16>
    %22 = vector.shape_cast %21 : vector<16x16x12xbf16> to vector<256x12xbf16>
    %c1 = arith.constant 1 : index
    %c0_9 = arith.constant 0 : index
    %c0_10 = arith.constant 0 : index
    %23 = vector.load %arg2[%c1, %c0_9, %c0_10] : memref<3x12x4xbf16, #tpu.memory_space<vmem>>, vector<1x12x4xbf16>
    %24 = vector.shape_cast %23 : vector<1x12x4xbf16> to vector<12x4xbf16>
    %cst_11 = arith.constant dense<0.000000e+00> : vector<256x4xf32>
    %25 = tpu.matmul %22, %24, %cst_11 {dimension_numbers = #tpu.dot_dimension_numbers<[1], [0], [0], [1], [0, 0, 1, 1], [], []>} : vector<256x12xbf16>, vector<12x4xbf16>, vector<256x4xf32> -> vector<256x4xf32>
    %26 = arith.addf %17, %25 : vector<256x4xf32>
    %27 = vector.extract_strided_slice %6 {offsets = [2, 0, 0], sizes = [16, 16, 4], strides = [1, 1, 1]} : vector<18x16x4xbf16> to vector<16x16x4xbf16>
    %28 = vector.extract_strided_slice %3 {offsets = [2, 0, 0], sizes = [16, 16, 4], strides = [1, 1, 1]} : vector<18x16x4xbf16> to vector<16x16x4xbf16>
    %29 = vector.extract_strided_slice %9 {offsets = [2, 0, 0], sizes = [16, 16, 4], strides = [1, 1, 1]} : vector<18x16x4xbf16> to vector<16x16x4xbf16>
    %30 = tpu.concatenate %27, %28, %29 in 2 : vector<16x16x4xbf16>, vector<16x16x4xbf16>, vector<16x16x4xbf16> -> vector<16x16x12xbf16>
    %31 = vector.shape_cast %30 : vector<16x16x12xbf16> to vector<256x12xbf16>
    %c2 = arith.constant 2 : index
    %c0_12 = arith.constant 0 : index
    %c0_13 = arith.constant 0 : index
    %32 = vector.load %arg2[%c2, %c0_12, %c0_13] : memref<3x12x4xbf16, #tpu.memory_space<vmem>>, vector<1x12x4xbf16>
    %33 = vector.shape_cast %32 : vector<1x12x4xbf16> to vector<12x4xbf16>
    %cst_14 = arith.constant dense<0.000000e+00> : vector<256x4xf32>
    %34 = tpu.matmul %31, %33, %cst_14 {dimension_numbers = #tpu.dot_dimension_numbers<[1], [0], [0], [1], [0, 0, 1, 1], [], []>} : vector<256x12xbf16>, vector<12x4xbf16>, vector<256x4xf32> -> vector<256x4xf32>
    %35 = arith.addf %26, %34 : vector<256x4xf32>
    %cst_15 = arith.constant dense<0.000000e+00> : vector<4xf32>
    %36 = vector.multi_reduction <add>, %35, %cst_15 [0] : vector<256x4xf32> to vector<4xf32>
    %37 = vector.shape_cast %36 : vector<4xf32> to vector<1x4xf32>
    %38 = arith.mulf %35, %35 : vector<256x4xf32>
    %cst_16 = arith.constant dense<0.000000e+00> : vector<4xf32>
    %39 = vector.multi_reduction <add>, %38, %cst_16 [0] : vector<256x4xf32> to vector<4xf32>
    %40 = vector.shape_cast %39 : vector<4xf32> to vector<1x4xf32>
    %41 = tpu.concatenate %37, %40 in 0 : vector<1x4xf32>, vector<1x4xf32> -> vector<2x4xf32>
    %c0_17 = arith.constant 0 : index
    %c0_18 = arith.constant 0 : index
    %c0_19 = arith.constant 0 : index
    %42 = vector.load %arg4[%c0_17, %c0_18, %c0_19] : memref<1x2x4xf32, #tpu.memory_space<vmem>>, vector<1x2x4xf32>
    %43 = vector.shape_cast %42 : vector<1x2x4xf32> to vector<2x4xf32>
    %44 = vector.shape_cast %41 : vector<2x4xf32> to vector<1x2x4xf32>
    tpu.vector_store %arg4[%c0_17, %c0_18, %c0_19], %44 {strides = array<i32>} : memref<1x2x4xf32, #tpu.memory_space<vmem>>, vector<1x2x4xf32>,
    %45 = vector.shape_cast %35 : vector<256x4xf32> to vector<16x16x4xf32>
    %46 = arith.truncf %45 : vector<16x16x4xf32> to vector<16x16x4xbf16>
    %c0_20 = arith.constant 0 : index
    %c0_21 = arith.constant 0 : index
    %c0_22 = arith.constant 0 : index
    %c0_23 = arith.constant 0 : index
    %47 = vector.load %arg3[%c0_20, %c0_21, %c0_22, %c0_23] : memref<1x16x16x4xbf16, #tpu.memory_space<vmem>>, vector<1x16x16x4xbf16>
    %48 = vector.shape_cast %47 : vector<1x16x16x4xbf16> to vector<16x16x4xbf16>
    %49 = vector.shape_cast %46 : vector<16x16x4xbf16> to vector<1x16x16x4xbf16>
    tpu.vector_store %arg3[%c0_20, %c0_21, %c0_22, %c0_23], %49 {strides = array<i32>} : memref<1x16x16x4xbf16, #tpu.memory_space<vmem>>, vector<1x16x16x4xbf16>,
    return
  }
  func.func @transform_0(%arg0: i32) -> (i32, i32, i32, i32) {
    %c0_i32 = arith.constant 0 : i32
    %c0_i32_0 = arith.constant 0 : i32
    %c0_i32_1 = arith.constant 0 : i32
    %c0_i32_2 = arith.constant 0 : i32
    return %arg0, %c0_i32, %c0_i32_0, %c0_i32_1 : i32, i32, i32, i32
  }
  func.func @transform_1(%arg0: i32) -> (i32, i32, i32) {
    %c0_i32 = arith.constant 0 : i32
    %c0_i32_0 = arith.constant 0 : i32
    %c0_i32_1 = arith.constant 0 : i32
    %c0_i32_2 = arith.constant 0 : i32
    return %c0_i32, %c0_i32_0, %c0_i32_1 : i32, i32, i32
  }
  func.func @transform_2(%arg0: i32) -> (i32, i32, i32, i32) {
    %c0_i32 = arith.constant 0 : i32
    %c0_i32_0 = arith.constant 0 : i32
    %c0_i32_1 = arith.constant 0 : i32
    %c0_i32_2 = arith.constant 0 : i32
    return %arg0, %c0_i32, %c0_i32_0, %c0_i32_1 : i32, i32, i32, i32
  }
  func.func @transform_3(%arg0: i32) -> (i32, i32, i32) {
    %c0_i32 = arith.constant 0 : i32
    %c0_i32_0 = arith.constant 0 : i32
    %c0_i32_1 = arith.constant 0 : i32
    return %arg0, %c0_i32, %c0_i32_0 : i32, i32, i32
  }
}

module attributes {stable_mosaic.version = 11 : i64} {
  func.func @_epilogue_kernel(%arg0: i32, %arg1: memref<1x16x16x4xbf16, #tpu.memory_space<vmem>>, %arg2: memref<1x16x16x4xbf16, #tpu.memory_space<vmem>>, %arg3: memref<1x4xf32, #tpu.memory_space<vmem>>, %arg4: memref<1x4xf32, #tpu.memory_space<vmem>>, %arg5: memref<1x16x16x4xf32, #tpu.memory_space<vmem>>) attributes {dimension_semantics = [#tpu.dimension_semantics<parallel>], iteration_bounds = array<i64: 2>, scalar_prefetch = 0 : i64, scratch_operands = 0 : i64, tpu.core_type = #tpu.core_type<tc>, window_params = [{transform_indices = @transform_0, window_bounds = array<i64: 1, 16, 16, 4>}, {transform_indices = @transform_1, window_bounds = array<i64: 1, 16, 16, 4>}, {pipeline_mode = #tpu.pipeline_mode<synchronous>, transform_indices = @transform_2, window_bounds = array<i64: 1, 4>}, {pipeline_mode = #tpu.pipeline_mode<synchronous>, transform_indices = @transform_3, window_bounds = array<i64: 1, 4>}, {transform_indices = @transform_4, window_bounds = array<i64: 1, 16, 16, 4>}]} {
    %c0 = arith.constant 0 : index
    %c0_0 = arith.constant 0 : index
    %c0_1 = arith.constant 0 : index
    %c0_2 = arith.constant 0 : index
    %0 = vector.load %arg1[%c0, %c0_0, %c0_1, %c0_2] : memref<1x16x16x4xbf16, #tpu.memory_space<vmem>>, vector<1x16x16x4xbf16>
    %1 = vector.shape_cast %0 : vector<1x16x16x4xbf16> to vector<16x16x4xbf16>
    %2 = arith.extf %1 : vector<16x16x4xbf16> to vector<16x16x4xf32>
    %c0_3 = arith.constant 0 : index
    %c0_4 = arith.constant 0 : index
    %3 = vector.load %arg3[%c0_3, %c0_4] : memref<1x4xf32, #tpu.memory_space<vmem>>, vector<1x4xf32>
    %4 = vector.shape_cast %3 : vector<1x4xf32> to vector<1x1x4xf32>
    %5 = vector.broadcast %4 : vector<1x1x4xf32> to vector<16x16x4xf32>
    %6 = arith.mulf %2, %5 : vector<16x16x4xf32>
    %c0_5 = arith.constant 0 : index
    %c0_6 = arith.constant 0 : index
    %7 = vector.load %arg4[%c0_5, %c0_6] : memref<1x4xf32, #tpu.memory_space<vmem>>, vector<1x4xf32>
    %8 = vector.shape_cast %7 : vector<1x4xf32> to vector<1x1x4xf32>
    %9 = vector.broadcast %8 : vector<1x1x4xf32> to vector<16x16x4xf32>
    %10 = arith.addf %6, %9 : vector<16x16x4xf32>
    %c0_7 = arith.constant 0 : index
    %c0_8 = arith.constant 0 : index
    %c0_9 = arith.constant 0 : index
    %c0_10 = arith.constant 0 : index
    %11 = vector.load %arg2[%c0_7, %c0_8, %c0_9, %c0_10] : memref<1x16x16x4xbf16, #tpu.memory_space<vmem>>, vector<1x16x16x4xbf16>
    %12 = vector.shape_cast %11 : vector<1x16x16x4xbf16> to vector<16x16x4xbf16>
    %13 = arith.extf %12 : vector<16x16x4xbf16> to vector<16x16x4xf32>
    %14 = arith.addf %10, %13 : vector<16x16x4xf32>
    %cst = arith.constant 0.000000e+00 : f32
    %15 = vector.broadcast %cst : f32 to vector<16x16x4xf32>
    %16 = arith.maximumf %14, %15 : vector<16x16x4xf32>
    %c0_11 = arith.constant 0 : index
    %c0_12 = arith.constant 0 : index
    %c0_13 = arith.constant 0 : index
    %c0_14 = arith.constant 0 : index
    %17 = vector.load %arg5[%c0_11, %c0_12, %c0_13, %c0_14] : memref<1x16x16x4xf32, #tpu.memory_space<vmem>>, vector<1x16x16x4xf32>
    %18 = vector.shape_cast %17 : vector<1x16x16x4xf32> to vector<16x16x4xf32>
    %19 = vector.shape_cast %16 : vector<16x16x4xf32> to vector<1x16x16x4xf32>
    tpu.vector_store %arg5[%c0_11, %c0_12, %c0_13, %c0_14], %19 {strides = array<i32>} : memref<1x16x16x4xf32, #tpu.memory_space<vmem>>, vector<1x16x16x4xf32>,
    return
  }
  func.func @transform_0(%arg0: i32) -> (i32, i32, i32, i32) {
    %c0_i32 = arith.constant 0 : i32
    %c0_i32_0 = arith.constant 0 : i32
    %c0_i32_1 = arith.constant 0 : i32
    %c0_i32_2 = arith.constant 0 : i32
    return %arg0, %c0_i32, %c0_i32_0, %c0_i32_1 : i32, i32, i32, i32
  }
  func.func @transform_1(%arg0: i32) -> (i32, i32, i32, i32) {
    %c0_i32 = arith.constant 0 : i32
    %c0_i32_0 = arith.constant 0 : i32
    %c0_i32_1 = arith.constant 0 : i32
    %c0_i32_2 = arith.constant 0 : i32
    return %arg0, %c0_i32, %c0_i32_0, %c0_i32_1 : i32, i32, i32, i32
  }
  func.func @transform_2(%arg0: i32) -> (i32, i32) {
    %c0_i32 = arith.constant 0 : i32
    %c0_i32_0 = arith.constant 0 : i32
    %c0_i32_1 = arith.constant 0 : i32
    return %c0_i32, %c0_i32_0 : i32, i32
  }
  func.func @transform_3(%arg0: i32) -> (i32, i32) {
    %c0_i32 = arith.constant 0 : i32
    %c0_i32_0 = arith.constant 0 : i32
    %c0_i32_1 = arith.constant 0 : i32
    return %c0_i32, %c0_i32_0 : i32, i32
  }
  func.func @transform_4(%arg0: i32) -> (i32, i32, i32, i32) {
    %c0_i32 = arith.constant 0 : i32
    %c0_i32_0 = arith.constant 0 : i32
    %c0_i32_1 = arith.constant 0 : i32
    %c0_i32_2 = arith.constant 0 : i32
    return %arg0, %c0_i32, %c0_i32_0, %c0_i32_1 : i32, i32, i32, i32
  }
}

module attributes {stable_mosaic.version = 11 : i64} {
  func.func @_conv2_kernel(%arg0: i32, %arg1: memref<1x16x16x4xbf16, #tpu.memory_space<vmem>>, %arg2: memref<1x4xf32, #tpu.memory_space<vmem>>, %arg3: memref<1x4xf32, #tpu.memory_space<vmem>>, %arg4: memref<3x12x4xbf16, #tpu.memory_space<vmem>>, %arg5: memref<1x16x16x4xbf16, #tpu.memory_space<vmem>>, %arg6: memref<1x2x4xf32, #tpu.memory_space<vmem>>) attributes {dimension_semantics = [#tpu.dimension_semantics<parallel>], iteration_bounds = array<i64: 2>, scalar_prefetch = 0 : i64, scratch_operands = 0 : i64, tpu.core_type = #tpu.core_type<tc>, window_params = [{transform_indices = @transform_0, window_bounds = array<i64: 1, 16, 16, 4>}, {pipeline_mode = #tpu.pipeline_mode<synchronous>, transform_indices = @transform_1, window_bounds = array<i64: 1, 4>}, {pipeline_mode = #tpu.pipeline_mode<synchronous>, transform_indices = @transform_2, window_bounds = array<i64: 1, 4>}, {pipeline_mode = #tpu.pipeline_mode<synchronous>, transform_indices = @transform_3, window_bounds = array<i64: 3, 12, 4>}, {transform_indices = @transform_4, window_bounds = array<i64: 1, 16, 16, 4>}, {transform_indices = @transform_5, window_bounds = array<i64: 1, 2, 4>}]} {
    %c0 = arith.constant 0 : index
    %c0_0 = arith.constant 0 : index
    %c0_1 = arith.constant 0 : index
    %c0_2 = arith.constant 0 : index
    %0 = vector.load %arg1[%c0, %c0_0, %c0_1, %c0_2] : memref<1x16x16x4xbf16, #tpu.memory_space<vmem>>, vector<1x16x16x4xbf16>
    %1 = vector.shape_cast %0 : vector<1x16x16x4xbf16> to vector<16x16x4xbf16>
    %2 = arith.extf %1 : vector<16x16x4xbf16> to vector<16x16x4xf32>
    %c0_3 = arith.constant 0 : index
    %c0_4 = arith.constant 0 : index
    %3 = vector.load %arg2[%c0_3, %c0_4] : memref<1x4xf32, #tpu.memory_space<vmem>>, vector<1x4xf32>
    %4 = vector.shape_cast %3 : vector<1x4xf32> to vector<1x1x4xf32>
    %5 = vector.broadcast %4 : vector<1x1x4xf32> to vector<16x16x4xf32>
    %6 = arith.mulf %2, %5 : vector<16x16x4xf32>
    %c0_5 = arith.constant 0 : index
    %c0_6 = arith.constant 0 : index
    %7 = vector.load %arg3[%c0_5, %c0_6] : memref<1x4xf32, #tpu.memory_space<vmem>>, vector<1x4xf32>
    %8 = vector.shape_cast %7 : vector<1x4xf32> to vector<1x1x4xf32>
    %9 = vector.broadcast %8 : vector<1x1x4xf32> to vector<16x16x4xf32>
    %10 = arith.addf %6, %9 : vector<16x16x4xf32>
    %cst = arith.constant 0.000000e+00 : f32
    %11 = vector.broadcast %cst : f32 to vector<16x16x4xf32>
    %12 = arith.maximumf %10, %11 : vector<16x16x4xf32>
    %13 = arith.truncf %12 : vector<16x16x4xf32> to vector<16x16x4xbf16>
    %cst_7 = arith.constant 0.000000e+00 : bf16
    %14 = vector.broadcast %cst_7 : bf16 to vector<1x16x4xbf16>
    %15 = tpu.concatenate %14, %13, %14 in 0 : vector<1x16x4xbf16>, vector<16x16x4xbf16>, vector<1x16x4xbf16> -> vector<18x16x4xbf16>
    %cst_8 = arith.constant 0.000000e+00 : bf16
    %16 = vector.broadcast %cst_8 : bf16 to vector<18x1x4xbf16>
    %17 = vector.extract_strided_slice %15 {offsets = [0, 0, 0], sizes = [18, 15, 4], strides = [1, 1, 1]} : vector<18x16x4xbf16> to vector<18x15x4xbf16>
    %18 = tpu.concatenate %16, %17 in 1 : vector<18x1x4xbf16>, vector<18x15x4xbf16> -> vector<18x16x4xbf16>
    %cst_9 = arith.constant 0.000000e+00 : bf16
    %19 = vector.broadcast %cst_9 : bf16 to vector<18x1x4xbf16>
    %20 = vector.extract_strided_slice %15 {offsets = [0, 1, 0], sizes = [18, 15, 4], strides = [1, 1, 1]} : vector<18x16x4xbf16> to vector<18x15x4xbf16>
    %21 = tpu.concatenate %20, %19 in 1 : vector<18x15x4xbf16>, vector<18x1x4xbf16> -> vector<18x16x4xbf16>
    %22 = vector.extract_strided_slice %18 {offsets = [0, 0, 0], sizes = [16, 16, 4], strides = [1, 1, 1]} : vector<18x16x4xbf16> to vector<16x16x4xbf16>
    %23 = vector.extract_strided_slice %15 {offsets = [0, 0, 0], sizes = [16, 16, 4], strides = [1, 1, 1]} : vector<18x16x4xbf16> to vector<16x16x4xbf16>
    %24 = vector.extract_strided_slice %21 {offsets = [0, 0, 0], sizes = [16, 16, 4], strides = [1, 1, 1]} : vector<18x16x4xbf16> to vector<16x16x4xbf16>
    %25 = tpu.concatenate %22, %23, %24 in 2 : vector<16x16x4xbf16>, vector<16x16x4xbf16>, vector<16x16x4xbf16> -> vector<16x16x12xbf16>
    %26 = vector.shape_cast %25 : vector<16x16x12xbf16> to vector<256x12xbf16>
    %c0_10 = arith.constant 0 : index
    %c0_11 = arith.constant 0 : index
    %c0_12 = arith.constant 0 : index
    %27 = vector.load %arg4[%c0_10, %c0_11, %c0_12] : memref<3x12x4xbf16, #tpu.memory_space<vmem>>, vector<1x12x4xbf16>
    %28 = vector.shape_cast %27 : vector<1x12x4xbf16> to vector<12x4xbf16>
    %cst_13 = arith.constant dense<0.000000e+00> : vector<256x4xf32>
    %29 = tpu.matmul %26, %28, %cst_13 {dimension_numbers = #tpu.dot_dimension_numbers<[1], [0], [0], [1], [0, 0, 1, 1], [], []>} : vector<256x12xbf16>, vector<12x4xbf16>, vector<256x4xf32> -> vector<256x4xf32>
    %30 = vector.extract_strided_slice %18 {offsets = [1, 0, 0], sizes = [16, 16, 4], strides = [1, 1, 1]} : vector<18x16x4xbf16> to vector<16x16x4xbf16>
    %31 = vector.extract_strided_slice %15 {offsets = [1, 0, 0], sizes = [16, 16, 4], strides = [1, 1, 1]} : vector<18x16x4xbf16> to vector<16x16x4xbf16>
    %32 = vector.extract_strided_slice %21 {offsets = [1, 0, 0], sizes = [16, 16, 4], strides = [1, 1, 1]} : vector<18x16x4xbf16> to vector<16x16x4xbf16>
    %33 = tpu.concatenate %30, %31, %32 in 2 : vector<16x16x4xbf16>, vector<16x16x4xbf16>, vector<16x16x4xbf16> -> vector<16x16x12xbf16>
    %34 = vector.shape_cast %33 : vector<16x16x12xbf16> to vector<256x12xbf16>
    %c1 = arith.constant 1 : index
    %c0_14 = arith.constant 0 : index
    %c0_15 = arith.constant 0 : index
    %35 = vector.load %arg4[%c1, %c0_14, %c0_15] : memref<3x12x4xbf16, #tpu.memory_space<vmem>>, vector<1x12x4xbf16>
    %36 = vector.shape_cast %35 : vector<1x12x4xbf16> to vector<12x4xbf16>
    %cst_16 = arith.constant dense<0.000000e+00> : vector<256x4xf32>
    %37 = tpu.matmul %34, %36, %cst_16 {dimension_numbers = #tpu.dot_dimension_numbers<[1], [0], [0], [1], [0, 0, 1, 1], [], []>} : vector<256x12xbf16>, vector<12x4xbf16>, vector<256x4xf32> -> vector<256x4xf32>
    %38 = arith.addf %29, %37 : vector<256x4xf32>
    %39 = vector.extract_strided_slice %18 {offsets = [2, 0, 0], sizes = [16, 16, 4], strides = [1, 1, 1]} : vector<18x16x4xbf16> to vector<16x16x4xbf16>
    %40 = vector.extract_strided_slice %15 {offsets = [2, 0, 0], sizes = [16, 16, 4], strides = [1, 1, 1]} : vector<18x16x4xbf16> to vector<16x16x4xbf16>
    %41 = vector.extract_strided_slice %21 {offsets = [2, 0, 0], sizes = [16, 16, 4], strides = [1, 1, 1]} : vector<18x16x4xbf16> to vector<16x16x4xbf16>
    %42 = tpu.concatenate %39, %40, %41 in 2 : vector<16x16x4xbf16>, vector<16x16x4xbf16>, vector<16x16x4xbf16> -> vector<16x16x12xbf16>
    %43 = vector.shape_cast %42 : vector<16x16x12xbf16> to vector<256x12xbf16>
    %c2 = arith.constant 2 : index
    %c0_17 = arith.constant 0 : index
    %c0_18 = arith.constant 0 : index
    %44 = vector.load %arg4[%c2, %c0_17, %c0_18] : memref<3x12x4xbf16, #tpu.memory_space<vmem>>, vector<1x12x4xbf16>
    %45 = vector.shape_cast %44 : vector<1x12x4xbf16> to vector<12x4xbf16>
    %cst_19 = arith.constant dense<0.000000e+00> : vector<256x4xf32>
    %46 = tpu.matmul %43, %45, %cst_19 {dimension_numbers = #tpu.dot_dimension_numbers<[1], [0], [0], [1], [0, 0, 1, 1], [], []>} : vector<256x12xbf16>, vector<12x4xbf16>, vector<256x4xf32> -> vector<256x4xf32>
    %47 = arith.addf %38, %46 : vector<256x4xf32>
    %cst_20 = arith.constant dense<0.000000e+00> : vector<4xf32>
    %48 = vector.multi_reduction <add>, %47, %cst_20 [0] : vector<256x4xf32> to vector<4xf32>
    %49 = vector.shape_cast %48 : vector<4xf32> to vector<1x4xf32>
    %50 = arith.mulf %47, %47 : vector<256x4xf32>
    %cst_21 = arith.constant dense<0.000000e+00> : vector<4xf32>
    %51 = vector.multi_reduction <add>, %50, %cst_21 [0] : vector<256x4xf32> to vector<4xf32>
    %52 = vector.shape_cast %51 : vector<4xf32> to vector<1x4xf32>
    %53 = tpu.concatenate %49, %52 in 0 : vector<1x4xf32>, vector<1x4xf32> -> vector<2x4xf32>
    %c0_22 = arith.constant 0 : index
    %c0_23 = arith.constant 0 : index
    %c0_24 = arith.constant 0 : index
    %54 = vector.load %arg6[%c0_22, %c0_23, %c0_24] : memref<1x2x4xf32, #tpu.memory_space<vmem>>, vector<1x2x4xf32>
    %55 = vector.shape_cast %54 : vector<1x2x4xf32> to vector<2x4xf32>
    %56 = vector.shape_cast %53 : vector<2x4xf32> to vector<1x2x4xf32>
    tpu.vector_store %arg6[%c0_22, %c0_23, %c0_24], %56 {strides = array<i32>} : memref<1x2x4xf32, #tpu.memory_space<vmem>>, vector<1x2x4xf32>,
    %57 = vector.shape_cast %47 : vector<256x4xf32> to vector<16x16x4xf32>
    %58 = arith.truncf %57 : vector<16x16x4xf32> to vector<16x16x4xbf16>
    %c0_25 = arith.constant 0 : index
    %c0_26 = arith.constant 0 : index
    %c0_27 = arith.constant 0 : index
    %c0_28 = arith.constant 0 : index
    %59 = vector.load %arg5[%c0_25, %c0_26, %c0_27, %c0_28] : memref<1x16x16x4xbf16, #tpu.memory_space<vmem>>, vector<1x16x16x4xbf16>
    %60 = vector.shape_cast %59 : vector<1x16x16x4xbf16> to vector<16x16x4xbf16>
    %61 = vector.shape_cast %58 : vector<16x16x4xbf16> to vector<1x16x16x4xbf16>
    tpu.vector_store %arg5[%c0_25, %c0_26, %c0_27, %c0_28], %61 {strides = array<i32>} : memref<1x16x16x4xbf16, #tpu.memory_space<vmem>>, vector<1x16x16x4xbf16>,
    return
  }
  func.func @transform_0(%arg0: i32) -> (i32, i32, i32, i32) {
    %c0_i32 = arith.constant 0 : i32
    %c0_i32_0 = arith.constant 0 : i32
    %c0_i32_1 = arith.constant 0 : i32
    %c0_i32_2 = arith.constant 0 : i32
    return %arg0, %c0_i32, %c0_i32_0, %c0_i32_1 : i32, i32, i32, i32
  }
  func.func @transform_1(%arg0: i32) -> (i32, i32) {
    %c0_i32 = arith.constant 0 : i32
    %c0_i32_0 = arith.constant 0 : i32
    %c0_i32_1 = arith.constant 0 : i32
    return %c0_i32, %c0_i32_0 : i32, i32
  }
  func.func @transform_2(%arg0: i32) -> (i32, i32) {
    %c0_i32 = arith.constant 0 : i32
    %c0_i32_0 = arith.constant 0 : i32
    %c0_i32_1 = arith.constant 0 : i32
    return %c0_i32, %c0_i32_0 : i32, i32
  }
  func.func @transform_3(%arg0: i32) -> (i32, i32, i32) {
    %c0_i32 = arith.constant 0 : i32
    %c0_i32_0 = arith.constant 0 : i32
    %c0_i32_1 = arith.constant 0 : i32
    %c0_i32_2 = arith.constant 0 : i32
    return %c0_i32, %c0_i32_0, %c0_i32_1 : i32, i32, i32
  }
  func.func @transform_4(%arg0: i32) -> (i32, i32, i32, i32) {
    %c0_i32 = arith.constant 0 : i32
    %c0_i32_0 = arith.constant 0 : i32
    %c0_i32_1 = arith.constant 0 : i32
    %c0_i32_2 = arith.constant 0 : i32
    return %arg0, %c0_i32, %c0_i32_0, %c0_i32_1 : i32, i32, i32, i32
  }
  func.func @transform_5(%arg0: i32) -> (i32, i32, i32) {
    %c0_i32 = arith.constant 0 : i32
    %c0_i32_0 = arith.constant 0 : i32
    %c0_i32_1 = arith.constant 0 : i32
    return %arg0, %c0_i32, %c0_i32_0 : i32, i32, i32
  }
}

</mosaic_0001>

<bundles_post_ra>
// kernel: basic_block.5
= control target key start
LH: loop header
LB: loop body
LE: loop exit
PB: predicated region body
PF: predicated region fallthrough
CT: control target
= control target key end

     0   :  { %s805_s15 = smov 0   ;;  %s1005_s0 = inlined_call_operand.vmem [shape: bf16[2,16,16,4], index: 0, kind: input, shape index: {}]   ;;  %s1006_s1 = inlined_call_operand.vmem [shape: bf16[2,16,16,4], index: 1, kind: input, shape index: {}]   ;;  %s1007_s2 = inlined_call_operand.vmem [shape: f32[1,4], index: 2, kind: input, shape index: {}]   ;;  %s1008_s3 = inlined_call_operand.vmem [shape: f32[1,4], index: 3, kind: input, shape index: {}]   ;;  %s1009_s4 = inlined_call_operand.vmem [shape: f32[2,16,16,4], index: 4, kind: output, shape index: {}]  }
   0x1 LB: > { %s588_s16 = sadd.s32 4294967295, %s778_s15   ;;  %p592_p0 = scmp.ge.s32.totalorder %s778_s15, 1  ;;  %s778_s15 = sphi %s805_s15, %s14_s15  }
   0x2   : > { %p172_p1 = scmp.lt.s32.totalorder %s778_s15, 3 }
   0x4   : > { %p173_p2 = pnand %p592_p0, %p172_p1 }
   0x5   : > { %p203_p3 = scmp.lt.s32.totalorder (!%p173_p2), %s588_s16, 1  ;;  %v829_v0 = vld [vmem:[%s1007_s2] ss:$0 sm:$0xff] (!%p173_p2)  ;;  %vm488_vm0 = vcmask (!%p173_p2), 31744  }
   0x6   : > { %176 = sbr.rel (%p173_p2) target bundleno = 71 (0x47), region = 36  ;;  %v840_v11 = vld [vmem:[%s1008_s3] ss:$0 sm:$0xff] (!%p173_p2) }
   0xd   : > { %s1011_s16 = smov (!%p203_p3, %s588_s16), 1 }
   0xe   : > { %s603_s17 = sshll.u32 %s1011_s16, 7  ;;  %s605_s28 = sshll.u32 %s1011_s16, 8 }
   0xf   : > { %s819_s20 = scalar_lea.vmem %s1005_s0, %s603_s17  ;;  %s824_s23 = scalar_lea.vmem %s1006_s1, %s603_s17 }
  0x10   : > { %v607_v1 = vld [vmem:[%s819_s20] sm:$0xff]   ;;  %v734_v3 = vld [vmem:[%s819_s20 + $0x8] sm:$0xff]   ;;  %v735_v9 = vld [vmem:[%s819_s20 + $0x10] sm:$0xff]   ;;  %s860_s5 = scalar_lea.vmem %s1009_s4, %s605_s28 }
  0x11   : > { %v671_v2 = vld [vmem:[%s824_s23] sm:$0xff]   ;;  %v608_v4 = vunpack.c.l.bf16 %v607_v1  ;;  %v609_v6 = vunpack.c.h.bf16 %v607_v1  ;;  %v749_v8 = vld [vmem:[%s824_s23 + $0x8] sm:$0xff]   ;;  %v750_v10 = vld [vmem:[%s824_s23 + $0x10] sm:$0xff]   ;;  %v612_v12 = vunpack.c.l.bf16 %v734_v3  ;;  %v613_v14 = vunpack.c.h.bf16 %v734_v3 }
  0x12   : > { %v672_v5 = vunpack.c.l.bf16 %v671_v2  ;;  %v673_v7 = vunpack.c.h.bf16 %v671_v2  ;;  %v676_v13 = vunpack.c.l.bf16 %v749_v8  ;;  %v677_v15 = vunpack.c.h.bf16 %v749_v8  ;;  %v736_v16 = vld [vmem:[%s819_s20 + $0x18] sm:$0xff]   ;;  %v737_v42 = vld [vmem:[%s819_s20 + $0x20] sm:$0xff]   ;;  %v738_v52 = vld [vmem:[%s819_s20 + $0x28] sm:$0xff]  }
  0x13   : > { %v289_v17 = vmul.f32 %v608_v4, %v829_v0  ;;  %v290_v18 = vmul.f32 %v609_v6, %v829_v0  ;;  %v616_v19 = vunpack.c.l.bf16 %v735_v9  ;;  %v680_v20 = vunpack.c.l.bf16 %v750_v10  ;;  %v751_v21 = vld [vmem:[%s824_s23 + $0x18] sm:$0xff]   ;;  %v752_v47 = vld [vmem:[%s824_s23 + $0x20] sm:$0xff]   ;;  %v753_v57 = vld [vmem:[%s824_s23 + $0x28] sm:$0xff]  }
  0x14   : > { %v291_v22 = vmul.f32 %v612_v12, %v829_v0  ;;  %v292_v23 = vmul.f32 %v613_v14, %v829_v0  ;;  %v617_v24 = vunpack.c.h.bf16 %v735_v9  ;;  %v681_v25 = vunpack.c.h.bf16 %v750_v10  ;;  %v739_v62 = vld [vmem:[%s819_s20 + $0x30] sm:$0xff]   ;;  %v740_v14 = vld [vmem:[%s819_s20 + $0x38] sm:$0xff]  }
  0x15   : > { %v328_v26 = vadd.f32 %v840_v11, %v289_v17  ;;  %v329_v27 = vadd.f32 %v840_v11, %v290_v18  ;;  %v293_v28 = vmul.f32 %v616_v19, %v829_v0  ;;  %v620_v29 = vunpack.c.l.bf16 %v736_v16  ;;  %v754_v4 = vld [vmem:[%s824_s23 + $0x30] sm:$0xff]  }
  0x16   : > { %v330_v30 = vadd.f32 %v840_v11, %v291_v22  ;;  %v331_v31 = vadd.f32 %v840_v11, %v292_v23  ;;  %v294_v32 = vmul.f32 %v617_v24, %v829_v0  ;;  %v684_v33 = vunpack.c.l.bf16 %v751_v21  ;;  %v755_v23 = vld [vmem:[%s824_s23 + $0x38] sm:$0xff]  }
  0x17   : > { %v424_v34 = vadd.f32 %v672_v5, %v328_v26  ;;  %v425_v35 = vadd.f32 %v673_v7, %v329_v27  ;;  %v332_v36 = vadd.f32 %v840_v11, %v293_v28  ;;  %v295_v37 = vmul.f32 %v620_v29, %v829_v0 }
  0x18   : > { %v426_v38 = vadd.f32 %v676_v13, %v330_v30  ;;  %v427_v39 = vadd.f32 %v677_v15, %v331_v31  ;;  %v333_v40 = vadd.f32 %v840_v11, %v294_v32  ;;  %v621_v41 = vunpack.c.h.bf16 %v736_v16  ;;  %v741_v32 = vld [vmem:[%s819_s20 + $0x40] sm:$0xff]  }
  0x19   : > { %v456_v43 = vmax.f32 %v424_v34, 0.0  ;;  %v457_v44 = vmax.f32 %v425_v35, 0.0  ;;  %v428_v45 = vadd.f32 %v680_v20, %v332_v36  ;;  %v334_v46 = vadd.f32 %v840_v11, %v295_v37  ;;  %v756_v37 = vld [vmem:[%s824_s23 + $0x40] sm:$0xff]  }
  0x1a   : > { %v458_v48 = vmax.f32 %v426_v38, 0.0  ;;  %v459_v49 = vmax.f32 %v427_v39, 0.0  ;;  %v429_v50 = vadd.f32 %v681_v25, %v333_v40  ;;  %v296_v51 = vmul.f32 %v621_v41, %v829_v0 }
  0x1b   : > { %489 = vst.msk [vmem:[%s860_s5] sm:$0xff] %vm488_vm0, %v456_v43  ;;  %490 = vst.msk [vmem:[%s860_s5 + $0x8] sm:$0xff] %vm488_vm0, %v457_v44  ;;  %v460_v53 = vmax.f32 %v428_v45, 0.0  ;;  %v430_v54 = vadd.f32 %v684_v33, %v334_v46  ;;  %v685_v55 = vunpack.c.h.bf16 %v751_v21  ;;  %v624_v56 = vunpack.c.l.bf16 %v737_v42  ;;  %v742_v46 = vld [vmem:[%s819_s20 + $0x48] sm:$0xff]  }
  0x1c   : > { %491 = vst.msk [vmem:[%s860_s5 + $0x10] sm:$0xff] %vm488_vm0, %v458_v48  ;;  %492 = vst.msk [vmem:[%s860_s5 + $0x18] sm:$0xff] %vm488_vm0, %v459_v49  ;;  %v461_v58 = vmax.f32 %v429_v50, 0.0  ;;  %v335_v59 = vadd.f32 %v840_v11, %v296_v51  ;;  %v688_v60 = vunpack.c.l.bf16 %v752_v47  ;;  %v625_v61 = vunpack.c.h.bf16 %v737_v42 }
  0x1d   : > { %493 = vst.msk [vmem:[%s860_s5 + $0x20] sm:$0xff] %vm488_vm0, %v460_v53  ;;  %v462_v63 = vmax.f32 %v430_v54, 0.0  ;;  %v297_v1 = vmul.f32 %v624_v56, %v829_v0  ;;  %v689_v2 = vunpack.c.h.bf16 %v752_v47  ;;  %v628_v3 = vunpack.c.l.bf16 %v738_v52  ;;  %v757_v47 = vld [vmem:[%s824_s23 + $0x48] sm:$0xff]   ;;  %v743_v56 = vld [vmem:[%s819_s20 + $0x50] sm:$0xff]  }
  0x1e   : > { %494 = vst.msk [vmem:[%s860_s5 + $0x28] sm:$0xff] %vm488_vm0, %v461_v58  ;;  %v431_v5 = vadd.f32 %v685_v55, %v335_v59  ;;  %v298_v6 = vmul.f32 %v625_v61, %v829_v0  ;;  %v692_v7 = vunpack.c.l.bf16 %v753_v57  ;;  %v629_v8 = vunpack.c.h.bf16 %v738_v52  ;;  %v758_v61 = vld [vmem:[%s824_s23 + $0x50] sm:$0xff]  }
  0x1f   : > { %495 = vst.msk [vmem:[%s860_s5 + $0x30] sm:$0xff] %vm488_vm0, %v462_v63  ;;  %v336_v9 = vadd.f32 %v840_v11, %v297_v1  ;;  %v299_v10 = vmul.f32 %v628_v3, %v829_v0  ;;  %v693_v12 = vunpack.c.h.bf16 %v753_v57  ;;  %v632_v13 = vunpack.c.l.bf16 %v739_v62 }
  0x20   : > { %v463_v15 = vmax.f32 %v431_v5, 0.0  ;;  %v337_v16 = vadd.f32 %v840_v11, %v298_v6  ;;  %v300_v17 = vmul.f32 %v629_v8, %v829_v0  ;;  %v696_v18 = vunpack.c.l.bf16 %v754_v4 }
  0x21   : > { %v432_v19 = vadd.f32 %v688_v60, %v336_v9  ;;  %v338_v20 = vadd.f32 %v840_v11, %v299_v10  ;;  %v301_v21 = vmul.f32 %v632_v13, %v829_v0  ;;  %v633_v22 = vunpack.c.h.bf16 %v739_v62 }
  0x22   : > { %496 = vst.msk [vmem:[%s860_s5 + $0x38] sm:$0xff] %vm488_vm0, %v463_v15  ;;  %v433_v24 = vadd.f32 %v689_v2, %v337_v16  ;;  %v339_v25 = vadd.f32 %v840_v11, %v300_v17  ;;  %v697_v26 = vunpack.c.h.bf16 %v754_v4  ;;  %v636_v27 = vunpack.c.l.bf16 %v740_v14  ;;  %v759_v17 = vld [vmem:[%s824_s23 + $0x58] sm:$0xff]  }
  0x23   : > { %v464_v28 = vmax.f32 %v432_v19, 0.0  ;;  %v434_v29 = vadd.f32 %v692_v7, %v338_v20  ;;  %v340_v30 = vadd.f32 %v840_v11, %v301_v21  ;;  %v302_v31 = vmul.f32 %v633_v22, %v829_v0 }
  0x24   : > { %v465_v33 = vmax.f32 %v433_v24, 0.0  ;;  %v435_v34 = vadd.f32 %v693_v12, %v339_v25  ;;  %v303_v35 = vmul.f32 %v636_v27, %v829_v0  ;;  %v700_v36 = vunpack.c.l.bf16 %v755_v23  ;;  %v744_v12 = vld [vmem:[%s819_s20 + $0x58] sm:$0xff]  }
  0x25   : > { %497 = vst.msk [vmem:[%s860_s5 + $0x40] sm:$0xff] %vm488_vm0, %v464_v28  ;;  %v466_v38 = vmax.f32 %v434_v29, 0.0  ;;  %v436_v39 = vadd.f32 %v696_v18, %v340_v30  ;;  %v341_v40 = vadd.f32 %v840_v11, %v302_v31  ;;  %v637_v41 = vunpack.c.h.bf16 %v740_v14  ;;  %v760_v31 = vld [vmem:[%s824_s23 + $0x60] sm:$0xff]  }
  0x26   : > { %498 = vst.msk [vmem:[%s860_s5 + $0x48] sm:$0xff] %vm488_vm0, %v465_v33  ;;  %v467_v42 = vmax.f32 %v435_v34, 0.0  ;;  %v342_v43 = vadd.f32 %v840_v11, %v303_v35  ;;  %v701_v44 = vunpack.c.h.bf16 %v755_v23  ;;  %v640_v45 = vunpack.c.l.bf16 %v741_v32 }
  0x27   : > { %499 = vst.msk [vmem:[%s860_s5 + $0x50] sm:$0xff] %vm488_vm0, %v466_v38  ;;  %v468_v48 = vmax.f32 %v436_v39, 0.0  ;;  %v437_v49 = vadd.f32 %v697_v26, %v341_v40  ;;  %v304_v50 = vmul.f32 %v637_v41, %v829_v0  ;;  %v704_v51 = vunpack.c.l.bf16 %v756_v37  ;;  %v745_v26 = vld [vmem:[%s819_s20 + $0x60] sm:$0xff]   ;;  %v746_v40 = vld [vmem:[%s819_s20 + $0x68] sm:$0xff]  }
  0x28   : > { %500 = vst.msk [vmem:[%s860_s5 + $0x58] sm:$0xff] %vm488_vm0, %v467_v42  ;;  %v438_v52 = vadd.f32 %v700_v36, %v342_v43  ;;  %v305_v53 = vmul.f32 %v640_v45, %v829_v0  ;;  %v641_v54 = vunpack.c.h.bf16 %v741_v32  ;;  %v705_v55 = vunpack.c.h.bf16 %v756_v37  ;;  %v761_v41 = vld [vmem:[%s824_s23 + $0x68] sm:$0xff]  }
  0x29   : > { %501 = vst.msk [vmem:[%s860_s5 + $0x60] sm:$0xff] %vm488_vm0, %v468_v48  ;;  %v469_v57 = vmax.f32 %v437_v49, 0.0  ;;  %v343_v58 = vadd.f32 %v840_v11, %v304_v50  ;;  %v644_v59 = vunpack.c.l.bf16 %v742_v46  ;;  %v708_v60 = vunpack.c.l.bf16 %v757_v47  ;;  %v747_v50 = vld [vmem:[%s819_s20 + $0x70] sm:$0xff]  }
  0x2a   : > { %v470_v62 = vmax.f32 %v438_v52, 0.0  ;;  %v344_v63 = vadd.f32 %v840_v11, %v305_v53  ;;  %v306_v1 = vmul.f32 %v641_v54, %v829_v0  ;;  %v645_v2 = vunpack.c.h.bf16 %v742_v46 }
  0x2b   : > { %502 = vst.msk [vmem:[%s860_s5 + $0x68] sm:$0xff] %vm488_vm0, %v469_v57  ;;  %v439_v3 = vadd.f32 %v701_v44, %v343_v58  ;;  %v307_v4 = vmul.f32 %v644_v59, %v829_v0  ;;  %v709_v5 = vunpack.c.h.bf16 %v757_v47  ;;  %v648_v6 = vunpack.c.l.bf16 %v743_v56  ;;  %v762_v59 = vld [vmem:[%s824_s23 + $0x70] sm:$0xff]  }
  0x2c   : > { %503 = vst.msk [vmem:[%s860_s5 + $0x70] sm:$0xff] %vm488_vm0, %v470_v62  ;;  %v440_v7 = vadd.f32 %v704_v51, %v344_v63  ;;  %v345_v8 = vadd.f32 %v840_v11, %v306_v1  ;;  %v308_v9 = vmul.f32 %v645_v2, %v829_v0  ;;  %v712_v10 = vunpack.c.l.bf16 %v758_v61 }
  0x2d   : > { %v471_v13 = vmax.f32 %v439_v3, 0.0  ;;  %v346_v14 = vadd.f32 %v840_v11, %v307_v4  ;;  %v309_v15 = vmul.f32 %v648_v6, %v829_v0  ;;  %v649_v16 = vunpack.c.h.bf16 %v743_v56 }
  0x2e   : > { %v472_v18 = vmax.f32 %v440_v7, 0.0  ;;  %v441_v19 = vadd.f32 %v705_v55, %v345_v8  ;;  %v347_v20 = vadd.f32 %v840_v11, %v308_v9  ;;  %v713_v21 = vunpack.c.h.bf16 %v758_v61 }
  0x2f   : > { %504 = vst.msk [vmem:[%s860_s5 + $0x78] sm:$0xff] %vm488_vm0, %v471_v13  ;;  %v442_v22 = vadd.f32 %v708_v60, %v346_v14  ;;  %v348_v23 = vadd.f32 %v840_v11, %v309_v15  ;;  %v310_v24 = vmul.f32 %v649_v16, %v829_v0  ;;  %v652_v25 = vunpack.c.l.bf16 %v744_v12 }
  0x30   : > { %505 = vst.msk [vmem:[%s860_s5 + $0x80] sm:$0xff] %vm488_vm0, %v472_v18  ;;  %v473_v27 = vmax.f32 %v441_v19, 0.0  ;;  %v443_v28 = vadd.f32 %v709_v5, %v347_v20  ;;  %v716_v29 = vunpack.c.l.bf16 %v759_v17  ;;  %v653_v30 = vunpack.c.h.bf16 %v744_v12  ;;  %v748_v5 = vld [vmem:[%s819_s20 + $0x78] sm:$0xff]  }
  0x31   : > { %v474_v32 = vmax.f32 %v442_v22, 0.0  ;;  %v444_v33 = vadd.f32 %v712_v10, %v348_v23  ;;  %v349_v34 = vadd.f32 %v840_v11, %v310_v24  ;;  %v311_v35 = vmul.f32 %v652_v25, %v829_v0  ;;  %v763_v10 = vld [vmem:[%s824_s23 + $0x78] sm:$0xff]  }
  0x32   : > { %506 = vst.msk [vmem:[%s860_s5 + $0x88] sm:$0xff] %vm488_vm0, %v473_v27  ;;  %v475_v36 = vmax.f32 %v443_v28, 0.0  ;;  %v312_v37 = vmul.f32 %v653_v30, %v829_v0  ;;  %v717_v38 = vunpack.c.h.bf16 %v759_v17  ;;  %v656_v39 = vunpack.c.l.bf16 %v745_v26 }
  0x33   : > { %507 = vst.msk [vmem:[%s860_s5 + $0x90] sm:$0xff] %vm488_vm0, %v474_v32  ;;  %v476_v42 = vmax.f32 %v444_v33, 0.0  ;;  %v445_v43 = vadd.f32 %v713_v21, %v349_v34  ;;  %v350_v44 = vadd.f32 %v840_v11, %v311_v35  ;;  %v720_v45 = vunpack.c.l.bf16 %v760_v31 }
  0x34   : > { %508 = vst.msk [vmem:[%s860_s5 + $0x98] sm:$0xff] %vm488_vm0, %v475_v36  ;;  %v351_v46 = vadd.f32 %v840_v11, %v312_v37  ;;  %v313_v47 = vmul.f32 %v656_v39, %v829_v0  ;;  %v657_v48 = vunpack.c.h.bf16 %v745_v26  ;;  %v721_v49 = vunpack.c.h.bf16 %v760_v31 }
  0x35   : > { %509 = vst.msk [vmem:[%s860_s5 + $0xa0] sm:$0xff] %vm488_vm0, %v476_v42  ;;  %v477_v51 = vmax.f32 %v445_v43, 0.0  ;;  %v446_v52 = vadd.f32 %v716_v29, %v350_v44  ;;  %v660_v53 = vunpack.c.l.bf16 %v746_v40  ;;  %v724_v54 = vunpack.c.l.bf16 %v761_v41 }
  0x36   : > { %v447_v55 = vadd.f32 %v717_v38, %v351_v46  ;;  %v352_v56 = vadd.f32 %v840_v11, %v313_v47  ;;  %v314_v57 = vmul.f32 %v657_v48, %v829_v0  ;;  %v661_v58 = vunpack.c.h.bf16 %v746_v40 }
  0x37   : > { %510 = vst.msk [vmem:[%s860_s5 + $0xa8] sm:$0xff] %vm488_vm0, %v477_v51  ;;  %v478_v60 = vmax.f32 %v446_v52, 0.0  ;;  %v315_v61 = vmul.f32 %v660_v53, %v829_v0  ;;  %v725_v62 = vunpack.c.h.bf16 %v761_v41  ;;  %v664_v63 = vunpack.c.l.bf16 %v747_v50 }
  0x38   : > { %v479_v1 = vmax.f32 %v447_v55, 0.0  ;;  %v448_v2 = vadd.f32 %v720_v45, %v352_v56  ;;  %v353_v3 = vadd.f32 %v840_v11, %v314_v57  ;;  %v316_v4 = vmul.f32 %v661_v58, %v829_v0 }
  0x39   : > { %511 = vst.msk [vmem:[%s860_s5 + $0xb0] sm:$0xff] %vm488_vm0, %v478_v60  ;;  %v354_v6 = vadd.f32 %v840_v11, %v315_v61  ;;  %v317_v7 = vmul.f32 %v664_v63, %v829_v0  ;;  %v728_v8 = vunpack.c.l.bf16 %v762_v59  ;;  %v665_v9 = vunpack.c.h.bf16 %v747_v50 }
  0x3a   : > { %512 = vst.msk [vmem:[%s860_s5 + $0xb8] sm:$0xff] %vm488_vm0, %v479_v1  ;;  %v480_v12 = vmax.f32 %v448_v2, 0.0  ;;  %v449_v13 = vadd.f32 %v721_v49, %v353_v3  ;;  %v355_v14 = vadd.f32 %v840_v11, %v316_v4  ;;  %v729_v15 = vunpack.c.h.bf16 %v762_v59 }
  0x3b   : > { %v450_v16 = vadd.f32 %v724_v54, %v354_v6  ;;  %v356_v17 = vadd.f32 %v840_v11, %v317_v7  ;;  %v318_v18 = vmul.f32 %v665_v9, %v829_v0  ;;  %v668_v19 = vunpack.c.l.bf16 %v748_v5 }
  0x3c   : > { %513 = vst.msk [vmem:[%s860_s5 + $0xc0] sm:$0xff] %vm488_vm0, %v480_v12  ;;  %v481_v20 = vmax.f32 %v449_v13, 0.0  ;;  %v451_v21 = vadd.f32 %v725_v62, %v355_v14  ;;  %v732_v22 = vunpack.c.l.bf16 %v763_v10  ;;  %v669_v23 = vunpack.c.h.bf16 %v748_v5 }
  0x3d   : > { %v482_v24 = vmax.f32 %v450_v16, 0.0  ;;  %v452_v25 = vadd.f32 %v728_v8, %v356_v17  ;;  %v357_v26 = vadd.f32 %v840_v11, %v318_v18  ;;  %v319_v27 = vmul.f32 %v668_v19, %v829_v0 }
  0x3e   : > { %514 = vst.msk [vmem:[%s860_s5 + $0xc8] sm:$0xff] %vm488_vm0, %v481_v20  ;;  %v483_v28 = vmax.f32 %v451_v21, 0.0  ;;  %v320_v29 = vmul.f32 %v669_v23, %v829_v0  ;;  %v733_v30 = vunpack.c.h.bf16 %v763_v10 }
  0x3f   : > { %515 = vst.msk [vmem:[%s860_s5 + $0xd0] sm:$0xff] %vm488_vm0, %v482_v24  ;;  %v484_v31 = vmax.f32 %v452_v25, 0.0  ;;  %v453_v32 = vadd.f32 %v729_v15, %v357_v26  ;;  %v358_v33 = vadd.f32 %v840_v11, %v319_v27 }
  0x40   : > { %516 = vst.msk [vmem:[%s860_s5 + $0xd8] sm:$0xff] %vm488_vm0, %v483_v28  ;;  %v359_v34 = vadd.f32 %v840_v11, %v320_v29 }
  0x41   : > { %517 = vst.msk [vmem:[%s860_s5 + $0xe0] sm:$0xff] %vm488_vm0, %v484_v31  ;;  %v485_v35 = vmax.f32 %v453_v32, 0.0  ;;  %v454_v36 = vadd.f32 %v732_v22, %v358_v33 }
  0x42   : > { %v455_v37 = vadd.f32 %v733_v30, %v359_v34 }
  0x43   : > { %518 = vst.msk [vmem:[%s860_s5 + $0xe8] sm:$0xff] %vm488_vm0, %v485_v35  ;;  %v486_v0 = vmax.f32 %v454_v36, 0.0 }
  0x44   : > { %v487_v38 = vmax.f32 %v455_v37, 0.0 }
  0x45   : > { %519 = vst.msk [vmem:[%s860_s5 + $0xf0] sm:$0xff] %vm488_vm0, %v486_v0 }
  0x46   : > { %520 = vst.msk [vmem:[%s860_s5 + $0xf8] sm:$0xff] %vm488_vm0, %v487_v38 }
  0x47 PF: > { %s14_s15 = sadd.s32 1, %s778_s15  }
  0x48   : > { %p11_p4 = scmp.ge.s32.totalorder %s14_s15, 4  }
  0x4a   :  { %13 = sbr.rel (!%p11_p4) target bundleno = 1 (0x1), region = 69 }

// kernel: basic_block.3
= control target key start
LH: loop header
LB: loop body
LE: loop exit
PB: predicated region body
PF: predicated region fallthrough
CT: control target
= control target key end

     0   :  { %s2132_s12 = smov 0   ;;  %s2622_s0 = inlined_call_operand.vmem [shape: bf16[2,16,16,4], index: 0, kind: input, shape index: {}]   ;;  %s2623_s1 = inlined_call_operand.vmem [shape: bf16[3,12,4], index: 1, kind: input, shape index: {}]   ;;  %s2624_s2 = inlined_call_operand.vmem [shape: bf16[2,16,16,4], index: 2, kind: output, shape index: {0}]   ;;  %s2625_s3 = inlined_call_operand.vmem [shape: f32[2,2,4], index: 3, kind: output, shape index: {1}]  }
   0x1 LB: > { %s1699_s13 = sadd.s32 4294967295, %s2107_s12   ;;  %p1703_p0 = scmp.ge.s32.totalorder %s2107_s12, 1  ;;  %s2107_s12 = sphi %s2132_s12, %s14_s12  }
   0x2   : > { %p140_p1 = scmp.lt.s32.totalorder %s2107_s12, 3 }
   0x4   : > { %p141_p2 = pnand %p1703_p0, %p140_p1 }
   0x5   : > { %vm502_vm0 = vcmask (!%p141_p2), 1047552   ;;  %vm503_vm1 = vsmask.f32 (!%p141_p2), 7424  ;;  %v2109_v0 = vmov (!%p141_p2), 0   ;;  %s2110_s14 = smov (!%p141_p2), 4   ;;  %p168_p3 = scmp.lt.s32.totalorder (!%p141_p2), %s1699_s13, 1 }
   0x6   : > { %144 = sbr.rel (%p141_p2) target bundleno = 471 (0x1d7), region = 28  ;;  %523 = vrot.lane.b32.xlu0 (!%p141_p2), %v2109_v0, %s2110_s14  ;;  %v451_v1 = vrot.slane (!%p141_p2), %v2109_v0, 1  ;;  %vm2143_vm2 = vmand (!%p141_p2), %vm502_vm0, %vm503_vm1  ;;  %vm738_vm3 = vcmask (!%p141_p2), 1045504   ;;  %s2111_s15 = smov (!%p141_p2), 8   ;;  %v2098_v4 = vld [vmem:[%s2623_s1 + $0x8] sm:$0x3f] (!%p141_p2)  }
   0x7   : > { %v2099_v5 = vld [vmem:[%s2623_s1] sm:$0x3f] (!%p141_p2)   ;;  %2067 = vmatprep.subr.msk.bf16.mxu1 (!%p141_p2), %vm738_vm3, %v2098_v4  ;;  %v740_v6 = vsel (!%p141_p2), %vm738_vm3, %v2098_v4, 0  ;;  %v2100_v7 = vld [vmem:[%s2623_s1 + $0x10] sm:$0x3f] (!%p141_p2)   ;;  %vm431_vm4 = vcmask (!%p141_p2), 1040384  }
   0x8   : > { %v505_v3 = vsel (!%p141_p2), %vm2143_vm2, %v451_v1, 0  ;;  %2068 = vmatprep.subr.msk.bf16.mxu0 (!%p141_p2), %vm738_vm3, %v2099_v5  ;;  %1900 = vmatpush3.bf16.msra.mxu1 (!%p141_p2), %v740_v6  ;;  %v2174_v9 = vsel (!%p141_p2), %vm738_vm3, %v2099_v5, 0  ;;  %v2180_v11 = vsel (!%p141_p2), %vm738_vm3, %v2100_v7, 0  ;;  %vm432_vm5 = vsmask.f32 (!%p141_p2), 256 }
   0x9   : > { %571 = vrot.lane.b32.xlu1 (!%p141_p2), %v505_v3, %s2111_s15  ;;  %1934 = vmatpush3.bf16.msra.mxu0 (!%p141_p2), %v2174_v9  ;;  %vm2284_vm6 = vmand (!%p141_p2), %vm431_vm4, %vm432_vm5  ;;  %vm603_vm7 = vcmask (!%p141_p2), 31744   ;;  %vm652_vm8 = vcmask (!%p141_p2), 64512   ;;  %vm705_vm9 = vcmask (!%p141_p2), 97280   ;;  %vm1580_vm10 = vcmask (!%p141_p2), 27648  }
   0xa   : > { %2069 = vmatprep.subr.msk.bf16.mxu1 (!%p141_p2), %vm738_vm3, %v2099_v5  ;;  %2070 = vmatprep.subr.msk.bf16.mxu0 (!%p141_p2), %vm738_vm3, %v2100_v7  ;;  %vm1450_vm11 = vcmask (!%p141_p2), 25600  }
   0xd   : > { %s2631_s13 = smov (!%p168_p3, %s1699_s13), 1 }
   0xe   : > { %s1814_s18 = sshll.u32 %s2631_s13, 7  ;;  %s1708_s29 = sshll.u32 %s2631_s13, 1 }
   0xf   : > { %s2164_s23 = scalar_lea.vmem %s2622_s0, %s1814_s18  ;;  %s2476_s28 = scalar_lea.vmem %s2624_s2, %s1814_s18 }
  0x10   : > { %v2082_v8 = vld [vmem:[%s2164_s23 + $0x8] sm:$0xff]   ;;  %v2083_v10 = vld [vmem:[%s2164_s23] sm:$0xff]   ;;  %v2084_v16 = vld [vmem:[%s2164_s23 + $0x18] sm:$0xff]   ;;  %s181_s5 = scalar_lea.vmem %s2625_s3, %s1708_s29 }
  0x11   : > { %527 = vrot.lane.b32.xlu1 %v2082_v8, %s2110_s14  ;;  %v310_v12 = vshrl.u32 %v2082_v8, 16  ;;  %v313_v13 = vshll.u32 %v2082_v8, 16  ;;  %525 = vrot.lane.b32.xlu0 %v2083_v10, %s2110_s14  ;;  %v303_v14 = vshrl.u32 %v2083_v10, 16  ;;  %v306_v15 = vshll.u32 %v2083_v10, 16  ;;  %v2085_v17 = vld [vmem:[%s2164_s23 + $0x10] sm:$0xff]   ;;  %v2086_v27 = vld [vmem:[%s2164_s23 + $0x28] sm:$0xff]  }
  0x12   : > { %v324_v22 = vshrl.u32 %v2084_v16, 16  ;;  %v327_v23 = vshll.u32 %v2084_v16, 16  ;;  %v317_v25 = vshrl.u32 %v2085_v17, 16  ;;  %v320_v26 = vshll.u32 %v2085_v17, 16  ;;  %v2189_v28 = vld [vmem:[%s2164_s23 + $0x20] sm:$0xff]   ;;  %v2088_v45 = vld [vmem:[%s2164_s23 + $0x38] sm:$0xff]  }
  0x13   : > { %v455_v18 = vrot.slane %v313_v13, 1  ;;  %v312_v19 = vrot.slane %v310_v12, 7  ;;  %v453_v20 = vrot.slane %v306_v15, 1  ;;  %v305_v21 = vrot.slane %v303_v14, 7  ;;  %v2089_v52 = vld [vmem:[%s2164_s23 + $0x30] sm:$0xff]   ;;  %v2090_v58 = vld [vmem:[%s2164_s23 + $0x48] sm:$0xff]  }
  0x14   : > { %v326_v31 = vrot.slane %v324_v22, 7  ;;  %v459_v32 = vrot.slane %v327_v23, 1  ;;  %v457_v35 = vrot.slane %v320_v26, 1  ;;  %v319_v37 = vrot.slane %v317_v25, 7  ;;  %v2091_v62 = vld [vmem:[%s2164_s23 + $0x40] sm:$0xff]   ;;  %v2229_v4 = vld [vmem:[%s2164_s23 + $0x58] sm:$0xff]  }
  0x15   : > { %v456_v24 = vor.u32 %v455_v18, %v310_v12  ;;  %v2191_v29 = vor.u32 %v313_v13, %v312_v19  ;;  %v454_v30 = vor.u32 %v453_v20, %v303_v14  ;;  %v2193_v33 = vor.u32 %v306_v15, %v305_v21  ;;  %v2093_v8 = vld [vmem:[%s2164_s23 + $0x50] sm:$0xff]  }
  0x16   : > { %v338_v38 = vshrl.u32 %v2086_v27, 16  ;;  %v460_v39 = vor.u32 %v459_v32, %v324_v22  ;;  %v341_v40 = vshll.u32 %v2086_v27, 16  ;;  %v2201_v41 = vor.u32 %v327_v23, %v326_v31 }
  0x17   : > { %v507_v34 = vsel %vm2143_vm2, %v456_v24, 0  ;;  %v506_v36 = vsel %vm2143_vm2, %v454_v30, 0  ;;  %v458_v42 = vor.u32 %v457_v35, %v317_v25  ;;  %v334_v44 = vshll.u32 %v2189_v28, 16  ;;  %v2095_v30 = vld [vmem:[%s2164_s23 + $0x60] sm:$0xff]  }
  0x18   : > { %575 = vrot.lane.b32.xlu1 %v507_v34, %s2111_s15  ;;  %573 = vrot.lane.b32.xlu0 %v506_v36, %s2111_s15  ;;  %v340_v43 = vrot.slane %v338_v38, 7  ;;  %v2206_v46 = vor.u32 %v320_v26, %v319_v37  ;;  %v509_v47 = vsel %vm2143_vm2, %v460_v39, 0  ;;  %v463_v48 = vrot.slane %v341_v40, 1  ;;  %v2094_v37 = vld [vmem:[%s2164_s23 + $0x68] sm:$0xff]  }
  0x19   : > { %v508_v49 = vsel %vm2143_vm2, %v458_v42, 0  ;;  %v331_v50 = vshrl.u32 %v2189_v28, 16  ;;  %v461_v51 = vrot.slane %v334_v44, 1  ;;  %v355_v54 = vshll.u32 %v2088_v45, 16 }
  0x1a   : > { %v2215_v53 = vor.u32 %v341_v40, %v340_v43  ;;  %v464_v55 = vor.u32 %v463_v48, %v338_v38  ;;  %v348_v57 = vshll.u32 %v2089_v52, 16  ;;  %v352_v59 = vshrl.u32 %v2088_v45, 16 }
  0x1b   : > { %v462_v56 = vor.u32 %v461_v51, %v331_v50  ;;  %v467_v60 = vrot.slane %v355_v54, 1  ;;  %v345_v1 = vshrl.u32 %v2089_v52, 16  ;;  %v366_v5 = vshrl.u32 %v2090_v58, 16 }
  0x1c   : > { %531 = vrot.lane.b32.xlu1 %v2084_v16, %s2110_s14  ;;  %529 = vrot.lane.b32.xlu0 %v2085_v17, %s2110_s14  ;;  %v511_v61 = vsel %vm2143_vm2, %v464_v55, 0  ;;  %v465_v3 = vrot.slane %v348_v57, 1  ;;  %v369_v6 = vshll.u32 %v2090_v58, 16  ;;  %v359_v7 = vshrl.u32 %v2091_v62, 16 }
  0x1d   : > { %v510_v63 = vsel %vm2143_vm2, %v462_v56, 0  ;;  %v333_v10 = vrot.slane %v331_v50, 7  ;;  %v354_v12 = vrot.slane %v352_v59, 7  ;;  %v468_v13 = vor.u32 %v467_v60, %v352_v59 }
  0x1e   : > { %v380_v14 = vshrl.u32 %v2229_v4, 16  ;;  %v347_v15 = vrot.slane %v345_v1, 7  ;;  %v368_v16 = vrot.slane %v366_v5, 7  ;;  %v361_v17 = vrot.slane %v359_v7, 7 }
  0x1f   : > { %v373_v18 = vshrl.u32 %v2093_v8, 16  ;;  %v466_v19 = vor.u32 %v465_v3, %v345_v1  ;;  %v362_v20 = vshll.u32 %v2091_v62, 16  ;;  %v471_v22 = vrot.slane %v369_v6, 1 }
  0x20   : > { %579 = vrot.lane.b32.xlu1 %v509_v47, %s2111_s15  ;;  %577 = vrot.lane.b32.xlu0 %v508_v49, %s2111_s15  ;;  %v382_v21 = vrot.slane %v380_v14, 7  ;;  %v513_v24 = vsel %vm2143_vm2, %v468_v13, 0  ;;  %v383_v25 = vshll.u32 %v2229_v4, 16  ;;  %v2239_v26 = vor.u32 %v334_v44, %v333_v10 }
  0x21   : > { %v375_v23 = vrot.slane %v373_v18, 7  ;;  %v2245_v31 = vor.u32 %v348_v57, %v347_v15  ;;  %v2247_v32 = vor.u32 %v369_v6, %v368_v16  ;;  %v2249_v34 = vor.u32 %v362_v20, %v361_v17 }
  0x22   : > { %v512_v35 = vsel %vm2143_vm2, %v466_v19, 0  ;;  %v469_v36 = vrot.slane %v362_v20, 1  ;;  %v2254_v38 = vor.u32 %v383_v25, %v382_v21  ;;  %v387_v39 = vshrl.u32 %v2095_v30, 16 }
  0x23   : > { %v394_v42 = vshrl.u32 %v2094_v37, 16  ;;  %v472_v43 = vor.u32 %v471_v22, %v366_v5  ;;  %v390_v48 = vshll.u32 %v2095_v30, 16  ;;  %v397_v49 = vshll.u32 %v2094_v37, 16 }
  0x24   : > { %535 = vrot.lane.b32.xlu1 %v2086_v27, %s2110_s14  ;;  %533 = vrot.lane.b32.xlu0 %v2189_v28, %s2110_s14  ;;  %v2241_v27 = vor.u32 %v355_v54, %v354_v12  ;;  %v376_v28 = vshll.u32 %v2093_v8, 16  ;;  %v389_v44 = vrot.slane %v387_v39, 7  ;;  %v475_v51 = vrot.slane %v383_v25, 1 }
  0x25   : > { %v396_v47 = vrot.slane %v394_v42, 7  ;;  %v515_v50 = vsel %vm2143_vm2, %v472_v43, 0  ;;  %v479_v5 = vrot.slane %v397_v49, 1  ;;  %v477_v12 = vrot.slane %v390_v48, 1 }
  0x26   : > { %v2256_v40 = vor.u32 %v376_v28, %v375_v23  ;;  %v2265_v54 = vor.u32 %v390_v48, %v389_v44  ;;  %v473_v56 = vrot.slane %v376_v28, 1  ;;  %v298_v28 = vrot.slane %v2109_v0, 7 }
  0x27   : > { %v2269_v57 = vor.u32 %v397_v49, %v396_v47  ;;  %v478_v17 = vor.u32 %v477_v12, %v387_v39  ;;  %v436_v0 = vsel %vm2284_vm6, 0, %v2191_v29  ;;  %v435_v43 = vsel %vm2284_vm6, 0, %v2193_v33 }
  0x28   : > { %583 = vrot.lane.b32.xlu1 %v511_v61, %s2111_s15  ;;  %581 = vrot.lane.b32.xlu0 %v510_v63, %s2111_s15  ;;  %v2097_v61 = vld [vmem:[%s2164_s23 + $0x78] sm:$0xff]   ;;  %v438_v33 = vsel %vm2284_vm6, 0, %v2201_v41  ;;  %v440_v41 = vsel %vm2284_vm6, 0, %v2215_v53  ;;  %v441_v12 = vsel %vm2284_vm6, 0, %v2245_v31  ;;  %v444_v31 = vsel %vm2284_vm6, 0, %v2247_v32 }
  0x29   : > { %v408_v1 = vshrl.u32 %v2097_v61, 16  ;;  %v518_v22 = vsel %vm2143_vm2, %v478_v17, 0 }
  0x2b   : > { %v410_v6 = vrot.slane %v408_v1, 7 }
  0x2c   : > { %539 = vrot.lane.b32.xlu1 %v2088_v45, %s2110_s14  ;;  %537 = vrot.lane.b32.xlu0 %v2089_v52, %s2110_s14  ;;  %v470_v45 = vor.u32 %v469_v36, %v359_v7  ;;  %v2096_v52 = vld [vmem:[%s2164_s23 + $0x70] sm:$0xff]  }
  0x2d   : > { %v401_v59 = vshrl.u32 %v2096_v52, 16  ;;  %v404_v63 = vshll.u32 %v2096_v52, 16 }
  0x2e   : > { %v514_v55 = vsel %vm2143_vm2, %v470_v45, 0 }
  0x2f   : > { %v403_v60 = vrot.slane %v401_v59, 7  ;;  %v481_v15 = vrot.slane %v404_v63, 1 }
  0x30   : > { %587 = vrot.lane.b32.xlu1 %v513_v24, %s2111_s15  ;;  %585 = vrot.lane.b32.xlu0 %v512_v35, %s2111_s15 }
  0x31   : > { %v2279_v7 = vor.u32 %v404_v63, %v403_v60  ;;  %v482_v20 = vor.u32 %v481_v15, %v401_v59 }
  0x33   : > { %v520_v23 = vsel %vm2143_vm2, %v482_v20, 0 }
  0x34   : > { %543 = vrot.lane.b32.xlu1 %v2090_v58, %s2110_s14  ;;  %541 = vrot.lane.b32.xlu0 %v2091_v62, %s2110_s14  ;;  %v476_v58 = vor.u32 %v475_v51, %v380_v14  ;;  %v474_v62 = vor.u32 %v473_v56, %v373_v18  ;;  %v411_v14 = vshll.u32 %v2097_v61, 16 }
  0x36   : > { %v517_v3 = vsel %vm2143_vm2, %v476_v58, 0  ;;  %v516_v10 = vsel %vm2143_vm2, %v474_v62, 0  ;;  %v2293_v16 = vor.u32 %v411_v14, %v410_v6  ;;  %v483_v21 = vrot.slane %v411_v14, 1 }
  0x38   : > { %591 = vrot.lane.b32.xlu1 %v515_v50, %s2111_s15  ;;  %589 = vrot.lane.b32.xlu0 %v514_v55, %s2111_s15  ;;  %v450_v18 = vsel %vm2284_vm6, 0, %v2293_v16  ;;  %v484_v24 = vor.u32 %v483_v21, %v408_v1 }
  0x3a   : > { %v521_v25 = vsel %vm2143_vm2, %v484_v24, 0 }
  0x3c   : > { %547 = vrot.lane.b32.xlu1 %v2229_v4, %s2110_s14  ;;  %545 = vrot.lane.b32.xlu0 %v2093_v8, %s2110_s14  ;;  %v449_v4 = vsel %vm2284_vm6, 0, %v2279_v7  ;;  %v480_v8 = vor.u32 %v479_v5, %v394_v42 }
  0x3e   : > { %v519_v19 = vsel %vm2143_vm2, %v480_v8, 0 }
  0x40   : > { %595 = vrot.lane.b32.xlu1 %v517_v3, %s2111_s15  ;;  %593 = vrot.lane.b32.xlu0 %v516_v10, %s2111_s15 }
  0x44   : > { %551 = vrot.lane.b32.xlu1 %v2094_v37, %s2110_s14  ;;  %549 = vrot.lane.b32.xlu0 %v2095_v30, %s2110_s14  ;;  %v434_v30 = vsel %vm2284_vm6, 0, %v298_v28 }
  0x48   : > { %599 = vrot.lane.b32.xlu1 %v519_v19, %s2111_s15  ;;  %597 = vrot.lane.b32.xlu0 %v518_v22, %s2111_s15  ;;  %v443_v22 = vsel %vm2284_vm6, 0, %v2249_v34  ;;  %v446_v34 = vsel %vm2284_vm6, 0, %v2254_v38 }
  0x4c   : > { %601 = vrot.lane.b32.xlu1 %v520_v23, %s2111_s15  ;;  %553 = vrot.lane.b32.xlu0 %v2096_v52, %s2110_s14  ;;  %v437_v52 = vsel %vm2284_vm6, 0, %v2206_v46 }
  0x50   : > { %690 = vrot.lane.b32.xlu1 %v521_v25, %s2111_s15  ;;  %687 = vrot.lane.b32.xlu0 %v2097_v61, %s2110_s14  ;;  %v439_v61 = vsel %vm2284_vm6, 0, %v2239_v26  ;;  %v442_v26 = vsel %vm2284_vm6, 0, %v2241_v27 }
  0x78   : > { %v524_v35 = vpop.permute.xlu0 %523 }
  0x79   : > { %v606_v36 = vsel %vm603_vm7, %v434_v30, %v524_v35 }
  0x7b   : > { %v572_v37 = vpop.permute.xlu1 %571 }
  0x7c   : > { %v2319_v39 = vsel %vm652_vm8, %v606_v36, %v572_v37  ;;  %v445_v37 = vsel %vm2284_vm6, 0, %v2256_v40  ;;  %v448_v40 = vsel %vm2284_vm6, 0, %v2269_v57 }
  0x7d   : > { %1935 = vmatprep.mubr.msk.bf16.mxu0 %vm705_vm9, %v2319_v39 }
  0x83   : > { %v528_v2 = vpop.permute.xlu1 %527  ;;  %v526_v42 = vpop.permute.xlu0 %525 }
  0x84   : > { %v612_v44 = vsel %vm603_vm7, %v436_v0, %v528_v2  ;;  %v609_v47 = vsel %vm603_vm7, %v435_v43, %v526_v42 }
  0x8a   : > { %v576_v45 = vpop.permute.xlu1 %575  ;;  %v574_v49 = vpop.permute.xlu0 %573 }
  0x8b   : > { %v658_v48 = vsel %vm652_vm8, %v612_v44, %v576_v45  ;;  %v656_v50 = vsel %vm652_vm8, %v609_v47, %v574_v49 }
  0x8c   : > { %1901 = vmatprep.mubr.msk.bf16.mxu1 %vm705_vm9, %v656_v50  ;;  %1936 = vmatmul.mubr.msk.bf16.vlgmr.msra.gmra.mrb[0].mxu0 %vm705_vm9, %v656_v50 }
  0x8d   : > { %1902 = vmatmul.mubr.msk.bf16.vlgmr.msra.gmra.mrb[0].mxu1 %vm705_vm9, %v658_v48  ;;  %1939 = vmatprep.mubr.msk.bf16.mxu0 %vm705_vm9, %v658_v48 }
  0x8e   : > { %v532_v29 = vpop.permute.xlu1 %531  ;;  %2002 = vmatpush3.bf16.msra.mxu1 %v2174_v9  ;;  %1968 = vmatpush3.bf16.msra.mxu0 %v2180_v11  ;;  %v530_v51 = vpop.permute.xlu0 %529 }
  0x8f   : > { %v618_v55 = vsel %vm603_vm7, %v438_v33, %v532_v29  ;;  %v615_v59 = vsel %vm603_vm7, %v437_v52, %v530_v51 }
  0x92   : > { %v580_v56 = vpop.permute.xlu1 %579  ;;  %v578_v60 = vpop.permute.xlu0 %577 }
  0x93   : > { %v662_v58 = vsel %vm652_vm8, %v618_v55, %v580_v56  ;;  %v660_v9 = vsel %vm652_vm8, %v615_v59, %v578_v60 }
  0x94   : > { %1905 = vmatprep.mubr.msk.bf16.mxu1 %vm705_vm9, %v660_v9  ;;  %1940 = vmatmul.mubr.msk.bf16.gmra.mrb[4].mxu0 %vm705_vm9, %v660_v9 }
  0x95   : > { %1906 = vmatmul.mubr.msk.bf16.gmra.mrb[4].mxu1 %vm705_vm9, %v662_v58  ;;  %1943 = vmatprep.mubr.msk.bf16.mxu0 %vm705_vm9, %v662_v58 }
  0x96   : > { %v536_v11 = vpop.permute.xlu1 %535  ;;  %v534_v46 = vpop.permute.xlu0 %533 }
  0x97   : > { %v624_v62 = vsel %vm603_vm7, %v440_v41, %v536_v11  ;;  %v621_v1 = vsel %vm603_vm7, %v439_v61, %v534_v46 }
  0x9a   : > { %v584_v63 = vpop.permute.xlu1 %583  ;;  %v582_v5 = vpop.permute.xlu0 %581 }
  0x9b   : > { %v666_v3 = vsel %vm652_vm8, %v624_v62, %v584_v63  ;;  %v664_v6 = vsel %vm652_vm8, %v621_v1, %v582_v5 }
  0x9c   : > { %1909 = vmatprep.mubr.msk.bf16.mxu1 %vm705_vm9, %v664_v6  ;;  %1944 = vmatmul.mubr.msk.bf16.gmra.mrb[8].mxu0 %vm705_vm9, %v664_v6 }
  0x9d   : > { %1910 = vmatmul.mubr.msk.bf16.gmra.mrb[8].mxu1 %vm705_vm9, %v666_v3  ;;  %1947 = vmatprep.mubr.msk.bf16.mxu0 %vm705_vm9, %v666_v3 }
  0x9e   : > { %v540_v53 = vpop.permute.xlu1 %539  ;;  %v538_v10 = vpop.permute.xlu0 %537 }
  0x9f   : > { %v630_v14 = vsel %vm603_vm7, %v442_v26, %v540_v53  ;;  %v627_v15 = vsel %vm603_vm7, %v441_v12, %v538_v10 }
  0xa2   : > { %v588_v8 = vpop.permute.xlu1 %587  ;;  %v586_v19 = vpop.permute.xlu0 %585 }
  0xa3   : > { %v670_v17 = vsel %vm652_vm8, %v630_v14, %v588_v8  ;;  %v668_v20 = vsel %vm652_vm8, %v627_v15, %v586_v19 }
  0xa4   : > { %1913 = vmatprep.mubr.msk.bf16.mxu1 %vm705_vm9, %v668_v20  ;;  %1948 = vmatmul.mubr.msk.bf16.gmra.mrb[12].mxu0 %vm705_vm9, %v668_v20 }
  0xa5   : > { %1914 = vmatmul.mubr.msk.bf16.gmra.mrb[12].mxu1 %vm705_vm9, %v670_v17  ;;  %1969 = vmatprep.mubr.msk.bf16.mxu0 %vm705_vm9, %v658_v48  ;;  %v447_v48 = vsel %vm2284_vm6, 0, %v2265_v54 }
  0xa6   : > { %v544_v27 = vpop.permute.xlu1 %543  ;;  %v542_v21 = vpop.permute.xlu0 %541 }
  0xa7   : > { %v636_v23 = vsel %vm603_vm7, %v444_v31, %v544_v27  ;;  %v633_v25 = vsel %vm603_vm7, %v443_v22, %v542_v21 }
  0xaa   : > { %v592_v24 = vpop.permute.xlu1 %591  ;;  %v590_v30 = vpop.permute.xlu0 %589 }
  0xab   : > { %v674_v28 = vsel %vm652_vm8, %v636_v23, %v592_v24  ;;  %v672_v35 = vsel %vm652_vm8, %v633_v25, %v590_v30 }
  0xac   : > { %1917 = vmatprep.mubr.msk.bf16.mxu1 %vm705_vm9, %v672_v35  ;;  %1970 = vmatmul.mubr.msk.bf16.vlgmr.msra.gmra.mrb[0].mxu0 %vm705_vm9, %v660_v9 }
  0xad   : > { %1918 = vmatmul.mubr.msk.bf16.gmra.mrb[16].mxu1 %vm705_vm9, %v674_v28  ;;  %1973 = vmatprep.mubr.msk.bf16.mxu0 %vm705_vm9, %v662_v58 }
  0xae   : > { %v548_v32 = vpop.permute.xlu1 %547  ;;  %v546_v36 = vpop.permute.xlu0 %545 }
  0xaf   : > { %v642_v2 = vsel %vm603_vm7, %v446_v34, %v548_v32  ;;  %v639_v0 = vsel %vm603_vm7, %v445_v37, %v546_v36 }
  0xb2   : > { %v596_v42 = vpop.permute.xlu1 %595  ;;  %v594_v44 = vpop.permute.xlu0 %593 }
  0xb3   : > { %v678_v43 = vsel %vm652_vm8, %v642_v2, %v596_v42  ;;  %v676_v45 = vsel %vm652_vm8, %v639_v0, %v594_v44 }
  0xb4   : > { %1921 = vmatprep.mubr.msk.bf16.mxu1 %vm705_vm9, %v676_v45  ;;  %1974 = vmatmul.mubr.msk.bf16.gmra.mrb[4].mxu0 %vm705_vm9, %v664_v6 }
  0xb5   : > { %1922 = vmatmul.mubr.msk.bf16.gmra.mrb[20].mxu1 %vm705_vm9, %v678_v43  ;;  %1977 = vmatprep.mubr.msk.bf16.mxu0 %vm705_vm9, %v666_v3 }
  0xb6   : > { %v552_v38 = vpop.permute.xlu1 %551  ;;  %v550_v47 = vpop.permute.xlu0 %549 }
  0xb7   : > { %v648_v49 = vsel %vm603_vm7, %v448_v40, %v552_v38  ;;  %v645_v29 = vsel %vm603_vm7, %v447_v48, %v550_v47 }
  0xba   : > { %v600_v50 = vpop.permute.xlu1 %599  ;;  %v598_v51 = vpop.permute.xlu0 %597 }
  0xbb   : > { %v682_v33 = vsel %vm652_vm8, %v648_v49, %v600_v50  ;;  %v680_v52 = vsel %vm652_vm8, %v645_v29, %v598_v51 }
  0xbc   : > { %1925 = vmatprep.mubr.msk.bf16.mxu1 %vm705_vm9, %v680_v52  ;;  %1978 = vmatmul.mubr.msk.bf16.gmra.mrb[8].mxu0 %vm705_vm9, %v668_v20 }
  0xbd   : > { %1926 = vmatmul.mubr.msk.bf16.gmra.mrb[24].mxu1 %vm705_vm9, %v682_v33  ;;  %1981 = vmatprep.mubr.msk.bf16.mxu0 %vm705_vm9, %v670_v17 }
  0xbe   : > { %v602_v57 = vpop.permute.xlu1 %601  ;;  %v554_v54 = vpop.permute.xlu0 %553 }
  0xbf   : > { %v651_v55 = vsel %vm603_vm7, %v449_v4, %v554_v54 }
  0xc0   : > { %v684_v56 = vsel %vm652_vm8, %v651_v55, %v602_v57 }
  0xc1   : > { %1929 = vmatprep.mubr.msk.bf16.mxu1 %vm705_vm9, %v684_v56 }
  0xc2   : > { %v691_v59 = vpop.permute.xlu1 %690  ;;  %v688_v58 = vpop.permute.xlu0 %687 }
  0xc3   : > { %v694_v60 = vsel %vm603_vm7, %v450_v18, %v688_v58 }
  0xc4   : > { %v696_v9 = vsel %vm652_vm8, %v694_v60, %v691_v59  ;;  %1982 = vmatmul.mubr.msk.bf16.gmra.mrb[12].mxu0 %vm705_vm9, %v672_v35 }
  0xc5   : > { %1930 = vmatmul.mubr.msk.bf16.gmra.mrb[28].mxu1 %vm705_vm9, %v696_v9  ;;  %1985 = vmatprep.mubr.msk.bf16.mxu0 %vm705_vm9, %v674_v28 }
  0xc6   : > { %1951 = vmatprep.mubr.msk.bf16.mxu1 %vm705_vm9, %v670_v17 }
  0xcc   : > { %1986 = vmatmul.mubr.msk.bf16.gmra.mrb[16].mxu0 %vm705_vm9, %v676_v45 }
  0xcd   : > { %1952 = vmatmul.mubr.msk.bf16.vlgmr.msra.gmra.mrb[16].mxu1 %vm705_vm9, %v672_v35  ;;  %1989 = vmatprep.mubr.msk.bf16.mxu0 %vm705_vm9, %v678_v43 }
  0xce   : > { %1955 = vmatprep.mubr.msk.bf16.mxu1 %vm705_vm9, %v674_v28 }
  0xd4   : > { %1990 = vmatmul.mubr.msk.bf16.gmra.mrb[20].mxu0 %vm705_vm9, %v680_v52 }
  0xd5   : > { %1956 = vmatmul.mubr.msk.bf16.gmra.mrb[20].mxu1 %vm705_vm9, %v676_v45  ;;  %1993 = vmatprep.mubr.msk.bf16.mxu0 %vm705_vm9, %v682_v33 }
  0xd6   : > { %1959 = vmatprep.mubr.msk.bf16.mxu1 %vm705_vm9, %v678_v43 }
  0xdc   : > { %1994 = vmatmul.mubr.msk.bf16.gmra.mrb[24].mxu0 %vm705_vm9, %v684_v56 }
  0xdd   : > { %1960 = vmatmul.mubr.msk.bf16.gmra.mrb[24].mxu1 %vm705_vm9, %v680_v52  ;;  %1997 = vmatprep.mubr.msk.bf16.mxu0 %vm705_vm9, %v696_v9 }
  0xde   : > { %1963 = vmatprep.mubr.msk.bf16.mxu1 %vm705_vm9, %v682_v33 }
  0xe4   : > { %1998 = vmatmul.mubr.msk.bf16.gmra.mrb[28].mxu0 %vm705_vm9, %v2319_v39 }
  0xe5   : > { %1964 = vmatmul.mubr.msk.bf16.gmra.mrb[28].mxu1 %vm705_vm9, %v684_v56 }
 0x160   : > { %v1903_v7 = vpop.f32.mrb[0].mxu1 }
 0x161   : > { %v776_v13 = vpop.f32.mrb[1].mxu1 }
 0x162   : > { %v1904_v4 = vpop.f32.mrb[2].mxu1 }
 0x163   : > { %v779_v16 = vpop.f32.mrb[3].mxu1 }
 0x168   : > { %v1907_v18 = vpop.f32.mrb[4].mxu1 }
 0x169   : > { %v792_v11 = vpop.f32.mrb[5].mxu1 }
 0x16a   : > { %v1908_v41 = vpop.f32.mrb[6].mxu1 }
 0x16b   : > { %v795_v46 = vpop.f32.mrb[7].mxu1 }
 0x170   : > { %v2455_v61 = vpop.f32.mrb[8].mxu1 }
 0x171   : > { %v2457_v62 = vpop.f32.mrb[9].mxu1 }
 0x172   : > { %v2459_v63 = vpop.f32.mrb[10].mxu1 }
 0x173   : > { %v2461_v1 = vpop.f32.mrb[11].mxu1 }
 0x178   : > { %v2463_v39 = vpop.f32.mrb[12].mxu1 }
 0x179   : > { %v2465_v3 = vpop.f32.mrb[13].mxu1 }
 0x17a   : > { %v2467_v5 = vpop.f32.mrb[14].mxu1 }
 0x17b   : > { %v2469_v6 = vpop.f32.mrb[15].mxu1 }
 0x17f   : > { %v1971_v53 = vpop.f32.mrb[0].mxu0 }
 0x180   : > { %v2003_v26 = vadd.f32 %v1971_v53, %v1903_v7  ;;  %v1119_v10 = vpop.f32.mrb[1].mxu0 }
 0x181   : > { %v2004_v12 = vadd.f32 %v1119_v10, %v776_v13  ;;  %v1972_v14 = vpop.f32.mrb[2].mxu0 }
 0x182   : > { %v1818_v8 = vpack.c.bf16 %v2003_v26, %v2003_v26  ;;  %v2005_v15 = vadd.f32 %v1972_v14, %v1904_v4  ;;  %v1122_v17 = vpop.f32.mrb[3].mxu0  ;;  %v1349_v31 = vmul.f32 %v2003_v26, %v2003_v26  ;;  %v1281_v35 = vsel %vm603_vm7, %v2003_v26, 0.0 }
 0x183   : > { %v1347_v19 = vmul.f32 %v2004_v12, %v2004_v12  ;;  %v1816_v20 = vpack.c.bf16 %v2004_v12, %v2004_v12  ;;  %v2006_v27 = vadd.f32 %v1122_v17, %v779_v16  ;;  %v1278_v22 = vsel %vm603_vm7, %v2004_v12, 0.0 }
 0x184   : > { %1583 = vst.msk [vmem:[%s2476_s28 + $0x8] sm:$0xf] %vm1580_vm10, %v1818_v8  ;;  %v1819_v21 = vpack.c.bf16 %v2005_v15, %v2005_v15  ;;  %v1350_v28 = vmul.f32 %v2005_v15, %v2005_v15  ;;  %v1382_v43 = vsel %vm603_vm7, %v1349_v31, 0.0  ;;  %v1283_v38 = vsel %vm603_vm7, %v2005_v15, 0.0 }
 0x185   : > { %1581 = vst.msk [vmem:[%s2476_s28] sm:$0xf] %vm1580_vm10, %v1816_v20  ;;  %v1279_v23 = vsel %vm603_vm7, %v2006_v27, 0.0  ;;  %v1348_v24 = vmul.f32 %v2006_v27, %v2006_v27  ;;  %v1817_v25 = vpack.c.bf16 %v2006_v27, %v2006_v27  ;;  %v1379_v32 = vsel %vm603_vm7, %v1347_v19, 0.0 }
 0x186   : > { %1584 = vst.msk [vmem:[%s2476_s28 + $0xc] sm:$0xf] %vm1580_vm10, %v1819_v21  ;;  %v1280_v30 = vadd.f32 %v1279_v23, %v1278_v22  ;;  %v1384_v40 = vsel %vm603_vm7, %v1350_v28, 0.0 }
 0x187   : > { %v1380_v34 = vsel %vm603_vm7, %v1348_v24, 0.0  ;;  %1582 = vst.msk [vmem:[%s2476_s28 + $0x4] sm:$0xf] %vm1580_vm10, %v1817_v25  ;;  %v1975_v36 = vpop.f32.mrb[4].mxu0 }
 0x188   : > { %v1282_v37 = vadd.f32 %v1281_v35, %v1280_v30  ;;  %v1381_v2 = vadd.f32 %v1380_v34, %v1379_v32  ;;  %v2007_v42 = vadd.f32 %v1975_v36, %v1907_v18  ;;  %v1135_v0 = vpop.f32.mrb[5].mxu0 }
 0x189   : > { %v2008_v44 = vadd.f32 %v1135_v0, %v792_v11  ;;  %v1976_v45 = vpop.f32.mrb[6].mxu0 }
 0x18a   : > { %v1383_v47 = vadd.f32 %v1382_v43, %v1381_v2  ;;  %v1822_v48 = vpack.c.bf16 %v2007_v42, %v2007_v42  ;;  %v1138_v49 = vpop.f32.mrb[7].mxu0  ;;  %v1284_v50 = vadd.f32 %v1283_v38, %v1282_v37  ;;  %v2009_v57 = vadd.f32 %v1976_v45, %v1908_v41 }
 0x18b   : > { %v1285_v29 = vsel %vm603_vm7, %v2008_v44, 0.0  ;;  %v1351_v33 = vmul.f32 %v2008_v44, %v2008_v44  ;;  %v1820_v51 = vpack.c.bf16 %v2008_v44, %v2008_v44  ;;  %v2010_v54 = vadd.f32 %v1138_v49, %v795_v46 }
 0x18c   : > { %1587 = vst.msk [vmem:[%s2476_s28 + $0x18] sm:$0xf] %vm1580_vm10, %v1822_v48  ;;  %v1385_v52 = vadd.f32 %v1384_v40, %v1383_v47  ;;  %v1286_v55 = vadd.f32 %v1285_v29, %v1284_v50  ;;  %v1353_v59 = vmul.f32 %v2007_v42, %v2007_v42  ;;  %v1823_v60 = vpack.c.bf16 %v2009_v57, %v2009_v57 }
 0x18d   : > { %v1386_v56 = vsel %vm603_vm7, %v1351_v33, 0.0  ;;  %1585 = vst.msk [vmem:[%s2476_s28 + $0x10] sm:$0xf] %vm1580_vm10, %v1820_v51  ;;  %v1287_v9 = vsel %vm603_vm7, %v2010_v54, 0.0  ;;  %v1352_v7 = vmul.f32 %v2010_v54, %v2010_v54  ;;  %v1821_v13 = vpack.c.bf16 %v2010_v54, %v2010_v54 }
 0x18e   : > { %v1387_v58 = vadd.f32 %v1386_v56, %v1385_v52  ;;  %1588 = vst.msk [vmem:[%s2476_s28 + $0x1c] sm:$0xf] %vm1580_vm10, %v1823_v60  ;;  %v1288_v16 = vadd.f32 %v1287_v9, %v1286_v55  ;;  %v1289_v41 = vsel %vm603_vm7, %v2007_v42, 0.0  ;;  %v1354_v46 = vmul.f32 %v2009_v57, %v2009_v57 }
 0x18f   : > { %v1979_v4 = vpop.f32.mrb[8].mxu0  ;;  %v1388_v53 = vsel %vm603_vm7, %v1352_v7, 0.0  ;;  %1586 = vst.msk [vmem:[%s2476_s28 + $0x14] sm:$0xf] %vm1580_vm10, %v1821_v13  ;;  %v1390_v12 = vsel %vm603_vm7, %v1353_v59, 0.0  ;;  %v1291_v14 = vsel %vm603_vm7, %v2009_v57, 0.0 }
 0x190   : > { %v2011_v18 = vadd.f32 %v1979_v4, %v2455_v61  ;;  %v1151_v11 = vpop.f32.mrb[9].mxu0  ;;  %v1290_v8 = vadd.f32 %v1289_v41, %v1288_v16  ;;  %v1389_v15 = vadd.f32 %v1388_v53, %v1387_v58 }
 0x191   : > { %v2012_v26 = vadd.f32 %v1151_v11, %v2457_v62  ;;  %v1980_v10 = vpop.f32.mrb[10].mxu0  ;;  %v1392_v62 = vsel %vm603_vm7, %v1354_v46, 0.0 }
 0x192   : > { %v1154_v61 = vpop.f32.mrb[11].mxu0  ;;  %v1826_v17 = vpack.c.bf16 %v2011_v18, %v2011_v18  ;;  %v1391_v31 = vadd.f32 %v1390_v12, %v1389_v15  ;;  %v1292_v21 = vadd.f32 %v1291_v14, %v1290_v8  ;;  %v2013_v22 = vadd.f32 %v1980_v10, %v2459_v63 }
 0x193   : > { %v1293_v19 = vsel %vm603_vm7, %v2012_v26, 0.0  ;;  %v1355_v20 = vmul.f32 %v2012_v26, %v2012_v26  ;;  %v1824_v27 = vpack.c.bf16 %v2012_v26, %v2012_v26  ;;  %v2014_v24 = vadd.f32 %v1154_v61, %v2461_v1 }
 0x194   : > { %1591 = vst.msk [vmem:[%s2476_s28 + $0x28] sm:$0xf] %vm1580_vm10, %v1826_v17  ;;  %v1357_v25 = vmul.f32 %v2011_v18, %v2011_v18  ;;  %v1294_v28 = vadd.f32 %v1293_v19, %v1292_v21  ;;  %v1393_v30 = vadd.f32 %v1392_v62, %v1391_v31  ;;  %v1827_v35 = vpack.c.bf16 %v2013_v22, %v2013_v22 }
 0x195   : > { %v1394_v23 = vsel %vm603_vm7, %v1355_v20, 0.0  ;;  %1589 = vst.msk [vmem:[%s2476_s28 + $0x20] sm:$0xf] %vm1580_vm10, %v1824_v27  ;;  %v1295_v32 = vsel %vm603_vm7, %v2014_v24, 0.0  ;;  %v1356_v34 = vmul.f32 %v2014_v24, %v2014_v24  ;;  %v1825_v63 = vpack.c.bf16 %v2014_v24, %v2014_v24 }
 0x196   : > { %v1395_v37 = vadd.f32 %v1394_v23, %v1393_v30  ;;  %v1296_v2 = vadd.f32 %v1295_v32, %v1294_v28  ;;  %v1297_v43 = vsel %vm603_vm7, %v2011_v18, 0.0  ;;  %v1358_v44 = vmul.f32 %v2013_v22, %v2013_v22  ;;  %1592 = vst.msk [vmem:[%s2476_s28 + $0x2c] sm:$0xf] %vm1580_vm10, %v1827_v35 }
 0x197   : > { %v1983_v36 = vpop.f32.mrb[12].mxu0  ;;  %v1396_v1 = vsel %vm603_vm7, %v1356_v34, 0.0  ;;  %1590 = vst.msk [vmem:[%s2476_s28 + $0x24] sm:$0xf] %vm1580_vm10, %v1825_v63  ;;  %v1398_v40 = vsel %vm603_vm7, %v1357_v25, 0.0  ;;  %v1299_v47 = vsel %vm603_vm7, %v2013_v22, 0.0 }
 0x198   : > { %v2015_v42 = vadd.f32 %v1983_v36, %v2463_v39  ;;  %v1167_v0 = vpop.f32.mrb[13].mxu0  ;;  %v1298_v39 = vadd.f32 %v1297_v43, %v1296_v2  ;;  %v1397_v48 = vadd.f32 %v1396_v1, %v1395_v37 }
 0x199   : > { %v2016_v45 = vadd.f32 %v1167_v0, %v2465_v3  ;;  %v1984_v38 = vpop.f32.mrb[14].mxu0  ;;  %v1400_v3 = vsel %vm603_vm7, %v1358_v44, 0.0 }
 0x19a   : > { %v1170_v49 = vpop.f32.mrb[15].mxu0  ;;  %v1830_v50 = vpack.c.bf16 %v2015_v42, %v2015_v42  ;;  %v1399_v52 = vadd.f32 %v1398_v40, %v1397_v48  ;;  %v1300_v57 = vadd.f32 %v1299_v47, %v1298_v39  ;;  %v2017_v54 = vadd.f32 %v1984_v38, %v2467_v5 }
 0x19b   : > { %v1301_v29 = vsel %vm603_vm7, %v2016_v45, 0.0  ;;  %v1359_v33 = vmul.f32 %v2016_v45, %v2016_v45  ;;  %v1828_v51 = vpack.c.bf16 %v2016_v45, %v2016_v45  ;;  %v2018_v56 = vadd.f32 %v1170_v49, %v2469_v6 }
 0x19c   : > { %1595 = vst.msk [vmem:[%s2476_s28 + $0x38] sm:$0xf] %vm1580_vm10, %v1830_v50  ;;  %v1361_v59 = vmul.f32 %v2015_v42, %v2015_v42  ;;  %v1302_v58 = vadd.f32 %v1301_v29, %v1300_v57  ;;  %v1401_v60 = vadd.f32 %v1400_v3, %v1399_v52  ;;  %v1831_v9 = vpack.c.bf16 %v2017_v54, %v2017_v54 }
 0x19d   : > { %v1402_v55 = vsel %vm603_vm7, %v1359_v33, 0.0  ;;  %1593 = vst.msk [vmem:[%s2476_s28 + $0x30] sm:$0xf] %vm1580_vm10, %v1828_v51  ;;  %v1303_v7 = vsel %vm603_vm7, %v2018_v56, 0.0  ;;  %v1360_v13 = vmul.f32 %v2018_v56, %v2018_v56  ;;  %v1829_v5 = vpack.c.bf16 %v2018_v56, %v2018_v56 }
 0x19e   : > { %v1403_v16 = vadd.f32 %v1402_v55, %v1401_v60  ;;  %v1304_v18 = vadd.f32 %v1303_v7, %v1302_v58  ;;  %v1305_v46 = vsel %vm603_vm7, %v2015_v42, 0.0  ;;  %v1362_v53 = vmul.f32 %v2017_v54, %v2017_v54  ;;  %1596 = vst.msk [vmem:[%s2476_s28 + $0x3c] sm:$0xf] %vm1580_vm10, %v1831_v9 }
 0x19f   : > { %v1987_v4 = vpop.f32.mrb[16].mxu0  ;;  %v1404_v6 = vsel %vm603_vm7, %v1360_v13, 0.0  ;;  %1594 = vst.msk [vmem:[%s2476_s28 + $0x34] sm:$0xf] %vm1580_vm10, %v1829_v5  ;;  %v1406_v19 = vsel %vm603_vm7, %v1361_v59, 0.0  ;;  %v1307_v20 = vsel %vm603_vm7, %v2017_v54, 0.0 }
 0x1a0   : > { %v1953_v11 = vpop.f32.mrb[16].mxu1  ;;  %v1183_v41 = vpop.f32.mrb[17].mxu0  ;;  %v1306_v14 = vadd.f32 %v1305_v46, %v1304_v18  ;;  %v1405_v8 = vadd.f32 %v1404_v6, %v1403_v16  ;;  %v1408_v25 = vsel %vm603_vm7, %v1362_v53, 0.0 }
 0x1a1   : > { %v2019_v26 = vadd.f32 %v1987_v4, %v1953_v11  ;;  %v1011_v10 = vpop.f32.mrb[17].mxu1  ;;  %v1988_v12 = vpop.f32.mrb[18].mxu0 }
 0x1a2   : > { %v2020_v15 = vadd.f32 %v1183_v41, %v1011_v10  ;;  %v1954_v61 = vpop.f32.mrb[18].mxu1  ;;  %v1186_v17 = vpop.f32.mrb[19].mxu0  ;;  %v1407_v22 = vadd.f32 %v1406_v19, %v1405_v8  ;;  %v1308_v62 = vadd.f32 %v1307_v20, %v1306_v14 }
 0x1a3   : > { %v1834_v27 = vpack.c.bf16 %v2019_v26, %v2019_v26  ;;  %v2021_v31 = vadd.f32 %v1988_v12, %v1954_v61  ;;  %v1014_v21 = vpop.f32.mrb[19].mxu1  ;;  %v1365_v63 = vmul.f32 %v2019_v26, %v2019_v26  ;;  %v1313_v47 = vsel %vm603_vm7, %v2019_v26, 0.0 }
 0x1a4   : > { %v1309_v23 = vsel %vm603_vm7, %v2020_v15, 0.0  ;;  %v1363_v24 = vmul.f32 %v2020_v15, %v2020_v15  ;;  %v1832_v28 = vpack.c.bf16 %v2020_v15, %v2020_v15  ;;  %v1409_v35 = vadd.f32 %v1408_v25, %v1407_v22 }
 0x1a5   : > { %1599 = vst.msk [vmem:[%s2476_s28 + $0x48] sm:$0xf] %vm1580_vm10, %v1834_v27  ;;  %v1310_v30 = vadd.f32 %v1309_v23, %v1308_v62  ;;  %v1835_v34 = vpack.c.bf16 %v2021_v31, %v2021_v31  ;;  %v2022_v36 = vadd.f32 %v1186_v17, %v1014_v21  ;;  %v1414_v29 = vsel %vm603_vm7, %v1365_v63, 0.0 }
 0x1a6   : > { %v1410_v32 = vsel %vm603_vm7, %v1363_v24, 0.0  ;;  %1597 = vst.msk [vmem:[%s2476_s28 + $0x40] sm:$0xf] %vm1580_vm10, %v1832_v28  ;;  %v1366_v33 = vmul.f32 %v2021_v31, %v2021_v31  ;;  %v1315_v54 = vsel %vm603_vm7, %v2021_v31, 0.0 }
 0x1a7   : > { %v1991_v37 = vpop.f32.mrb[20].mxu0  ;;  %v1411_v2 = vadd.f32 %v1410_v32, %v1409_v35  ;;  %1600 = vst.msk [vmem:[%s2476_s28 + $0x4c] sm:$0xf] %vm1580_vm10, %v1835_v34  ;;  %v1311_v43 = vsel %vm603_vm7, %v2022_v36, 0.0  ;;  %v1364_v44 = vmul.f32 %v2022_v36, %v2022_v36  ;;  %v1833_v1 = vpack.c.bf16 %v2022_v36, %v2022_v36 }
 0x1a8   : > { %v1957_v42 = vpop.f32.mrb[20].mxu1  ;;  %v1199_v0 = vpop.f32.mrb[21].mxu0  ;;  %v1312_v39 = vadd.f32 %v1311_v43, %v1310_v30  ;;  %v1416_v5 = vsel %vm603_vm7, %v1366_v33, 0.0 }
 0x1a9   : > { %v2023_v45 = vadd.f32 %v1991_v37, %v1957_v42  ;;  %v1027_v38 = vpop.f32.mrb[21].mxu1  ;;  %v1992_v40 = vpop.f32.mrb[22].mxu0  ;;  %v1412_v51 = vsel %vm603_vm7, %v1364_v44, 0.0  ;;  %1598 = vst.msk [vmem:[%s2476_s28 + $0x44] sm:$0xf] %vm1580_vm10, %v1833_v1 }
 0x1aa   : > { %v2024_v48 = vadd.f32 %v1199_v0, %v1027_v38  ;;  %v1958_v49 = vpop.f32.mrb[22].mxu1  ;;  %v1202_v50 = vpop.f32.mrb[23].mxu0  ;;  %v1314_v3 = vadd.f32 %v1313_v47, %v1312_v39  ;;  %v1413_v55 = vadd.f32 %v1412_v51, %v1411_v2 }
 0x1ab   : > { %v1838_v52 = vpack.c.bf16 %v2023_v45, %v2023_v45  ;;  %v1030_v57 = vpop.f32.mrb[23].mxu1  ;;  %v2025_v60 = vadd.f32 %v1992_v40, %v1958_v49  ;;  %v1369_v12 = vmul.f32 %v2023_v45, %v2023_v45  ;;  %v1321_v21 = vsel %vm603_vm7, %v2023_v45, 0.0 }
 0x1ac   : > { %v1367_v56 = vmul.f32 %v2024_v48, %v2024_v48  ;;  %v1317_v59 = vsel %vm603_vm7, %v2024_v48, 0.0  ;;  %v1836_v58 = vpack.c.bf16 %v2024_v48, %v2024_v48  ;;  %v2026_v9 = vadd.f32 %v1202_v50, %v1030_v57 }
 0x1ad   : > { %1603 = vst.msk [vmem:[%s2476_s28 + $0x58] sm:$0xf] %vm1580_vm10, %v1838_v52  ;;  %v1415_v7 = vadd.f32 %v1414_v29, %v1413_v55  ;;  %v1316_v13 = vadd.f32 %v1315_v54, %v1314_v3  ;;  %v1839_v16 = vpack.c.bf16 %v2025_v60, %v2025_v60  ;;  %v1370_v22 = vmul.f32 %v2025_v60, %v2025_v60 }
 0x1ae   : > { %v1418_v4 = vsel %vm603_vm7, %v1367_v56, 0.0  ;;  %1601 = vst.msk [vmem:[%s2476_s28 + $0x50] sm:$0xf] %vm1580_vm10, %v1836_v58  ;;  %v1319_v18 = vsel %vm603_vm7, %v2026_v9, 0.0  ;;  %v1368_v53 = vmul.f32 %v2026_v9, %v2026_v9  ;;  %v1837_v6 = vpack.c.bf16 %v2026_v9, %v2026_v9 }
 0x1af   : > { %v1995_v11 = vpop.f32.mrb[24].mxu0  ;;  %v1318_v41 = vadd.f32 %v1317_v59, %v1316_v13  ;;  %v1417_v46 = vadd.f32 %v1416_v5, %v1415_v7  ;;  %1604 = vst.msk [vmem:[%s2476_s28 + $0x5c] sm:$0xf] %vm1580_vm10, %v1839_v16  ;;  %v1422_v35 = vsel %vm603_vm7, %v1369_v12, 0.0  ;;  %v1323_v32 = vsel %vm603_vm7, %v2025_v60, 0.0 }
 0x1b0   : > { %v1961_v26 = vpop.f32.mrb[24].mxu1  ;;  %v1215_v10 = vpop.f32.mrb[25].mxu0  ;;  %v1420_v19 = vsel %vm603_vm7, %v1368_v53, 0.0  ;;  %1602 = vst.msk [vmem:[%s2476_s28 + $0x54] sm:$0xf] %vm1580_vm10, %v1837_v6  ;;  %v1424_v42 = vsel %vm603_vm7, %v1370_v22, 0.0 }
 0x1b1   : > { %v2027_v14 = vadd.f32 %v1995_v11, %v1961_v26  ;;  %v1043_v8 = vpop.f32.mrb[25].mxu1  ;;  %v1996_v15 = vpop.f32.mrb[26].mxu0  ;;  %v1419_v61 = vadd.f32 %v1418_v4, %v1417_v46  ;;  %v1320_v17 = vadd.f32 %v1319_v18, %v1318_v41 }
 0x1b2   : > { %v2028_v20 = vadd.f32 %v1215_v10, %v1043_v8  ;;  %v1962_v27 = vpop.f32.mrb[26].mxu1  ;;  %v1218_v31 = vpop.f32.mrb[27].mxu0 }
 0x1b3   : > { %v1842_v62 = vpack.c.bf16 %v2027_v14, %v2027_v14  ;;  %v2029_v23 = vadd.f32 %v1996_v15, %v1962_v27  ;;  %v1046_v24 = vpop.f32.mrb[27].mxu1  ;;  %v1322_v25 = vadd.f32 %v1321_v21, %v1320_v17  ;;  %v1421_v28 = vadd.f32 %v1420_v19, %v1419_v61 }
 0x1b4   : > { %v1371_v30 = vmul.f32 %v2028_v20, %v2028_v20  ;;  %v1325_v34 = vsel %vm603_vm7, %v2028_v20, 0.0  ;;  %v1840_v63 = vpack.c.bf16 %v2028_v20, %v2028_v20  ;;  %v1373_v0 = vmul.f32 %v2027_v14, %v2027_v14 }
 0x1b5   : > { %1607 = vst.msk [vmem:[%s2476_s28 + $0x68] sm:$0xf] %vm1580_vm10, %v1842_v62  ;;  %v1423_v36 = vadd.f32 %v1422_v35, %v1421_v28  ;;  %v1324_v37 = vadd.f32 %v1323_v32, %v1322_v25  ;;  %v1843_v2 = vpack.c.bf16 %v2029_v23, %v2029_v23  ;;  %v2030_v44 = vadd.f32 %v1218_v31, %v1046_v24 }
 0x1b6   : > { %v1426_v43 = vsel %vm603_vm7, %v1371_v30, 0.0  ;;  %1605 = vst.msk [vmem:[%s2476_s28 + $0x60] sm:$0xf] %vm1580_vm10, %v1840_v63  ;;  %v1329_v51 = vsel %vm603_vm7, %v2027_v14, 0.0  ;;  %v1430_v56 = vsel %vm603_vm7, %v1373_v0, 0.0  ;;  %v1374_v59 = vmul.f32 %v2029_v23, %v2029_v23 }
 0x1b7   : > { %v1999_v1 = vpop.f32.mrb[28].mxu0  ;;  %v1326_v45 = vadd.f32 %v1325_v34, %v1324_v37  ;;  %v1425_v38 = vadd.f32 %v1424_v42, %v1423_v36  ;;  %1608 = vst.msk [vmem:[%s2476_s28 + $0x6c] sm:$0xf] %vm1580_vm10, %v1843_v2  ;;  %v1327_v39 = vsel %vm603_vm7, %v2030_v44, 0.0  ;;  %v1372_v48 = vmul.f32 %v2030_v44, %v2030_v44 }
 0x1b8   : > { %v1965_v40 = vpop.f32.mrb[28].mxu1  ;;  %v1231_v47 = vpop.f32.mrb[29].mxu0  ;;  %v1841_v49 = vpack.c.bf16 %v2030_v44, %v2030_v44  ;;  %v1331_v7 = vsel %vm603_vm7, %v2029_v23, 0.0  ;;  %v1432_v6 = vsel %vm603_vm7, %v1374_v59, 0.0 }
 0x1b9   : > { %v2031_v50 = vadd.f32 %v1999_v1, %v1965_v40  ;;  %v1059_v29 = vpop.f32.mrb[29].mxu1  ;;  %v2000_v33 = vpop.f32.mrb[30].mxu0  ;;  %v1427_v52 = vadd.f32 %v1426_v43, %v1425_v38  ;;  %v1328_v57 = vadd.f32 %v1327_v39, %v1326_v45  ;;  %v1428_v58 = vsel %vm603_vm7, %v1372_v48, 0.0 }
 0x1ba   : > { %v2032_v54 = vadd.f32 %v1231_v47, %v1059_v29  ;;  %v1966_v3 = vpop.f32.mrb[30].mxu1  ;;  %v1234_v55 = vpop.f32.mrb[31].mxu0  ;;  %1606 = vst.msk [vmem:[%s2476_s28 + $0x64] sm:$0xf] %vm1580_vm10, %v1841_v49 }
 0x1bb   : > { %v1846_v60 = vpack.c.bf16 %v2031_v50, %v2031_v50  ;;  %v1062_v9 = vpop.f32.mrb[31].mxu1  ;;  %v1330_v13 = vadd.f32 %v1329_v51, %v1328_v57  ;;  %v1429_v5 = vadd.f32 %v1428_v58, %v1427_v52  ;;  %v2033_v11 = vadd.f32 %v2000_v33, %v1966_v3 }
 0x1bc   : > { %v1375_v4 = vmul.f32 %v2032_v54, %v2032_v54  ;;  %v1333_v16 = vsel %vm603_vm7, %v2032_v54, 0.0  ;;  %v1844_v18 = vpack.c.bf16 %v2032_v54, %v2032_v54  ;;  %v2034_v41 = vadd.f32 %v1234_v55, %v1062_v9 }
 0x1bd   : > { %1611 = vst.msk [vmem:[%s2476_s28 + $0x78] sm:$0xf] %vm1580_vm10, %v1846_v60  ;;  %v1431_v46 = vadd.f32 %v1430_v56, %v1429_v5  ;;  %v1332_v53 = vadd.f32 %v1331_v7, %v1330_v13  ;;  %v1847_v10 = vpack.c.bf16 %v2033_v11, %v2033_v11  ;;  %v1377_v17 = vmul.f32 %v2031_v50, %v2031_v50 }
 0x1be   : > { %v1434_v26 = vsel %vm603_vm7, %v1375_v4, 0.0  ;;  %1609 = vst.msk [vmem:[%s2476_s28 + $0x70] sm:$0xf] %vm1580_vm10, %v1844_v18  ;;  %v1335_v12 = vsel %vm603_vm7, %v2034_v41, 0.0  ;;  %v1376_v15 = vmul.f32 %v2034_v41, %v2034_v41  ;;  %v1845_v61 = vpack.c.bf16 %v2034_v41, %v2034_v41 }
 0x1bf   : > { %v1334_v14 = vadd.f32 %v1333_v16, %v1332_v53  ;;  %v1433_v8 = vadd.f32 %v1432_v6, %v1431_v46  ;;  %1612 = vst.msk [vmem:[%s2476_s28 + $0x7c] sm:$0xf] %vm1580_vm10, %v1847_v10  ;;  %v1337_v31 = vsel %vm603_vm7, %v2031_v50, 0.0  ;;  %v1378_v21 = vmul.f32 %v2033_v11, %v2033_v11 }
 0x1c0   : > { %v1436_v27 = vsel %vm603_vm7, %v1376_v15, 0.0  ;;  %1610 = vst.msk [vmem:[%s2476_s28 + $0x74] sm:$0xf] %vm1580_vm10, %v1845_v61  ;;  %v1438_v23 = vsel %vm603_vm7, %v1377_v17, 0.0  ;;  %v1339_v24 = vsel %vm603_vm7, %v2033_v11, 0.0 }
 0x1c1   : > { %v1435_v19 = vadd.f32 %v1434_v26, %v1433_v8  ;;  %v1336_v20 = vadd.f32 %v1335_v12, %v1334_v14  ;;  %v1440_v30 = vsel %vm603_vm7, %v1378_v21, 0.0 }
 0x1c3   : > { %v1338_v22 = vadd.f32 %v1337_v31, %v1336_v20  ;;  %v1437_v62 = vadd.f32 %v1436_v27, %v1435_v19 }
 0x1c5   : > { %v1340_v25 = vadd.f32 %v1339_v24, %v1338_v22  ;;  %v1439_v28 = vadd.f32 %v1438_v23, %v1437_v62 }
 0x1c7   : > { %v1341_v35 = vrot.slane %v1340_v25, 4  ;;  %v1441_v32 = vadd.f32 %v1440_v30, %v1439_v28 }
 0x1c9   : > { %v1342_v34 = vadd.f32 %v1341_v35, %v1340_v25  ;;  %v1442_v63 = vrot.slane %v1441_v32, 4 }
 0x1cb   : > { %v1343_v36 = vrot.slane %v1342_v34, 2  ;;  %v1443_v37 = vadd.f32 %v1442_v63, %v1441_v32 }
 0x1cd   : > { %v1344_v2 = vadd.f32 %v1343_v36, %v1342_v34  ;;  %v1444_v42 = vrot.slane %v1443_v37, 2 }
 0x1cf   : > { %v1345_v0 = vrot.slane %v1344_v2, 1  ;;  %v1445_v43 = vadd.f32 %v1444_v42, %v1443_v37 }
 0x1d1   : > { %v1446_v44 = vrot.slane %v1445_v43, 1  ;;  %v1346_v1 = vadd.f32 %v1345_v0, %v1344_v2 }
 0x1d3   : > { %v1447_v45 = vadd.f32 %v1446_v44, %v1445_v43 }
 0x1d5   : > { %v1449_v38 = vsel %vm431_vm4, %v1346_v1, %v1447_v45 }
 0x1d6   : > { %1451 = vst.msk [vmem:[%s181_s5] sm:$0x3] %vm1450_vm11, %v1449_v38 }
 0x1d7 PF: > { %s14_s12 = sadd.s32 1, %s2107_s12  }
 0x1d8   : > { %p11_p4 = scmp.ge.s32.totalorder %s14_s12, 4  }
 0x1da   :  { %13 = sbr.rel (!%p11_p4) target bundleno = 1 (0x1), region = 72 }

// kernel: basic_block.4
= control target key start
LH: loop header
LB: loop body
LE: loop exit
PB: predicated region body
PF: predicated region fallthrough
CT: control target
= control target key end

     0   :  { %s2339_s18 = smov 0   ;;  %s3077_s0 = inlined_call_operand.vmem [shape: bf16[2,16,16,4], index: 0, kind: input, shape index: {}]   ;;  %s3078_s1 = inlined_call_operand.vmem [shape: f32[1,4], index: 1, kind: input, shape index: {}]   ;;  %s3079_s2 = inlined_call_operand.vmem [shape: f32[1,4], index: 2, kind: input, shape index: {}]   ;;  %s3080_s3 = inlined_call_operand.vmem [shape: bf16[3,12,4], index: 3, kind: input, shape index: {}]   ;;  %s3081_s4 = inlined_call_operand.vmem [shape: bf16[2,16,16,4], index: 4, kind: output, shape index: {0}]   ;;  %s3082_s5 = inlined_call_operand.vmem [shape: f32[2,2,4], index: 5, kind: output, shape index: {1}]  }
   0x1 LB: > { %s1847_s19 = sadd.s32 4294967295, %s2304_s18   ;;  %p1851_p0 = scmp.ge.s32.totalorder %s2304_s18, 1  ;;  %s2304_s18 = sphi %s2339_s18, %s16_s18  }
   0x2   : > { %p190_p1 = scmp.lt.s32.totalorder %s2304_s18, 3 }
   0x4   : > { %p191_p2 = pnand %p1851_p0, %p190_p1 }
   0x5   : > { %vm634_vm0 = vcmask (!%p191_p2), 1047552   ;;  %vm635_vm1 = vsmask.f32 (!%p191_p2), 7424  ;;  %v2306_v0 = vmov (!%p191_p2), 0   ;;  %s2307_s20 = smov (!%p191_p2), 4   ;;  %p222_p3 = scmp.lt.s32.totalorder (!%p191_p2), %s1847_s19, 1 }
   0x6   : > { %194 = sbr.rel (%p191_p2) target bundleno = 481 (0x1e1), region = 36  ;;  %670 = vrot.lane.b32.xlu0 (!%p191_p2), %v2306_v0, %s2307_s20  ;;  %v583_v1 = vrot.slane (!%p191_p2), %v2306_v0, 1  ;;  %vm2350_vm2 = vmand (!%p191_p2), %vm634_vm0, %vm635_vm1  ;;  %s2308_s21 = smov (!%p191_p2), 8   ;;  %v2363_v4 = vld [vmem:[%s3078_s1] ss:$0 sm:$0xff] (!%p191_p2)  ;;  %vm886_vm3 = vcmask (!%p191_p2), 1045504  }
   0x7   : > { %v2295_v5 = vld [vmem:[%s3080_s3 + $0x8] sm:$0x3f] (!%p191_p2)   ;;  %v2378_v6 = vld [vmem:[%s3080_s3] sm:$0x3f] (!%p191_p2)   ;;  %vm563_vm4 = vcmask (!%p191_p2), 1040384   ;;  %vm750_vm7 = vcmask (!%p191_p2), 31744  }
   0x8   : > { %v637_v3 = vsel (!%p191_p2), %vm2350_vm2, %v583_v1, 0  ;;  %2280 = vmatprep.subr.msk.bf16.mxu1 (!%p191_p2), %vm886_vm3, %v2295_v5  ;;  %v888_v10 = vsel (!%p191_p2), %vm886_vm3, %v2295_v5, 0  ;;  %2281 = vmatprep.subr.msk.bf16.mxu0 (!%p191_p2), %vm886_vm3, %v2378_v6  ;;  %v2391_v16 = vld [vmem:[%s3079_s2] ss:$0 sm:$0xff] (!%p191_p2)  ;;  %vm564_vm5 = vsmask.f32 (!%p191_p2), 256 }
   0x9   : > { %718 = vrot.lane.b32.xlu1 (!%p191_p2), %v637_v3, %s2308_s21  ;;  %2113 = vmatpush3.bf16.msra.mxu1 (!%p191_p2), %v888_v10  ;;  %vm2768_vm6 = vmand (!%p191_p2), %vm563_vm4, %vm564_vm5  ;;  %vm799_vm8 = vcmask (!%p191_p2), 64512   ;;  %vm853_vm9 = vcmask (!%p191_p2), 97280   ;;  %vm1728_vm10 = vcmask (!%p191_p2), 27648   ;;  %vm1598_vm11 = vcmask (!%p191_p2), 25600  }
   0xa   : > { %2282 = vmatprep.subr.msk.bf16.mxu1 (!%p191_p2), %vm886_vm3, %v2378_v6 }
   0xd   : > { %s3088_s19 = smov (!%p222_p3, %s1847_s19), 1 }
   0xe   : > { %s1948_s22 = sshll.u32 %s3088_s19, 7  ;;  %s1856_s14 = sshll.u32 %s3088_s19, 1 }
   0xf   : > { %s2373_s29 = scalar_lea.vmem %s3077_s0, %s1948_s22  ;;  %s2931_s13 = scalar_lea.vmem %s3081_s4, %s1948_s22 }
  0x10   : > { %v2046_v7 = vld [vmem:[%s2373_s29 + $0x8] sm:$0xff]   ;;  %v1983_v8 = vld [vmem:[%s2373_s29] sm:$0xff]   ;;  %v2048_v9 = vld [vmem:[%s2373_s29 + $0x18] sm:$0xff]   ;;  %s235_s17 = scalar_lea.vmem %s3082_s5, %s1856_s14 }
  0x11   : > { %v1988_v11 = vunpack.c.l.bf16 %v2046_v7  ;;  %v1989_v12 = vunpack.c.h.bf16 %v2046_v7  ;;  %v1984_v13 = vunpack.c.l.bf16 %v1983_v8  ;;  %v1985_v14 = vunpack.c.h.bf16 %v1983_v8  ;;  %v2047_v15 = vld [vmem:[%s2373_s29 + $0x10] sm:$0xff]   ;;  %v2050_v37 = vld [vmem:[%s2373_s29 + $0x28] sm:$0xff]   ;;  %v2049_v42 = vld [vmem:[%s2373_s29 + $0x20] sm:$0xff]  }
  0x12   : > { %v1996_v17 = vunpack.c.l.bf16 %v2048_v9  ;;  %v1997_v18 = vunpack.c.h.bf16 %v2048_v9  ;;  %v1992_v19 = vunpack.c.l.bf16 %v2047_v15  ;;  %v1993_v20 = vunpack.c.h.bf16 %v2047_v15  ;;  %v2052_v15 = vld [vmem:[%s2373_s29 + $0x38] sm:$0xff]  }
  0x13   : > { %v310_v21 = vmul.f32 %v1988_v11, %v2363_v4  ;;  %v311_v22 = vmul.f32 %v1989_v12, %v2363_v4  ;;  %v308_v23 = vmul.f32 %v1984_v13, %v2363_v4  ;;  %v309_v24 = vmul.f32 %v1985_v14, %v2363_v4 }
  0x14   : > { %v314_v25 = vmul.f32 %v1996_v17, %v2363_v4  ;;  %v315_v26 = vmul.f32 %v1997_v18, %v2363_v4  ;;  %v312_v27 = vmul.f32 %v1992_v19, %v2363_v4  ;;  %v313_v28 = vmul.f32 %v1993_v20, %v2363_v4 }
  0x15   : > { %v349_v29 = vadd.f32 %v2391_v16, %v310_v21  ;;  %v350_v30 = vadd.f32 %v2391_v16, %v311_v22  ;;  %v347_v31 = vadd.f32 %v2391_v16, %v308_v23  ;;  %v348_v32 = vadd.f32 %v2391_v16, %v309_v24  ;;  %v2051_v21 = vld [vmem:[%s2373_s29 + $0x30] sm:$0xff]  }
  0x16   : > { %v353_v33 = vadd.f32 %v2391_v16, %v314_v25  ;;  %v354_v34 = vadd.f32 %v2391_v16, %v315_v26  ;;  %v351_v35 = vadd.f32 %v2391_v16, %v312_v27  ;;  %v352_v36 = vadd.f32 %v2391_v16, %v313_v28  ;;  %v2054_v26 = vld [vmem:[%s2373_s29 + $0x48] sm:$0xff]  }
  0x17   : > { %v381_v38 = vmax.f32 %v349_v29, 0.0  ;;  %v382_v39 = vmax.f32 %v350_v30, 0.0  ;;  %v379_v40 = vmax.f32 %v347_v31, 0.0  ;;  %v380_v41 = vmax.f32 %v348_v32, 0.0 }
  0x18   : > { %v385_v43 = vmax.f32 %v353_v33, 0.0  ;;  %v386_v44 = vmax.f32 %v354_v34, 0.0  ;;  %v383_v45 = vmax.f32 %v351_v35, 0.0  ;;  %v384_v46 = vmax.f32 %v352_v36, 0.0 }
  0x19   : > { %v2413_v47 = vpack.c.bf16 %v382_v39, %v381_v38  ;;  %v2415_v48 = vpack.c.bf16 %v380_v41, %v379_v40  ;;  %v2004_v49 = vunpack.c.l.bf16 %v2050_v37  ;;  %v2005_v50 = vunpack.c.h.bf16 %v2050_v37 }
  0x1a   : > { %v2417_v51 = vpack.c.bf16 %v386_v44, %v385_v43  ;;  %v2419_v52 = vpack.c.bf16 %v384_v46, %v383_v45  ;;  %v2000_v53 = vunpack.c.l.bf16 %v2049_v42  ;;  %v2001_v54 = vunpack.c.h.bf16 %v2049_v42 }
  0x1b   : > { %674 = vrot.lane.b32.xlu1 %v2413_v47, %s2307_s20  ;;  %672 = vrot.lane.b32.xlu0 %v2415_v48, %s2307_s20  ;;  %v442_v55 = vshrl.u32 %v2413_v47, 16  ;;  %v445_v56 = vshll.u32 %v2413_v47, 16  ;;  %v435_v57 = vshrl.u32 %v2415_v48, 16  ;;  %v438_v58 = vshll.u32 %v2415_v48, 16 }
  0x1c   : > { %v456_v59 = vshrl.u32 %v2417_v51, 16  ;;  %v459_v60 = vshll.u32 %v2417_v51, 16  ;;  %v449_v61 = vshrl.u32 %v2419_v52, 16  ;;  %v452_v62 = vshll.u32 %v2419_v52, 16 }
  0x1d   : > { %v587_v63 = vrot.slane %v445_v56, 1  ;;  %v585_v1 = vrot.slane %v438_v58, 1  ;;  %v318_v9 = vmul.f32 %v2004_v49, %v2363_v4  ;;  %v319_v10 = vmul.f32 %v2005_v50, %v2363_v4 }
  0x1e   : > { %v591_v3 = vrot.slane %v459_v60, 1  ;;  %v589_v5 = vrot.slane %v452_v62, 1  ;;  %v316_v13 = vmul.f32 %v2000_v53, %v2363_v4  ;;  %v317_v14 = vmul.f32 %v2001_v54, %v2363_v4 }
  0x1f   : > { %v588_v7 = vor.u32 %v587_v63, %v442_v55  ;;  %v586_v8 = vor.u32 %v585_v1, %v435_v57  ;;  %v357_v19 = vadd.f32 %v2391_v16, %v318_v9  ;;  %v358_v20 = vadd.f32 %v2391_v16, %v319_v10 }
  0x20   : > { %v592_v11 = vor.u32 %v591_v3, %v456_v59  ;;  %v590_v12 = vor.u32 %v589_v5, %v449_v61  ;;  %v355_v24 = vadd.f32 %v2391_v16, %v316_v13  ;;  %v356_v25 = vadd.f32 %v2391_v16, %v317_v14  ;;  %v2053_v5 = vld [vmem:[%s2373_s29 + $0x40] sm:$0xff]  }
  0x21   : > { %v639_v17 = vsel %vm2350_vm2, %v588_v7, 0  ;;  %v638_v18 = vsel %vm2350_vm2, %v586_v8, 0  ;;  %v389_v27 = vmax.f32 %v357_v19, 0.0  ;;  %v390_v28 = vmax.f32 %v358_v20, 0.0 }
  0x22   : > { %722 = vrot.lane.b32.xlu1 %v639_v17, %s2308_s21  ;;  %720 = vrot.lane.b32.xlu0 %v638_v18, %s2308_s21  ;;  %v641_v22 = vsel %vm2350_vm2, %v592_v11, 0  ;;  %v640_v23 = vsel %vm2350_vm2, %v590_v12, 0  ;;  %v2012_v29 = vunpack.c.l.bf16 %v2052_v15  ;;  %v2013_v30 = vunpack.c.h.bf16 %v2052_v15 }
  0x23   : > { %v387_v31 = vmax.f32 %v355_v24, 0.0  ;;  %v388_v32 = vmax.f32 %v356_v25, 0.0  ;;  %v2008_v33 = vunpack.c.l.bf16 %v2051_v21  ;;  %v2009_v34 = vunpack.c.h.bf16 %v2051_v21 }
  0x24   : > { %v2470_v35 = vpack.c.bf16 %v390_v28, %v389_v27  ;;  %v322_v36 = vmul.f32 %v2012_v29, %v2363_v4  ;;  %v323_v37 = vmul.f32 %v2013_v30, %v2363_v4  ;;  %v2020_v38 = vunpack.c.l.bf16 %v2054_v26 }
  0x25   : > { %v2478_v39 = vpack.c.bf16 %v388_v32, %v387_v31  ;;  %v320_v40 = vmul.f32 %v2008_v33, %v2363_v4  ;;  %v321_v41 = vmul.f32 %v2009_v34, %v2363_v4  ;;  %v2021_v42 = vunpack.c.h.bf16 %v2054_v26  ;;  %v2056_v26 = vld [vmem:[%s2373_s29 + $0x58] sm:$0xff]   ;;  %v2055_v31 = vld [vmem:[%s2373_s29 + $0x50] sm:$0xff]  }
  0x26   : > { %678 = vrot.lane.b32.xlu1 %v2417_v51, %s2307_s20  ;;  %676 = vrot.lane.b32.xlu0 %v2419_v52, %s2307_s20  ;;  %v470_v43 = vshrl.u32 %v2470_v35, 16  ;;  %v473_v44 = vshll.u32 %v2470_v35, 16  ;;  %v361_v45 = vadd.f32 %v2391_v16, %v322_v36  ;;  %v362_v46 = vadd.f32 %v2391_v16, %v323_v37 }
  0x27   : > { %v463_v49 = vshrl.u32 %v2478_v39, 16  ;;  %v466_v50 = vshll.u32 %v2478_v39, 16  ;;  %v359_v53 = vadd.f32 %v2391_v16, %v320_v40  ;;  %v360_v54 = vadd.f32 %v2391_v16, %v321_v41 }
  0x28   : > { %v595_v63 = vrot.slane %v473_v44, 1  ;;  %v393_v1 = vmax.f32 %v361_v45, 0.0  ;;  %v394_v3 = vmax.f32 %v362_v46, 0.0  ;;  %v326_v12 = vmul.f32 %v2020_v38, %v2363_v4 }
  0x29   : > { %v593_v7 = vrot.slane %v466_v50, 1  ;;  %v391_v8 = vmax.f32 %v359_v53, 0.0  ;;  %v392_v9 = vmax.f32 %v360_v54, 0.0  ;;  %v327_v13 = vmul.f32 %v2021_v42, %v2363_v4 }
  0x2a   : > { %726 = vrot.lane.b32.xlu1 %v641_v22, %s2308_s21  ;;  %724 = vrot.lane.b32.xlu0 %v640_v23, %s2308_s21  ;;  %v596_v10 = vor.u32 %v595_v63, %v470_v43  ;;  %v2499_v11 = vpack.c.bf16 %v394_v3, %v393_v1  ;;  %v2016_v17 = vunpack.c.l.bf16 %v2053_v5  ;;  %v2017_v18 = vunpack.c.h.bf16 %v2053_v5  ;;  %v2058_v3 = vld [vmem:[%s2373_s29 + $0x68] sm:$0xff]  }
  0x2b   : > { %v594_v14 = vor.u32 %v593_v7, %v463_v49  ;;  %v2505_v15 = vpack.c.bf16 %v392_v9, %v391_v8  ;;  %v2509_v19 = vrot.slane %v442_v55, 7  ;;  %v365_v22 = vadd.f32 %v2391_v16, %v326_v12 }
  0x2c   : > { %v484_v20 = vshrl.u32 %v2499_v11, 16  ;;  %v487_v21 = vshll.u32 %v2499_v11, 16  ;;  %v643_v23 = vsel %vm2350_vm2, %v596_v10, 0  ;;  %v366_v25 = vadd.f32 %v2391_v16, %v327_v13 }
  0x2d   : > { %v477_v24 = vshrl.u32 %v2505_v15, 16  ;;  %v480_v55 = vshll.u32 %v2505_v15, 16  ;;  %v642_v27 = vsel %vm2350_vm2, %v594_v14, 0  ;;  %v397_v29 = vmax.f32 %v365_v22, 0.0 }
  0x2e   : > { %682 = vrot.lane.b32.xlu1 %v2470_v35, %s2307_s20  ;;  %680 = vrot.lane.b32.xlu0 %v2478_v39, %s2307_s20  ;;  %v599_v28 = vrot.slane %v487_v21, 1  ;;  %v324_v30 = vmul.f32 %v2016_v17, %v2363_v4  ;;  %v2532_v32 = vrot.slane %v435_v57, 7  ;;  %v398_v34 = vmax.f32 %v366_v25, 0.0 }
  0x2f   : > { %v597_v33 = vrot.slane %v480_v55, 1  ;;  %v325_v36 = vmul.f32 %v2017_v18, %v2363_v4  ;;  %v2028_v40 = vunpack.c.l.bf16 %v2056_v26  ;;  %v2029_v41 = vunpack.c.h.bf16 %v2056_v26 }
  0x30   : > { %v600_v37 = vor.u32 %v599_v28, %v484_v20  ;;  %v363_v38 = vadd.f32 %v2391_v16, %v324_v30  ;;  %v2544_v42 = vpack.c.bf16 %v398_v34, %v397_v29  ;;  %v2024_v46 = vunpack.c.l.bf16 %v2055_v31 }
  0x31   : > { %v598_v57 = vor.u32 %v597_v33, %v477_v24  ;;  %v364_v45 = vadd.f32 %v2391_v16, %v325_v36  ;;  %v2549_v53 = vrot.slane %v456_v59, 7  ;;  %v330_v63 = vmul.f32 %v2028_v40, %v2363_v4 }
  0x32   : > { %730 = vrot.lane.b32.xlu1 %v643_v23, %s2308_s21  ;;  %728 = vrot.lane.b32.xlu0 %v642_v27, %s2308_s21  ;;  %v395_v54 = vmax.f32 %v363_v38, 0.0  ;;  %v331_v1 = vmul.f32 %v2029_v41, %v2363_v4  ;;  %v645_v5 = vsel %vm2350_vm2, %v600_v37, 0  ;;  %v498_v8 = vshrl.u32 %v2544_v42, 16  ;;  %v2057_v38 = vld [vmem:[%s2373_s29 + $0x60] sm:$0xff]  }
  0x33   : > { %v396_v7 = vmax.f32 %v364_v45, 0.0  ;;  %v501_v9 = vshll.u32 %v2544_v42, 16  ;;  %v369_v10 = vadd.f32 %v2391_v16, %v330_v63  ;;  %v2025_v59 = vunpack.c.h.bf16 %v2055_v31 }
  0x34   : > { %v370_v12 = vadd.f32 %v2391_v16, %v331_v1  ;;  %v328_v13 = vmul.f32 %v2024_v46, %v2363_v4  ;;  %v644_v14 = vsel %vm2350_vm2, %v598_v57, 0  ;;  %v2036_v22 = vunpack.c.l.bf16 %v2058_v3 }
  0x35   : > { %v2567_v17 = vpack.c.bf16 %v396_v7, %v395_v54  ;;  %v603_v18 = vrot.slane %v501_v9, 1  ;;  %v401_v23 = vmax.f32 %v369_v10, 0.0  ;;  %v329_v26 = vmul.f32 %v2025_v59, %v2363_v4  ;;  %v2059_v7 = vld [vmem:[%s2373_s29 + $0x70] sm:$0xff]  }
  0x36   : > { %686 = vrot.lane.b32.xlu1 %v2499_v11, %s2307_s20  ;;  %684 = vrot.lane.b32.xlu0 %v2505_v15, %s2307_s20  ;;  %v402_v25 = vmax.f32 %v370_v12, 0.0  ;;  %v367_v27 = vadd.f32 %v2391_v16, %v328_v13  ;;  %v2037_v31 = vunpack.c.h.bf16 %v2058_v3  ;;  %v334_v37 = vmul.f32 %v2036_v22, %v2363_v4 }
  0x37   : > { %v604_v28 = vor.u32 %v603_v18, %v498_v8  ;;  %v491_v29 = vshrl.u32 %v2567_v17, 16  ;;  %v494_v30 = vshll.u32 %v2567_v17, 16  ;;  %v368_v34 = vadd.f32 %v2391_v16, %v329_v26 }
  0x38   : > { %v2577_v33 = vpack.c.bf16 %v402_v25, %v401_v23  ;;  %v399_v36 = vmax.f32 %v367_v27, 0.0  ;;  %v2584_v40 = vrot.slane %v449_v61, 7  ;;  %v2588_v41 = vrot.slane %v470_v43, 7 }
  0x39   : > { %v601_v57 = vrot.slane %v494_v30, 1  ;;  %v335_v45 = vmul.f32 %v2037_v31, %v2363_v4  ;;  %v400_v46 = vmax.f32 %v368_v34, 0.0  ;;  %v373_v61 = vadd.f32 %v2391_v16, %v334_v37 }
  0x3a   : > { %734 = vrot.lane.b32.xlu1 %v645_v5, %s2308_s21  ;;  %732 = vrot.lane.b32.xlu0 %v644_v14, %s2308_s21  ;;  %v512_v54 = vshrl.u32 %v2577_v33, 16  ;;  %v515_v63 = vshll.u32 %v2577_v33, 16  ;;  %v2032_v3 = vunpack.c.l.bf16 %v2057_v38  ;;  %v2033_v5 = vunpack.c.h.bf16 %v2057_v38  ;;  %v2060_v38 = vld [vmem:[%s2373_s29 + $0x78] sm:$0xff]  }
  0x3b   : > { %v602_v43 = vor.u32 %v601_v57, %v491_v29  ;;  %v374_v1 = vadd.f32 %v2391_v16, %v335_v45  ;;  %v647_v10 = vsel %vm2350_vm2, %v604_v28, 0  ;;  %v2604_v12 = vpack.c.bf16 %v400_v46, %v399_v36 }
  0x3c   : > { %v607_v59 = vrot.slane %v515_v63, 1  ;;  %v405_v13 = vmax.f32 %v373_v61, 0.0  ;;  %v332_v22 = vmul.f32 %v2032_v3, %v2363_v4  ;;  %v333_v23 = vmul.f32 %v2033_v5, %v2363_v4 }
  0x3d   : > { %v646_v14 = vsel %vm2350_vm2, %v602_v43, 0  ;;  %v406_v18 = vmax.f32 %v374_v1, 0.0  ;;  %v505_v26 = vshrl.u32 %v2604_v12, 16  ;;  %v508_v27 = vshll.u32 %v2604_v12, 16 }
  0x3e   : > { %690 = vrot.lane.b32.xlu1 %v2544_v42, %s2307_s20  ;;  %688 = vrot.lane.b32.xlu0 %v2567_v17, %s2307_s20  ;;  %v608_v25 = vor.u32 %v607_v59, %v512_v54  ;;  %v2040_v28 = vunpack.c.l.bf16 %v2059_v7  ;;  %v371_v34 = vadd.f32 %v2391_v16, %v332_v22  ;;  %v372_v36 = vadd.f32 %v2391_v16, %v333_v23 }
  0x3f   : > { %v2620_v31 = vpack.c.bf16 %v406_v18, %v405_v13  ;;  %v2041_v37 = vunpack.c.h.bf16 %v2059_v7  ;;  %v465_v57 = vrot.slane %v463_v49, 7  ;;  %v2629_v45 = vrot.slane %v484_v20, 7 }
  0x40   : > { %v605_v46 = vrot.slane %v508_v27, 1  ;;  %v336_v61 = vmul.f32 %v2040_v28, %v2363_v4  ;;  %v2636_v43 = vrot.slane %v477_v24, 7  ;;  %v403_v1 = vmax.f32 %v371_v34, 0.0 }
  0x41   : > { %v404_v3 = vmax.f32 %v372_v36, 0.0  ;;  %v529_v49 = vshll.u32 %v2620_v31, 16  ;;  %v337_v20 = vmul.f32 %v2041_v37, %v2363_v4  ;;  %v2044_v59 = vunpack.c.l.bf16 %v2060_v38 }
  0x42   : > { %738 = vrot.lane.b32.xlu1 %v647_v10, %s2308_s21  ;;  %736 = vrot.lane.b32.xlu0 %v646_v14, %s2308_s21  ;;  %v606_v5 = vor.u32 %v605_v46, %v505_v26  ;;  %v375_v7 = vadd.f32 %v2391_v16, %v336_v61  ;;  %v649_v13 = vsel %vm2350_vm2, %v608_v25, 0  ;;  %v526_v24 = vshrl.u32 %v2620_v31, 16 }
  0x43   : > { %v2645_v18 = vpack.c.bf16 %v404_v3, %v403_v1  ;;  %v2045_v10 = vunpack.c.h.bf16 %v2060_v38  ;;  %v611_v14 = vrot.slane %v529_v49, 1  ;;  %v376_v22 = vadd.f32 %v2391_v16, %v337_v20  ;;  %v2297_v38 = vld [vmem:[%s3080_s3 + $0x10] sm:$0x3f]  }
  0x44   : > { %v407_v23 = vmax.f32 %v375_v7, 0.0  ;;  %v338_v28 = vmul.f32 %v2044_v59, %v2363_v4  ;;  %v648_v25 = vsel %vm2350_vm2, %v606_v5, 0  ;;  %v2668_v1 = vor.u32 %v445_v56, %v2509_v19 }
  0x45   : > { %v519_v34 = vshrl.u32 %v2645_v18, 16  ;;  %v522_v36 = vshll.u32 %v2645_v18, 16  ;;  %v339_v37 = vmul.f32 %v2045_v10, %v2363_v4  ;;  %v408_v46 = vmax.f32 %v376_v22, 0.0 }
  0x46   : > { %694 = vrot.lane.b32.xlu1 %v2577_v33, %s2307_s20  ;;  %692 = vrot.lane.b32.xlu0 %v2604_v12, %s2307_s20  ;;  %v377_v61 = vadd.f32 %v2391_v16, %v338_v28  ;;  %v2673_v3 = vor.u32 %v438_v58, %v2532_v32  ;;  %v500_v4 = vrot.slane %v498_v8, 7  ;;  %v493_v5 = vrot.slane %v491_v29, 7 }
  0x47   : > { %v609_v20 = vrot.slane %v522_v36, 1  ;;  %v378_v7 = vadd.f32 %v2391_v16, %v339_v37  ;;  %v514_v59 = vrot.slane %v512_v54, 7  ;;  %v612_v47 = vor.u32 %v611_v14, %v526_v24 }
  0x48   : > { %v425_v56 = vpack.c.bf16 %v408_v46, %v407_v23  ;;  %v409_v19 = vmax.f32 %v377_v61, 0.0  ;;  %v2686_v32 = vsel %vm886_vm3, %v2378_v6, 0  ;;  %v2689_v8 = vsel %vm886_vm3, %v2297_v38, 0 }
  0x49   : > { %v610_v48 = vor.u32 %v609_v20, %v519_v34  ;;  %v410_v58 = vmax.f32 %v378_v7, 0.0  ;;  %2147 = vmatpush3.bf16.msra.mxu0 %v2686_v32  ;;  %v2695_v54 = vor.u32 %v459_v60, %v2549_v53  ;;  %v507_v10 = vrot.slane %v505_v26, 7 }
  0x4a   : > { %742 = vrot.lane.b32.xlu1 %v649_v13, %s2308_s21  ;;  %740 = vrot.lane.b32.xlu0 %v648_v25, %s2308_s21  ;;  %v533_v16 = vshrl.u32 %v425_v56, 16  ;;  %v536_v29 = vshll.u32 %v425_v56, 16  ;;  %v2700_v13 = vor.u32 %v452_v62, %v2584_v40  ;;  %v2706_v14 = vor.u32 %v473_v44, %v2588_v41 }
  0x4b   : > { %v426_v6 = vpack.c.bf16 %v410_v58, %v409_v19  ;;  %2283 = vmatprep.subr.msk.bf16.mxu0 %vm886_vm3, %v2297_v38  ;;  %v2710_v22 = vor.u32 %v466_v50, %v465_v57  ;;  %v528_v51 = vrot.slane %v526_v24, 7  ;;  %v651_v60 = vsel %vm2350_vm2, %v612_v47, 0 }
  0x4c   : > { %v521_v52 = vrot.slane %v519_v34, 7  ;;  %v613_v62 = vrot.slane %v536_v29, 1  ;;  %v650_v35 = vsel %vm2350_vm2, %v610_v48, 0  ;;  %v535_v44 = vrot.slane %v533_v16, 7 }
  0x4d   : > { %v540_v53 = vshrl.u32 %v426_v6, 16  ;;  %v543_v39 = vshll.u32 %v426_v6, 16  ;;  %v2723_v40 = vor.u32 %v487_v21, %v2629_v45  ;;  %v2728_v41 = vor.u32 %v480_v55, %v2636_v43 }
  0x4e   : > { %698 = vrot.lane.b32.xlu1 %v2620_v31, %s2307_s20  ;;  %696 = vrot.lane.b32.xlu0 %v2645_v18, %s2307_s20  ;;  %v614_v50 = vor.u32 %v613_v62, %v533_v16  ;;  %v2732_v26 = vor.u32 %v501_v9, %v500_v4  ;;  %v2736_v24 = vor.u32 %v494_v30, %v493_v5  ;;  %v568_v23 = vsel %vm2768_vm6, 0, %v2668_v1 }
  0x4f   : > { %v542_v57 = vrot.slane %v540_v53, 7  ;;  %v615_v18 = vrot.slane %v543_v39, 1  ;;  %v2740_v11 = vor.u32 %v515_v63, %v514_v59  ;;  %v2748_v55 = vor.u32 %v508_v27, %v507_v10 }
  0x50   : > { %v652_v15 = vsel %vm2350_vm2, %v614_v50, 0  ;;  %v2752_v42 = vor.u32 %v529_v49, %v528_v51  ;;  %v2754_v9 = vor.u32 %v522_v36, %v521_v52  ;;  %v2756_v17 = vor.u32 %v536_v29, %v535_v44 }
  0x51   : > { %v616_v21 = vor.u32 %v615_v18, %v540_v53  ;;  %v2758_v30 = vor.u32 %v543_v39, %v542_v57  ;;  %v430_v63 = vrot.slane %v2306_v0, 7  ;;  %v567_v28 = vsel %vm2768_vm6, 0, %v2673_v3 }
  0x52   : > { %746 = vrot.lane.b32.xlu1 %v651_v60, %s2308_s21  ;;  %744 = vrot.lane.b32.xlu0 %v650_v35, %s2308_s21  ;;  %v570_v3 = vsel %vm2768_vm6, 0, %v2695_v54  ;;  %v569_v4 = vsel %vm2768_vm6, 0, %v2700_v13  ;;  %v572_v58 = vsel %vm2768_vm6, 0, %v2706_v14  ;;  %v573_v51 = vsel %vm2768_vm6, 0, %v2728_v41 }
  0x53   : > { %v653_v33 = vsel %vm2350_vm2, %v616_v21, 0  ;;  %v566_v27 = vsel %vm2768_vm6, 0, %v430_v63  ;;  %v575_v41 = vsel %vm2768_vm6, 0, %v2736_v24 }
  0x56   : > { %700 = vrot.lane.b32.xlu0 %v425_v56, %s2307_s20  ;;  %748 = vrot.lane.b32.xlu1 %v652_v15, %s2308_s21 }
  0x5a   : > { %835 = vrot.lane.b32.xlu0 %v426_v6, %s2307_s20  ;;  %838 = vrot.lane.b32.xlu1 %v653_v33, %s2308_s21 }
  0x78   : > { %v671_v31 = vpop.permute.xlu0 %670 }
  0x79   : > { %v753_v2 = vsel %vm750_vm7, %v566_v27, %v671_v31  ;;  %v578_v27 = vsel %vm2768_vm6, 0, %v2740_v11  ;;  %v577_v31 = vsel %vm2768_vm6, 0, %v2748_v55 }
  0x7b   : > { %v719_v45 = vpop.permute.xlu1 %718 }
  0x7c   : > { %v2776_v43 = vsel %vm799_vm8, %v753_v2, %v719_v45 }
  0x7d   : > { %2148 = vmatprep.mubr.msk.bf16.mxu0 %vm853_vm9, %v2776_v43 }
  0x8d   : > { %v675_v0 = vpop.permute.xlu1 %674  ;;  %v673_v49 = vpop.permute.xlu0 %672 }
  0x8e   : > { %v759_v25 = vsel %vm750_vm7, %v568_v23, %v675_v0  ;;  %v756_v34 = vsel %vm750_vm7, %v567_v28, %v673_v49 }
  0x94   : > { %v723_v36 = vpop.permute.xlu1 %722  ;;  %v721_v37 = vpop.permute.xlu0 %720 }
  0x95   : > { %v805_v38 = vsel %vm799_vm8, %v759_v25, %v723_v36  ;;  %v803_v46 = vsel %vm799_vm8, %v756_v34, %v721_v37  ;;  %v580_v25 = vsel %vm2768_vm6, 0, %v2752_v42  ;;  %v579_v34 = vsel %vm2768_vm6, 0, %v2754_v9 }
  0x96   : > { %2114 = vmatprep.mubr.msk.bf16.mxu1 %vm853_vm9, %v803_v46  ;;  %2149 = vmatmul.mubr.msk.bf16.vlgmr.msra.gmra.mrb[0].mxu0 %vm853_vm9, %v803_v46  ;;  %v581_v42 = vsel %vm2768_vm6, 0, %v2756_v17 }
  0x97   : > { %2115 = vmatmul.mubr.msk.bf16.vlgmr.msra.gmra.mrb[0].mxu1 %vm853_vm9, %v805_v38  ;;  %2152 = vmatprep.mubr.msk.bf16.mxu0 %vm853_vm9, %v805_v38 }
  0x98   : > { %2215 = vmatpush3.bf16.msra.mxu1 %v2686_v32  ;;  %2181 = vmatpush3.bf16.msra.mxu0 %v2689_v8  ;;  %v679_v61 = vpop.permute.xlu1 %678  ;;  %v677_v1 = vpop.permute.xlu0 %676  ;;  %v571_v32 = vsel %vm2768_vm6, 0, %v2710_v22  ;;  %v574_v22 = vsel %vm2768_vm6, 0, %v2723_v40  ;;  %v576_v40 = vsel %vm2768_vm6, 0, %v2732_v26 }
  0x99   : > { %v765_v5 = vsel %vm750_vm7, %v570_v3, %v679_v61  ;;  %v762_v20 = vsel %vm750_vm7, %v569_v4, %v677_v1 }
  0x9c   : > { %v727_v7 = vpop.permute.xlu1 %726  ;;  %v725_v59 = vpop.permute.xlu0 %724 }
  0x9d   : > { %v809_v47 = vsel %vm799_vm8, %v765_v5, %v727_v7  ;;  %v807_v56 = vsel %vm799_vm8, %v762_v20, %v725_v59  ;;  %v582_v20 = vsel %vm2768_vm6, 0, %v2758_v30 }
  0x9e   : > { %2118 = vmatprep.mubr.msk.bf16.mxu1 %vm853_vm9, %v807_v56  ;;  %2153 = vmatmul.mubr.msk.bf16.gmra.mrb[4].mxu0 %vm853_vm9, %v807_v56 }
  0x9f   : > { %2119 = vmatmul.mubr.msk.bf16.gmra.mrb[4].mxu1 %vm853_vm9, %v809_v47  ;;  %2156 = vmatprep.mubr.msk.bf16.mxu0 %vm853_vm9, %v809_v47 }
  0xa0   : > { %v683_v19 = vpop.permute.xlu1 %682  ;;  %v681_v48 = vpop.permute.xlu0 %680 }
  0xa1   : > { %v771_v8 = vsel %vm750_vm7, %v572_v58, %v683_v19  ;;  %v768_v16 = vsel %vm750_vm7, %v571_v32, %v681_v48 }
  0xa4   : > { %v731_v29 = vpop.permute.xlu1 %730  ;;  %v729_v54 = vpop.permute.xlu0 %728 }
  0xa5   : > { %v813_v13 = vsel %vm799_vm8, %v771_v8, %v731_v29  ;;  %v811_v10 = vsel %vm799_vm8, %v768_v16, %v729_v54 }
  0xa6   : > { %2122 = vmatprep.mubr.msk.bf16.mxu1 %vm853_vm9, %v811_v10  ;;  %2157 = vmatmul.mubr.msk.bf16.gmra.mrb[8].mxu0 %vm853_vm9, %v811_v10 }
  0xa7   : > { %2123 = vmatmul.mubr.msk.bf16.gmra.mrb[8].mxu1 %vm853_vm9, %v813_v13  ;;  %2160 = vmatprep.mubr.msk.bf16.mxu0 %vm853_vm9, %v813_v13 }
  0xa8   : > { %v687_v6 = vpop.permute.xlu1 %686  ;;  %v685_v14 = vpop.permute.xlu0 %684 }
  0xa9   : > { %v777_v60 = vsel %vm750_vm7, %v574_v22, %v687_v6  ;;  %v774_v52 = vsel %vm750_vm7, %v573_v51, %v685_v14 }
  0xac   : > { %v735_v62 = vpop.permute.xlu1 %734  ;;  %v733_v35 = vpop.permute.xlu0 %732 }
  0xad   : > { %v817_v44 = vsel %vm799_vm8, %v777_v60, %v735_v62  ;;  %v815_v53 = vsel %vm799_vm8, %v774_v52, %v733_v35 }
  0xae   : > { %2126 = vmatprep.mubr.msk.bf16.mxu1 %vm853_vm9, %v815_v53  ;;  %2161 = vmatmul.mubr.msk.bf16.gmra.mrb[12].mxu0 %vm853_vm9, %v815_v53 }
  0xaf   : > { %2127 = vmatmul.mubr.msk.bf16.gmra.mrb[12].mxu1 %vm853_vm9, %v817_v44  ;;  %2182 = vmatprep.mubr.msk.bf16.mxu0 %vm853_vm9, %v805_v38 }
  0xb0   : > { %v691_v39 = vpop.permute.xlu1 %690  ;;  %v689_v50 = vpop.permute.xlu0 %688 }
  0xb1   : > { %v783_v57 = vsel %vm750_vm7, %v576_v40, %v691_v39  ;;  %v780_v18 = vsel %vm750_vm7, %v575_v41, %v689_v50 }
  0xb4   : > { %v739_v15 = vpop.permute.xlu1 %738  ;;  %v737_v21 = vpop.permute.xlu0 %736 }
  0xb5   : > { %v821_v33 = vsel %vm799_vm8, %v783_v57, %v739_v15  ;;  %v819_v63 = vsel %vm799_vm8, %v780_v18, %v737_v21 }
  0xb6   : > { %2130 = vmatprep.mubr.msk.bf16.mxu1 %vm853_vm9, %v819_v63  ;;  %2183 = vmatmul.mubr.msk.bf16.vlgmr.msra.gmra.mrb[0].mxu0 %vm853_vm9, %v807_v56 }
  0xb7   : > { %2131 = vmatmul.mubr.msk.bf16.gmra.mrb[16].mxu1 %vm853_vm9, %v821_v33  ;;  %2186 = vmatprep.mubr.msk.bf16.mxu0 %vm853_vm9, %v809_v47 }
  0xb8   : > { %v695_v26 = vpop.permute.xlu1 %694  ;;  %v693_v24 = vpop.permute.xlu0 %692 }
  0xb9   : > { %v789_v2 = vsel %vm750_vm7, %v578_v27, %v695_v26  ;;  %v786_v45 = vsel %vm750_vm7, %v577_v31, %v693_v24 }
  0xbc   : > { %v743_v0 = vpop.permute.xlu1 %742  ;;  %v741_v49 = vpop.permute.xlu0 %740 }
  0xbd   : > { %v825_v23 = vsel %vm799_vm8, %v789_v2, %v743_v0  ;;  %v823_v28 = vsel %vm799_vm8, %v786_v45, %v741_v49 }
  0xbe   : > { %2134 = vmatprep.mubr.msk.bf16.mxu1 %vm853_vm9, %v823_v28  ;;  %2187 = vmatmul.mubr.msk.bf16.gmra.mrb[4].mxu0 %vm853_vm9, %v811_v10 }
  0xbf   : > { %2135 = vmatmul.mubr.msk.bf16.gmra.mrb[20].mxu1 %vm853_vm9, %v825_v23  ;;  %2190 = vmatprep.mubr.msk.bf16.mxu0 %vm853_vm9, %v813_v13 }
  0xc0   : > { %v699_v11 = vpop.permute.xlu1 %698  ;;  %v697_v55 = vpop.permute.xlu0 %696 }
  0xc1   : > { %v795_v36 = vsel %vm750_vm7, %v580_v25, %v699_v11  ;;  %v792_v37 = vsel %vm750_vm7, %v579_v34, %v697_v55 }
  0xc4   : > { %v747_v38 = vpop.permute.xlu1 %746  ;;  %v745_v46 = vpop.permute.xlu0 %744 }
  0xc5   : > { %v829_v61 = vsel %vm799_vm8, %v795_v36, %v747_v38  ;;  %v827_v1 = vsel %vm799_vm8, %v792_v37, %v745_v46 }
  0xc6   : > { %2138 = vmatprep.mubr.msk.bf16.mxu1 %vm853_vm9, %v827_v1  ;;  %2191 = vmatmul.mubr.msk.bf16.gmra.mrb[8].mxu0 %vm853_vm9, %v815_v53 }
  0xc7   : > { %2139 = vmatmul.mubr.msk.bf16.gmra.mrb[24].mxu1 %vm853_vm9, %v829_v61  ;;  %2194 = vmatprep.mubr.msk.bf16.mxu0 %vm853_vm9, %v817_v44 }
  0xc8   : > { %v701_v9 = vpop.permute.xlu0 %700  ;;  %v749_v3 = vpop.permute.xlu1 %748 }
  0xc9   : > { %v798_v4 = vsel %vm750_vm7, %v581_v42, %v701_v9 }
  0xca   : > { %v831_v5 = vsel %vm799_vm8, %v798_v4, %v749_v3 }
  0xcb   : > { %2142 = vmatprep.mubr.msk.bf16.mxu1 %vm853_vm9, %v831_v5 }
  0xcc   : > { %v836_v7 = vpop.permute.xlu0 %835  ;;  %v839_v59 = vpop.permute.xlu1 %838 }
  0xcd   : > { %v842_v17 = vsel %vm750_vm7, %v582_v20, %v836_v7 }
  0xce   : > { %v844_v47 = vsel %vm799_vm8, %v842_v17, %v839_v59  ;;  %2195 = vmatmul.mubr.msk.bf16.gmra.mrb[12].mxu0 %vm853_vm9, %v819_v63 }
  0xcf   : > { %2143 = vmatmul.mubr.msk.bf16.gmra.mrb[28].mxu1 %vm853_vm9, %v844_v47  ;;  %2198 = vmatprep.mubr.msk.bf16.mxu0 %vm853_vm9, %v821_v33 }
  0xd0   : > { %2164 = vmatprep.mubr.msk.bf16.mxu1 %vm853_vm9, %v817_v44 }
  0xd6   : > { %2199 = vmatmul.mubr.msk.bf16.gmra.mrb[16].mxu0 %vm853_vm9, %v823_v28 }
  0xd7   : > { %2165 = vmatmul.mubr.msk.bf16.vlgmr.msra.gmra.mrb[16].mxu1 %vm853_vm9, %v819_v63  ;;  %2202 = vmatprep.mubr.msk.bf16.mxu0 %vm853_vm9, %v825_v23 }
  0xd8   : > { %2168 = vmatprep.mubr.msk.bf16.mxu1 %vm853_vm9, %v821_v33 }
  0xde   : > { %2203 = vmatmul.mubr.msk.bf16.gmra.mrb[20].mxu0 %vm853_vm9, %v827_v1 }
  0xdf   : > { %2169 = vmatmul.mubr.msk.bf16.gmra.mrb[20].mxu1 %vm853_vm9, %v823_v28  ;;  %2206 = vmatprep.mubr.msk.bf16.mxu0 %vm853_vm9, %v829_v61 }
  0xe0   : > { %2172 = vmatprep.mubr.msk.bf16.mxu1 %vm853_vm9, %v825_v23 }
  0xe6   : > { %2207 = vmatmul.mubr.msk.bf16.gmra.mrb[24].mxu0 %vm853_vm9, %v831_v5 }
  0xe7   : > { %2173 = vmatmul.mubr.msk.bf16.gmra.mrb[24].mxu1 %vm853_vm9, %v827_v1  ;;  %2210 = vmatprep.mubr.msk.bf16.mxu0 %vm853_vm9, %v844_v47 }
  0xe8   : > { %2176 = vmatprep.mubr.msk.bf16.mxu1 %vm853_vm9, %v829_v61 }
  0xee   : > { %2211 = vmatmul.mubr.msk.bf16.gmra.mrb[28].mxu0 %vm853_vm9, %v2776_v43 }
  0xef   : > { %2177 = vmatmul.mubr.msk.bf16.gmra.mrb[28].mxu1 %vm853_vm9, %v831_v5 }
 0x16a   : > { %v2116_v30 = vpop.f32.mrb[0].mxu1 }
 0x16b   : > { %v924_v12 = vpop.f32.mrb[1].mxu1 }
 0x16c   : > { %v2117_v56 = vpop.f32.mrb[2].mxu1 }
 0x16d   : > { %v927_v19 = vpop.f32.mrb[3].mxu1 }
 0x172   : > { %v2120_v48 = vpop.f32.mrb[4].mxu1 }
 0x173   : > { %v940_v58 = vpop.f32.mrb[5].mxu1 }
 0x174   : > { %v2121_v32 = vpop.f32.mrb[6].mxu1 }
 0x175   : > { %v943_v8 = vpop.f32.mrb[7].mxu1 }
 0x17a   : > { %v2910_v16 = vpop.f32.mrb[8].mxu1 }
 0x17b   : > { %v2912_v29 = vpop.f32.mrb[9].mxu1 }
 0x17c   : > { %v2914_v54 = vpop.f32.mrb[10].mxu1 }
 0x17d   : > { %v2916_v13 = vpop.f32.mrb[11].mxu1 }
 0x182   : > { %v2918_v43 = vpop.f32.mrb[12].mxu1 }
 0x183   : > { %v2920_v10 = vpop.f32.mrb[13].mxu1 }
 0x184   : > { %v2922_v6 = vpop.f32.mrb[14].mxu1 }
 0x185   : > { %v2924_v14 = vpop.f32.mrb[15].mxu1 }
 0x189   : > { %v2184_v22 = vpop.f32.mrb[0].mxu0 }
 0x18a   : > { %v2216_v51 = vadd.f32 %v2184_v22, %v2116_v30  ;;  %v1267_v60 = vpop.f32.mrb[1].mxu0 }
 0x18b   : > { %v2217_v52 = vadd.f32 %v1267_v60, %v924_v12  ;;  %v2185_v62 = vpop.f32.mrb[2].mxu0 }
 0x18c   : > { %v1952_v35 = vpack.c.bf16 %v2216_v51, %v2216_v51  ;;  %v2218_v44 = vadd.f32 %v2185_v62, %v2117_v56  ;;  %v1270_v53 = vpop.f32.mrb[3].mxu0  ;;  %v1497_v41 = vmul.f32 %v2216_v51, %v2216_v51  ;;  %v1429_v24 = vsel %vm750_vm7, %v2216_v51, 0.0 }
 0x18d   : > { %v1495_v39 = vmul.f32 %v2217_v52, %v2217_v52  ;;  %v1950_v50 = vpack.c.bf16 %v2217_v52, %v2217_v52  ;;  %v2219_v40 = vadd.f32 %v1270_v53, %v927_v19  ;;  %v1426_v18 = vsel %vm750_vm7, %v2217_v52, 0.0 }
 0x18e   : > { %1731 = vst.msk [vmem:[%s2931_s13 + $0x8] sm:$0xf] %vm1728_vm10, %v1952_v35  ;;  %v1953_v57 = vpack.c.bf16 %v2218_v44, %v2218_v44  ;;  %v1498_v63 = vmul.f32 %v2218_v44, %v2218_v44  ;;  %v1530_v28 = vsel %vm750_vm7, %v1497_v41, 0.0  ;;  %v1431_v25 = vsel %vm750_vm7, %v2218_v44, 0.0 }
 0x18f   : > { %1729 = vst.msk [vmem:[%s2931_s13] sm:$0xf] %vm1728_vm10, %v1950_v50  ;;  %v1427_v15 = vsel %vm750_vm7, %v2219_v40, 0.0  ;;  %v1496_v21 = vmul.f32 %v2219_v40, %v2219_v40  ;;  %v1951_v33 = vpack.c.bf16 %v2219_v40, %v2219_v40  ;;  %v1527_v27 = vsel %vm750_vm7, %v1495_v39, 0.0 }
 0x190   : > { %1732 = vst.msk [vmem:[%s2931_s13 + $0xc] sm:$0xf] %vm1728_vm10, %v1953_v57  ;;  %v1428_v26 = vadd.f32 %v1427_v15, %v1426_v18  ;;  %v1532_v34 = vsel %vm750_vm7, %v1498_v63, 0.0 }
 0x191   : > { %v1528_v31 = vsel %vm750_vm7, %v1496_v21, 0.0  ;;  %1730 = vst.msk [vmem:[%s2931_s13 + $0x4] sm:$0xf] %vm1728_vm10, %v1951_v33  ;;  %v2188_v2 = vpop.f32.mrb[4].mxu0 }
 0x192   : > { %v1430_v45 = vadd.f32 %v1429_v24, %v1428_v26  ;;  %v1529_v0 = vadd.f32 %v1528_v31, %v1527_v27  ;;  %v2220_v49 = vadd.f32 %v2188_v2, %v2120_v48  ;;  %v1283_v23 = vpop.f32.mrb[5].mxu0 }
 0x193   : > { %v2221_v11 = vadd.f32 %v1283_v23, %v940_v58  ;;  %v2189_v55 = vpop.f32.mrb[6].mxu0 }
 0x194   : > { %v1531_v36 = vadd.f32 %v1530_v28, %v1529_v0  ;;  %v1956_v37 = vpack.c.bf16 %v2220_v49, %v2220_v49  ;;  %v1286_v38 = vpop.f32.mrb[7].mxu0  ;;  %v1432_v46 = vadd.f32 %v1431_v25, %v1430_v45  ;;  %v2222_v3 = vadd.f32 %v2189_v55, %v2121_v32 }
 0x195   : > { %v1433_v61 = vsel %vm750_vm7, %v2221_v11, 0.0  ;;  %v1499_v1 = vmul.f32 %v2221_v11, %v2221_v11  ;;  %v1954_v42 = vpack.c.bf16 %v2221_v11, %v2221_v11  ;;  %v2223_v4 = vadd.f32 %v1286_v38, %v943_v8 }
 0x196   : > { %1735 = vst.msk [vmem:[%s2931_s13 + $0x18] sm:$0xf] %vm1728_vm10, %v1956_v37  ;;  %v1533_v9 = vadd.f32 %v1532_v34, %v1531_v36  ;;  %v1434_v5 = vadd.f32 %v1433_v61, %v1432_v46  ;;  %v1501_v7 = vmul.f32 %v2220_v49, %v2220_v49  ;;  %v1957_v17 = vpack.c.bf16 %v2222_v3, %v2222_v3 }
 0x197   : > { %v1534_v20 = vsel %vm750_vm7, %v1499_v1, 0.0  ;;  %1733 = vst.msk [vmem:[%s2931_s13 + $0x10] sm:$0xf] %vm1728_vm10, %v1954_v42  ;;  %v1435_v47 = vsel %vm750_vm7, %v2223_v4, 0.0  ;;  %v1500_v30 = vmul.f32 %v2223_v4, %v2223_v4  ;;  %v1955_v12 = vpack.c.bf16 %v2223_v4, %v2223_v4 }
 0x198   : > { %v1535_v59 = vadd.f32 %v1534_v20, %v1533_v9  ;;  %1736 = vst.msk [vmem:[%s2931_s13 + $0x1c] sm:$0xf] %vm1728_vm10, %v1957_v17  ;;  %v1436_v19 = vadd.f32 %v1435_v47, %v1434_v5  ;;  %v1437_v32 = vsel %vm750_vm7, %v2220_v49, 0.0  ;;  %v1502_v8 = vmul.f32 %v2222_v3, %v2222_v3 }
 0x199   : > { %v2192_v56 = vpop.f32.mrb[8].mxu0  ;;  %v1536_v22 = vsel %vm750_vm7, %v1500_v30, 0.0  ;;  %1734 = vst.msk [vmem:[%s2931_s13 + $0x14] sm:$0xf] %vm1728_vm10, %v1955_v12  ;;  %v1538_v52 = vsel %vm750_vm7, %v1501_v7, 0.0  ;;  %v1439_v62 = vsel %vm750_vm7, %v2222_v3, 0.0 }
 0x19a   : > { %v2224_v48 = vadd.f32 %v2192_v56, %v2910_v16  ;;  %v1299_v58 = vpop.f32.mrb[9].mxu0  ;;  %v1438_v35 = vadd.f32 %v1437_v32, %v1436_v19  ;;  %v1537_v44 = vadd.f32 %v1536_v22, %v1535_v59 }
 0x19b   : > { %v2225_v51 = vadd.f32 %v1299_v58, %v2912_v29  ;;  %v2193_v60 = vpop.f32.mrb[10].mxu0  ;;  %v1540_v29 = vsel %vm750_vm7, %v1502_v8, 0.0 }
 0x19c   : > { %v1302_v16 = vpop.f32.mrb[11].mxu0  ;;  %v1960_v53 = vpack.c.bf16 %v2224_v48, %v2224_v48  ;;  %v1539_v41 = vadd.f32 %v1538_v52, %v1537_v44  ;;  %v1440_v57 = vadd.f32 %v1439_v62, %v1438_v35  ;;  %v2226_v18 = vadd.f32 %v2193_v60, %v2914_v54 }
 0x19d   : > { %v1441_v39 = vsel %vm750_vm7, %v2225_v51, 0.0  ;;  %v1503_v50 = vmul.f32 %v2225_v51, %v2225_v51  ;;  %v1958_v40 = vpack.c.bf16 %v2225_v51, %v2225_v51  ;;  %v2227_v21 = vadd.f32 %v1302_v16, %v2916_v13 }
 0x19e   : > { %1739 = vst.msk [vmem:[%s2931_s13 + $0x28] sm:$0xf] %vm1728_vm10, %v1960_v53  ;;  %v1505_v33 = vmul.f32 %v2224_v48, %v2224_v48  ;;  %v1442_v63 = vadd.f32 %v1441_v39, %v1440_v57  ;;  %v1541_v26 = vadd.f32 %v1540_v29, %v1539_v41  ;;  %v1961_v24 = vpack.c.bf16 %v2226_v18, %v2226_v18 }
 0x19f   : > { %v1542_v15 = vsel %vm750_vm7, %v1503_v50, 0.0  ;;  %1737 = vst.msk [vmem:[%s2931_s13 + $0x20] sm:$0xf] %vm1728_vm10, %v1958_v40  ;;  %v1443_v27 = vsel %vm750_vm7, %v2227_v21, 0.0  ;;  %v1504_v31 = vmul.f32 %v2227_v21, %v2227_v21  ;;  %v1959_v54 = vpack.c.bf16 %v2227_v21, %v2227_v21 }
 0x1a0   : > { %v1543_v45 = vadd.f32 %v1542_v15, %v1541_v26  ;;  %v1444_v0 = vadd.f32 %v1443_v27, %v1442_v63  ;;  %v1445_v28 = vsel %vm750_vm7, %v2224_v48, 0.0  ;;  %v1506_v11 = vmul.f32 %v2226_v18, %v2226_v18  ;;  %1740 = vst.msk [vmem:[%s2931_s13 + $0x2c] sm:$0xf] %vm1728_vm10, %v1961_v24 }
 0x1a1   : > { %v2196_v2 = vpop.f32.mrb[12].mxu0  ;;  %v1544_v13 = vsel %vm750_vm7, %v1504_v31, 0.0  ;;  %1738 = vst.msk [vmem:[%s2931_s13 + $0x24] sm:$0xf] %vm1728_vm10, %v1959_v54  ;;  %v1546_v34 = vsel %vm750_vm7, %v1505_v33, 0.0  ;;  %v1447_v36 = vsel %vm750_vm7, %v2226_v18, 0.0 }
 0x1a2   : > { %v2228_v49 = vadd.f32 %v2196_v2, %v2918_v43  ;;  %v1315_v23 = vpop.f32.mrb[13].mxu0  ;;  %v1446_v43 = vadd.f32 %v1445_v28, %v1444_v0  ;;  %v1545_v37 = vadd.f32 %v1544_v13, %v1543_v45 }
 0x1a3   : > { %v2229_v55 = vadd.f32 %v1315_v23, %v2920_v10  ;;  %v2197_v25 = vpop.f32.mrb[14].mxu0  ;;  %v1548_v10 = vsel %vm750_vm7, %v1506_v11, 0.0 }
 0x1a4   : > { %v1318_v38 = vpop.f32.mrb[15].mxu0  ;;  %v1964_v46 = vpack.c.bf16 %v2228_v49, %v2228_v49  ;;  %v1547_v9 = vadd.f32 %v1546_v34, %v1545_v37  ;;  %v1448_v3 = vadd.f32 %v1447_v36, %v1446_v43  ;;  %v2230_v4 = vadd.f32 %v2197_v25, %v2922_v6 }
 0x1a5   : > { %v1449_v61 = vsel %vm750_vm7, %v2229_v55, 0.0  ;;  %v1507_v1 = vmul.f32 %v2229_v55, %v2229_v55  ;;  %v1962_v42 = vpack.c.bf16 %v2229_v55, %v2229_v55  ;;  %v2231_v20 = vadd.f32 %v1318_v38, %v2924_v14 }
 0x1a6   : > { %1743 = vst.msk [vmem:[%s2931_s13 + $0x38] sm:$0xf] %vm1728_vm10, %v1964_v46  ;;  %v1509_v7 = vmul.f32 %v2228_v49, %v2228_v49  ;;  %v1450_v59 = vadd.f32 %v1449_v61, %v1448_v3  ;;  %v1549_v17 = vadd.f32 %v1548_v10, %v1547_v9  ;;  %v1965_v47 = vpack.c.bf16 %v2230_v4, %v2230_v4 }
 0x1a7   : > { %v1550_v5 = vsel %vm750_vm7, %v1507_v1, 0.0  ;;  %1741 = vst.msk [vmem:[%s2931_s13 + $0x30] sm:$0xf] %vm1728_vm10, %v1962_v42  ;;  %v1451_v30 = vsel %vm750_vm7, %v2231_v20, 0.0  ;;  %v1508_v12 = vmul.f32 %v2231_v20, %v2231_v20  ;;  %v1963_v6 = vpack.c.bf16 %v2231_v20, %v2231_v20 }
 0x1a8   : > { %v1551_v19 = vadd.f32 %v1550_v5, %v1549_v17  ;;  %v1452_v48 = vadd.f32 %v1451_v30, %v1450_v59  ;;  %v1453_v8 = vsel %vm750_vm7, %v2228_v49, 0.0  ;;  %v1510_v22 = vmul.f32 %v2230_v4, %v2230_v4  ;;  %1744 = vst.msk [vmem:[%s2931_s13 + $0x3c] sm:$0xf] %vm1728_vm10, %v1965_v47 }
 0x1a9   : > { %v2200_v56 = vpop.f32.mrb[16].mxu0  ;;  %v1552_v14 = vsel %vm750_vm7, %v1508_v12, 0.0  ;;  %1742 = vst.msk [vmem:[%s2931_s13 + $0x34] sm:$0xf] %vm1728_vm10, %v1963_v6  ;;  %v1554_v39 = vsel %vm750_vm7, %v1509_v7, 0.0  ;;  %v1455_v50 = vsel %vm750_vm7, %v2230_v4, 0.0 }
 0x1aa   : > { %v2166_v58 = vpop.f32.mrb[16].mxu1  ;;  %v1331_v32 = vpop.f32.mrb[17].mxu0  ;;  %v1454_v62 = vadd.f32 %v1453_v8, %v1452_v48  ;;  %v1553_v35 = vadd.f32 %v1552_v14, %v1551_v19  ;;  %v1556_v33 = vsel %vm750_vm7, %v1510_v22, 0.0 }
 0x1ab   : > { %v2232_v51 = vadd.f32 %v2200_v56, %v2166_v58  ;;  %v1159_v60 = vpop.f32.mrb[17].mxu1  ;;  %v2201_v52 = vpop.f32.mrb[18].mxu0 }
 0x1ac   : > { %v2233_v44 = vadd.f32 %v1331_v32, %v1159_v60  ;;  %v2167_v16 = vpop.f32.mrb[18].mxu1  ;;  %v1334_v53 = vpop.f32.mrb[19].mxu0  ;;  %v1555_v18 = vadd.f32 %v1554_v39, %v1553_v35  ;;  %v1456_v29 = vadd.f32 %v1455_v50, %v1454_v62 }
 0x1ad   : > { %v1968_v40 = vpack.c.bf16 %v2232_v51, %v2232_v51  ;;  %v2234_v41 = vadd.f32 %v2201_v52, %v2167_v16  ;;  %v1162_v57 = vpop.f32.mrb[19].mxu1  ;;  %v1513_v54 = vmul.f32 %v2232_v51, %v2232_v51  ;;  %v1461_v36 = vsel %vm750_vm7, %v2232_v51, 0.0 }
 0x1ae   : > { %v1457_v15 = vsel %vm750_vm7, %v2233_v44, 0.0  ;;  %v1511_v21 = vmul.f32 %v2233_v44, %v2233_v44  ;;  %v1966_v63 = vpack.c.bf16 %v2233_v44, %v2233_v44  ;;  %v1557_v24 = vadd.f32 %v1556_v33, %v1555_v18 }
 0x1af   : > { %1747 = vst.msk [vmem:[%s2931_s13 + $0x48] sm:$0xf] %vm1728_vm10, %v1968_v40  ;;  %v1458_v26 = vadd.f32 %v1457_v15, %v1456_v29  ;;  %v1969_v31 = vpack.c.bf16 %v2234_v41, %v2234_v41  ;;  %v2235_v2 = vadd.f32 %v1334_v53, %v1162_v57  ;;  %v1562_v61 = vsel %vm750_vm7, %v1513_v54, 0.0 }
 0x1b0   : > { %v1558_v27 = vsel %vm750_vm7, %v1511_v21, 0.0  ;;  %1745 = vst.msk [vmem:[%s2931_s13 + $0x40] sm:$0xf] %vm1728_vm10, %v1966_v63  ;;  %v1514_v1 = vmul.f32 %v2234_v41, %v2234_v41  ;;  %v1463_v4 = vsel %vm750_vm7, %v2234_v41, 0.0 }
 0x1b1   : > { %v2204_v45 = vpop.f32.mrb[20].mxu0  ;;  %v1559_v0 = vadd.f32 %v1558_v27, %v1557_v24  ;;  %1748 = vst.msk [vmem:[%s2931_s13 + $0x4c] sm:$0xf] %vm1728_vm10, %v1969_v31  ;;  %v1459_v28 = vsel %vm750_vm7, %v2235_v2, 0.0  ;;  %v1512_v11 = vmul.f32 %v2235_v2, %v2235_v2  ;;  %v1967_v13 = vpack.c.bf16 %v2235_v2, %v2235_v2 }
 0x1b2   : > { %v2170_v49 = vpop.f32.mrb[20].mxu1  ;;  %v1347_v23 = vpop.f32.mrb[21].mxu0  ;;  %v1460_v43 = vadd.f32 %v1459_v28, %v1458_v26  ;;  %v1564_v6 = vsel %vm750_vm7, %v1514_v1, 0.0 }
 0x1b3   : > { %v2236_v55 = vadd.f32 %v2204_v45, %v2170_v49  ;;  %v1175_v25 = vpop.f32.mrb[21].mxu1  ;;  %v2205_v34 = vpop.f32.mrb[22].mxu0  ;;  %v1560_v42 = vsel %vm750_vm7, %v1512_v11, 0.0  ;;  %1746 = vst.msk [vmem:[%s2931_s13 + $0x44] sm:$0xf] %vm1728_vm10, %v1967_v13 }
 0x1b4   : > { %v2237_v37 = vadd.f32 %v1347_v23, %v1175_v25  ;;  %v2171_v38 = vpop.f32.mrb[22].mxu1  ;;  %v1350_v46 = vpop.f32.mrb[23].mxu0  ;;  %v1462_v10 = vadd.f32 %v1461_v36, %v1460_v43  ;;  %v1561_v5 = vadd.f32 %v1560_v42, %v1559_v0 }
 0x1b5   : > { %v1972_v9 = vpack.c.bf16 %v2236_v55, %v2236_v55  ;;  %v1178_v3 = vpop.f32.mrb[23].mxu1  ;;  %v2238_v17 = vadd.f32 %v2205_v34, %v2171_v38  ;;  %v1517_v52 = vmul.f32 %v2236_v55, %v2236_v55  ;;  %v1469_v57 = vsel %vm750_vm7, %v2236_v55, 0.0 }
 0x1b6   : > { %v1515_v20 = vmul.f32 %v2237_v37, %v2237_v37  ;;  %v1465_v7 = vsel %vm750_vm7, %v2237_v37, 0.0  ;;  %v1970_v59 = vpack.c.bf16 %v2237_v37, %v2237_v37  ;;  %v2239_v47 = vadd.f32 %v1350_v46, %v1178_v3 }
 0x1b7   : > { %1751 = vst.msk [vmem:[%s2931_s13 + $0x58] sm:$0xf] %vm1728_vm10, %v1972_v9  ;;  %v1563_v30 = vadd.f32 %v1562_v61, %v1561_v5  ;;  %v1464_v12 = vadd.f32 %v1463_v4, %v1462_v10  ;;  %v1973_v19 = vpack.c.bf16 %v2238_v17, %v2238_v17  ;;  %v1518_v18 = vmul.f32 %v2238_v17, %v2238_v17 }
 0x1b8   : > { %v1566_v56 = vsel %vm750_vm7, %v1515_v20, 0.0  ;;  %1749 = vst.msk [vmem:[%s2931_s13 + $0x50] sm:$0xf] %vm1728_vm10, %v1970_v59  ;;  %v1467_v48 = vsel %vm750_vm7, %v2239_v47, 0.0  ;;  %v1516_v22 = vmul.f32 %v2239_v47, %v2239_v47  ;;  %v1971_v14 = vpack.c.bf16 %v2239_v47, %v2239_v47 }
 0x1b9   : > { %v2208_v58 = vpop.f32.mrb[24].mxu0  ;;  %v1466_v32 = vadd.f32 %v1465_v7, %v1464_v12  ;;  %v1565_v8 = vadd.f32 %v1564_v6, %v1563_v30  ;;  %1752 = vst.msk [vmem:[%s2931_s13 + $0x5c] sm:$0xf] %vm1728_vm10, %v1973_v19  ;;  %v1570_v24 = vsel %vm750_vm7, %v1517_v52, 0.0  ;;  %v1471_v27 = vsel %vm750_vm7, %v2238_v17, 0.0 }
 0x1ba   : > { %v2174_v51 = vpop.f32.mrb[24].mxu1  ;;  %v1363_v60 = vpop.f32.mrb[25].mxu0  ;;  %v1568_v39 = vsel %vm750_vm7, %v1516_v22, 0.0  ;;  %1750 = vst.msk [vmem:[%s2931_s13 + $0x54] sm:$0xf] %vm1728_vm10, %v1971_v14  ;;  %v1572_v49 = vsel %vm750_vm7, %v1518_v18, 0.0 }
 0x1bb   : > { %v2240_v62 = vadd.f32 %v2208_v58, %v2174_v51  ;;  %v1191_v35 = vpop.f32.mrb[25].mxu1  ;;  %v2209_v44 = vpop.f32.mrb[26].mxu0  ;;  %v1567_v16 = vadd.f32 %v1566_v56, %v1565_v8  ;;  %v1468_v53 = vadd.f32 %v1467_v48, %v1466_v32 }
 0x1bc   : > { %v2241_v50 = vadd.f32 %v1363_v60, %v1191_v35  ;;  %v2175_v40 = vpop.f32.mrb[26].mxu1  ;;  %v1366_v41 = vpop.f32.mrb[27].mxu0 }
 0x1bd   : > { %v1976_v29 = vpack.c.bf16 %v2240_v62, %v2240_v62  ;;  %v2242_v15 = vadd.f32 %v2209_v44, %v2175_v40  ;;  %v1194_v21 = vpop.f32.mrb[27].mxu1  ;;  %v1470_v33 = vadd.f32 %v1469_v57, %v1468_v53  ;;  %v1569_v63 = vadd.f32 %v1568_v39, %v1567_v16 }
 0x1be   : > { %v1519_v26 = vmul.f32 %v2241_v50, %v2241_v50  ;;  %v1473_v31 = vsel %vm750_vm7, %v2241_v50, 0.0  ;;  %v1974_v54 = vpack.c.bf16 %v2241_v50, %v2241_v50  ;;  %v1521_v23 = vmul.f32 %v2240_v62, %v2240_v62 }
 0x1bf   : > { %1755 = vst.msk [vmem:[%s2931_s13 + $0x68] sm:$0xf] %vm1728_vm10, %v1976_v29  ;;  %v1571_v2 = vadd.f32 %v1570_v24, %v1569_v63  ;;  %v1472_v45 = vadd.f32 %v1471_v27, %v1470_v33  ;;  %v1977_v0 = vpack.c.bf16 %v2242_v15, %v2242_v15  ;;  %v2243_v11 = vadd.f32 %v1366_v41, %v1194_v21 }
 0x1c0   : > { %v1574_v28 = vsel %vm750_vm7, %v1519_v26, 0.0  ;;  %1753 = vst.msk [vmem:[%s2931_s13 + $0x60] sm:$0xf] %vm1728_vm10, %v1974_v54  ;;  %v1477_v42 = vsel %vm750_vm7, %v2240_v62, 0.0  ;;  %v1578_v20 = vsel %vm750_vm7, %v1521_v23, 0.0  ;;  %v1522_v7 = vmul.f32 %v2242_v15, %v2242_v15 }
 0x1c1   : > { %v2212_v13 = vpop.f32.mrb[28].mxu0  ;;  %v1474_v55 = vadd.f32 %v1473_v31, %v1472_v45  ;;  %v1573_v25 = vadd.f32 %v1572_v49, %v1571_v2  ;;  %1756 = vst.msk [vmem:[%s2931_s13 + $0x6c] sm:$0xf] %vm1728_vm10, %v1977_v0  ;;  %v1475_v43 = vsel %vm750_vm7, %v2243_v11, 0.0  ;;  %v1520_v37 = vmul.f32 %v2243_v11, %v2243_v11 }
 0x1c2   : > { %v2178_v34 = vpop.f32.mrb[28].mxu1  ;;  %v1379_v36 = vpop.f32.mrb[29].mxu0  ;;  %v1975_v38 = vpack.c.bf16 %v2243_v11, %v2243_v11  ;;  %v1479_v30 = vsel %vm750_vm7, %v2242_v15, 0.0  ;;  %v1580_v14 = vsel %vm750_vm7, %v1522_v7, 0.0 }
 0x1c3   : > { %v2244_v46 = vadd.f32 %v2212_v13, %v2178_v34  ;;  %v1207_v61 = vpop.f32.mrb[29].mxu1  ;;  %v2213_v1 = vpop.f32.mrb[30].mxu0  ;;  %v1575_v9 = vadd.f32 %v1574_v28, %v1573_v25  ;;  %v1476_v3 = vadd.f32 %v1475_v43, %v1474_v55  ;;  %v1576_v59 = vsel %vm750_vm7, %v1520_v37, 0.0 }
 0x1c4   : > { %v2245_v4 = vadd.f32 %v1379_v36, %v1207_v61  ;;  %v2179_v10 = vpop.f32.mrb[30].mxu1  ;;  %v1382_v5 = vpop.f32.mrb[31].mxu0  ;;  %1754 = vst.msk [vmem:[%s2931_s13 + $0x64] sm:$0xf] %vm1728_vm10, %v1975_v38 }
 0x1c5   : > { %v1980_v17 = vpack.c.bf16 %v2244_v46, %v2244_v46  ;;  %v1210_v47 = vpop.f32.mrb[31].mxu1  ;;  %v1478_v12 = vadd.f32 %v1477_v42, %v1476_v3  ;;  %v1577_v6 = vadd.f32 %v1576_v59, %v1575_v9  ;;  %v2246_v58 = vadd.f32 %v2213_v1, %v2179_v10 }
 0x1c6   : > { %v1523_v56 = vmul.f32 %v2245_v4, %v2245_v4  ;;  %v1481_v19 = vsel %vm750_vm7, %v2245_v4, 0.0  ;;  %v1978_v48 = vpack.c.bf16 %v2245_v4, %v2245_v4  ;;  %v2247_v32 = vadd.f32 %v1382_v5, %v1210_v47 }
 0x1c7   : > { %1759 = vst.msk [vmem:[%s2931_s13 + $0x78] sm:$0xf] %vm1728_vm10, %v1980_v17  ;;  %v1579_v8 = vadd.f32 %v1578_v20, %v1577_v6  ;;  %v1480_v22 = vadd.f32 %v1479_v30, %v1478_v12  ;;  %v1981_v60 = vpack.c.bf16 %v2246_v58, %v2246_v58  ;;  %v1525_v53 = vmul.f32 %v2244_v46, %v2244_v46 }
 0x1c8   : > { %v1582_v51 = vsel %vm750_vm7, %v1523_v56, 0.0  ;;  %1757 = vst.msk [vmem:[%s2931_s13 + $0x70] sm:$0xf] %vm1728_vm10, %v1978_v48  ;;  %v1483_v52 = vsel %vm750_vm7, %v2247_v32, 0.0  ;;  %v1524_v44 = vmul.f32 %v2247_v32, %v2247_v32  ;;  %v1979_v16 = vpack.c.bf16 %v2247_v32, %v2247_v32 }
 0x1c9   : > { %v1482_v62 = vadd.f32 %v1481_v19, %v1480_v22  ;;  %v1581_v35 = vadd.f32 %v1580_v14, %v1579_v8  ;;  %1760 = vst.msk [vmem:[%s2931_s13 + $0x7c] sm:$0xf] %vm1728_vm10, %v1981_v60  ;;  %v1485_v41 = vsel %vm750_vm7, %v2244_v46, 0.0  ;;  %v1526_v57 = vmul.f32 %v2246_v58, %v2246_v58 }
 0x1ca   : > { %v1584_v40 = vsel %vm750_vm7, %v1524_v44, 0.0  ;;  %1758 = vst.msk [vmem:[%s2931_s13 + $0x74] sm:$0xf] %vm1728_vm10, %v1979_v16  ;;  %v1586_v15 = vsel %vm750_vm7, %v1525_v53, 0.0  ;;  %v1487_v21 = vsel %vm750_vm7, %v2246_v58, 0.0 }
 0x1cb   : > { %v1583_v39 = vadd.f32 %v1582_v51, %v1581_v35  ;;  %v1484_v50 = vadd.f32 %v1483_v52, %v1482_v62  ;;  %v1588_v26 = vsel %vm750_vm7, %v1526_v57, 0.0 }
 0x1cd   : > { %v1486_v18 = vadd.f32 %v1485_v41, %v1484_v50  ;;  %v1585_v29 = vadd.f32 %v1584_v40, %v1583_v39 }
 0x1cf   : > { %v1488_v33 = vadd.f32 %v1487_v21, %v1486_v18  ;;  %v1587_v63 = vadd.f32 %v1586_v15, %v1585_v29 }
 0x1d1   : > { %v1489_v24 = vrot.slane %v1488_v33, 4  ;;  %v1589_v27 = vadd.f32 %v1588_v26, %v1587_v63 }
 0x1d3   : > { %v1490_v31 = vadd.f32 %v1489_v24, %v1488_v33  ;;  %v1590_v54 = vrot.slane %v1589_v27, 4 }
 0x1d5   : > { %v1491_v2 = vrot.slane %v1490_v31, 2  ;;  %v1591_v45 = vadd.f32 %v1590_v54, %v1589_v27 }
 0x1d7   : > { %v1492_v0 = vadd.f32 %v1491_v2, %v1490_v31  ;;  %v1592_v49 = vrot.slane %v1591_v45, 2 }
 0x1d9   : > { %v1493_v23 = vrot.slane %v1492_v0, 1  ;;  %v1593_v28 = vadd.f32 %v1592_v49, %v1591_v45 }
 0x1db   : > { %v1594_v11 = vrot.slane %v1593_v28, 1  ;;  %v1494_v13 = vadd.f32 %v1493_v23, %v1492_v0 }
 0x1dd   : > { %v1595_v55 = vadd.f32 %v1594_v11, %v1593_v28 }
 0x1df   : > { %v1597_v25 = vsel %vm563_vm4, %v1494_v13, %v1595_v55 }
 0x1e0   : > { %1599 = vst.msk [vmem:[%s235_s17] sm:$0x3] %vm1598_vm11, %v1597_v25 }
 0x1e1 PF: > { %s16_s18 = sadd.s32 1, %s2304_s18  }
 0x1e2   : > { %p13_p4 = scmp.ge.s32.totalorder %s16_s18, 4  }
 0x1e4   :  { %15 = sbr.rel (!%p13_p4) target bundleno = 1 (0x1), region = 80 }

</bundles_post_ra>
